<compile_context>
chip_gen: v6e
topology: v6e:2x2x1
jax: 0.10.0
libtpu: 0.0.40
codegen_flags: <defaults>
</compile_context>

<pallas_src>
import functools

import jax
import jax.numpy as jnp
from jax.experimental import pallas as pl
from jax.experimental.pallas import tpu as pltpu


# ----------------------------------------------------------------------------
# Pallas kernel: one grid step = BW windows (R = BW*N rows).
# ----------------------------------------------------------------------------
def _window_attention_kernel(x_ref, wqkv_ref, bqkv_ref, wp_ref, bp_ref,
                             bias_ref, mask_ref, out_ref, qkv_scr,
                             *, num_heads, mxu_dtype, flatten_out):
    BW, N, C = x_ref.shape
    H = num_heads
    hd = C // H
    R = BW * N

    # Fused QKV projection: one full-width matmul, softmax scale already folded into q columns.
    xm = x_ref[...].reshape(R, C)                                        # (R, C), mxu_dtype
    qkv = jnp.dot(xm, wqkv_ref[...], preferred_element_type=jnp.float32) + bqkv_ref[...]
    qkv_scr[...] = qkv.astype(mxu_dtype)                                 # park in VMEM scratch

    mask_f = mask_ref[...].astype(jnp.float32)                           # (Bm, N, N), Bm in {1, BW}

    ctx_heads = []
    for h in range(H):                                                   # static unroll (small H)
        q = qkv_scr[:, h * hd:(h + 1) * hd].reshape(BW, N, hd)
        k = qkv_scr[:, C + h * hd:C + (h + 1) * hd].reshape(BW, N, hd)
        v = qkv_scr[:, 2 * C + h * hd:2 * C + (h + 1) * hd].reshape(BW, N, hd)

        # Scores for all BW windows of this head at once.
        s = jnp.einsum('bqd,bkd->bqk', q, k, preferred_element_type=jnp.float32)  # (BW, N, N)
        s = s + bias_ref[h].astype(jnp.float32) + mask_f

        # f32 softmax; reciprocal goes to the EUP slot.
        s = s - jnp.max(s, axis=-1, keepdims=True)
        e = jnp.exp(s)
        p = e * pl.reciprocal(jnp.sum(e, axis=-1, keepdims=True), approx=True)

        ctx = jnp.einsum('bqk,bkd->bqd', p.astype(mxu_dtype), v,
                         preferred_element_type=jnp.float32)             # (BW, N, hd)
        ctx_heads.append(ctx.reshape(R, hd).astype(mxu_dtype))

    # Fused output projection: single (R, C) @ (C, C) matmul on head-concatenated contexts.
    ctx_full = jnp.concatenate(ctx_heads, axis=-1)                        # (R, C)
    o = jnp.dot(ctx_full, wp_ref[...], preferred_element_type=jnp.float32) + bp_ref[...]

    if flatten_out:
        out_ref[...] = o.reshape(BW, N * C).astype(out_ref.dtype)         # lane-dense flat slab
    else:
        out_ref[...] = o.reshape(BW, N, C).astype(out_ref.dtype)          # C already 128-aligned


def _pick_block_windows(nW, n_batch, N, *, max_rows=2048):
    """Largest BW with BW | nW and BW*N <= max_rows, preferring >=4 (even) total grid steps."""
    cands = [d for d in range(1, nW + 1) if nW % d == 0 and d * N <= max_rows]
    if not cands:
        return 1
    for min_steps, want_even in ((4, True), (2, True), (2, False), (1, False)):
        for d in sorted(cands, reverse=True):
            steps = (nW // d) * n_batch
            if steps >= min_steps and (not want_even or steps % 2 == 0):
                return d
    return max(cands)


def window_attention_pallas(x, mask, wqkv, bqkv, wproj, bproj, rel_bias, num_heads,
                            *, block_windows=None, mxu_dtype=jnp.bfloat16):
    """x: (B_, N, C); mask: (nW, N, N) or None; rel_bias: (num_heads, N, N)."""
    B_, N, C = x.shape
    H = num_heads
    hd = C // H
    scale = hd ** (-0.5)
    assert C % H == 0 and N % 8 == 0

    has_mask = mask is not None
    if has_mask:
        nW = mask.shape[0]
        assert B_ % nW == 0
        n_batch = B_ // nW
    else:
        nW, n_batch = B_, 1            # no per-window mask: BW only has to divide B_

    BW = block_windows if block_windows is not None else _pick_block_windows(nW, n_batch, N)
    assert nW % BW == 0
    nW_blocks = nW // BW
    grid = (nW_blocks, n_batch)        # inner axis = batch: bias/mask block index is constant there
    R = BW * N

    stream_dtype = jnp.float32 if mxu_dtype == jnp.float32 else jnp.bfloat16

    # ---- host-side parameter prep -------------------------------------------------------
    # torch Linear: y = x @ W.T + b ; qkv rows ordered [q | k | v], head-major inside each.
    # Fold the softmax scale into the q slice of the fused weight / bias.
    scale_vec = jnp.concatenate([jnp.full((C,), scale, jnp.float32),
                                 jnp.ones((2 * C,), jnp.float32)])
    w_qkv = (wqkv.astype(jnp.float32).T * scale_vec[None, :]).astype(mxu_dtype)   # (C, 3C)
    b_qkv = (bqkv.astype(jnp.float32) * scale_vec).reshape(1, 3 * C)              # (1, 3C) f32
    w_p = wproj.astype(jnp.float32).T.astype(mxu_dtype)                            # (C, C)
    b_p = bproj.astype(jnp.float32).reshape(1, C)                                  # (1, C)

    bias = rel_bias.astype(stream_dtype)                                           # (H, N, N)
    if has_mask:
        mask_arr = mask.astype(stream_dtype)                                       # (nW, N, N)
        mask_block = BW
        mask_map = lambda i, j: (i, 0, 0)
    else:
        mask_arr = jnp.zeros((1, N, N), stream_dtype)
        mask_block = 1
        mask_map = lambda i, j: (0, 0, 0)

    x_m = x.astype(mxu_dtype)

    flatten_out = (C % 128) != 0
    if flatten_out:
        out_shape = jax.ShapeDtypeStruct((B_, N * C), x.dtype)
        out_spec = pl.BlockSpec((BW, N * C), lambda i, j: (j * nW_blocks + i, 0))
    else:
        out_shape = jax.ShapeDtypeStruct((B_, N, C), x.dtype)
        out_spec = pl.BlockSpec((BW, N, C), lambda i, j: (j * nW_blocks + i, 0, 0))

    # ---- hardware-aware VMEM budget: double-buffered blocks + constants + scratch --------
    isz = jnp.dtype(mxu_dtype).itemsize
    ssz = jnp.dtype(stream_dtype).itemsize
    osz = jnp.dtype(x.dtype).itemsize
    blk_bytes = BW * N * C * isz + BW * N * C * osz + mask_block * N * N * ssz
    const_bytes = (3 * C * C + C * C) * isz + (3 * C + C) * 4 + H * N * N * ssz
    scratch_bytes = R * 3 * C * isz
    est = 2 * (blk_bytes + const_bytes) + scratch_bytes + (8 << 20)
    try:
        info = pltpu.get_tpu_info()
        vmem_cap = int(getattr(info, "vmem_capacity_bytes", 64 << 20))
    except Exception:
        vmem_cap = 64 << 20
    vmem_bytes = int(min(max(est, 32 << 20), int(0.75 * vmem_cap)))

    kernel = functools.partial(_window_attention_kernel, num_heads=H,
                               mxu_dtype=mxu_dtype, flatten_out=flatten_out)
    const2 = lambda i, j: (0, 0)
    const3 = lambda i, j: (0, 0, 0)

    out = pl.pallas_call(
        kernel,
        out_shape=out_shape,
        grid=grid,
        in_specs=[
            pl.BlockSpec((BW, N, C), lambda i, j: (j * nW_blocks + i, 0, 0)),  # x (BW windows)
            pl.BlockSpec((C, 3 * C), const2),                                  # fused qkv weight
            pl.BlockSpec((1, 3 * C), const2),                                  # fused qkv bias
            pl.BlockSpec((C, C), const2),                                      # proj weight
            pl.BlockSpec((1, C), const2),                                      # proj bias
            pl.BlockSpec((H, N, N), const3),                                   # rel-pos bias (resident)
            pl.BlockSpec((mask_block, N, N), mask_map),                        # window mask
        ],
        out_specs=out_spec,
        scratch_shapes=[pltpu.VMEM((R, 3 * C), mxu_dtype)],
        compiler_params=pltpu.CompilerParams(
            dimension_semantics=("parallel", "parallel"),
            vmem_limit_bytes=vmem_bytes),
    )(x_m, w_qkv, b_qkv, w_p, b_p, bias, mask_arr)

    if flatten_out:
        out = out.reshape(B_, N, C)
    return out


# ----------------------------------------------------------------------------
# Glue: relative position index / bias (matches the torch __init__ math).
# ----------------------------------------------------------------------------
def make_relative_position_index(window_size):
    Wh, Ww = window_size
    coords = jnp.stack(jnp.meshgrid(jnp.arange(Wh), jnp.arange(Ww), indexing="ij"))  # (2, Wh, Ww)
    coords_flatten = coords.reshape(2, -1)                                            # (2, N)
    rel = coords_flatten[:, :, None] - coords_flatten[:, None, :]                     # (2, N, N)
    rel = rel.transpose(1, 2, 0)                                                      # (N, N, 2)
    rel = rel.at[:, :, 0].add(Wh - 1)
    rel = rel.at[:, :, 1].add(Ww - 1)
    rel = rel.at[:, :, 0].multiply(2 * Ww - 1)
    return rel.sum(-1)                                                                # (N, N)


def make_relative_position_bias(table, rel_index, num_heads):
    N = rel_index.shape[0]
    bias = table[rel_index.reshape(-1)].reshape(N, N, num_heads)
    return bias.transpose(2, 0, 1)                                                    # (H, N, N)


# ----------------------------------------------------------------------------
# Pure-JAX reference (mirrors the torch forward) for verification.
# ----------------------------------------------------------------------------
def reference(x, mask, wqkv, bqkv, wproj, bproj, rel_bias, num_heads):
    B_, N, C = x.shape
    hd = C // num_heads
    scale = hd ** (-0.5)
    qkv = (x @ wqkv.T + bqkv).reshape(B_, N, 3, num_heads, hd).transpose(2, 0, 3, 1, 4)
    q, k, v = qkv[0], qkv[1], qkv[2]
    q = q * scale
    attn = q @ jnp.swapaxes(k, -2, -1)                       # (B_, H, N, N)
    attn = attn + rel_bias[None]
    if mask is not None:
        nW = mask.shape[0]
        attn = attn.reshape(B_ // nW, nW, num_heads, N, N) + mask[None, :, None]
        attn = attn.reshape(-1, num_heads, N, N)
    attn = jax.nn.softmax(attn, axis=-1)
    out = (attn @ v).transpose(0, 2, 1, 3).reshape(B_, N, C)
    return out @ wproj.T + bproj


if __name__ == "__main__":
    # Small, module-consistent shapes (head_dim = 32, as in real Swin stages).
    dim = 128
    window_size = (8, 8)
    num_heads = 4
    N = window_size[0] * window_size[1]          # 64
    batch = 2
    nW = 4
    B_ = batch * nW                              # 8

    key = jax.random.PRNGKey(0)
    ks = jax.random.split(key, 7)

    x = jax.random.normal(ks[0], (B_, N, dim), dtype=jnp.float32)
    # 0 / -100 shifted-window style mask.
    mask = jnp.where(jax.random.bernoulli(ks[1], 0.5, (nW, N, N)),
                     0.0, -100.0).astype(jnp.float32)

    # Deterministic parameter init (shapes from the module's __init__).
    wqkv = jax.random.normal(ks[2], (3 * dim, dim), dtype=jnp.float32) * 0.02
    bqkv = jax.random.normal(ks[3], (3 * dim,), dtype=jnp.float32) * 0.02
    wproj = jax.random.normal(ks[4], (dim, dim), dtype=jnp.float32) * 0.02
    bproj = jax.random.normal(ks[5], (dim,), dtype=jnp.float32) * 0.02
    table = jax.random.normal(
        ks[6], ((2 * window_size[0] - 1) * (2 * window_size[1] - 1), num_heads),
        dtype=jnp.float32) * 0.02

    rel_index = make_relative_position_index(window_size)
    rel_bias = make_relative_position_bias(table, rel_index, num_heads)

    ref = reference(x, mask, wqkv, bqkv, wproj, bproj, rel_bias, num_heads)

    # f32-MXU run: tight check against the pure-JAX reference (only approx-reciprocal error).
    out_f32 = window_attention_pallas(x, mask, wqkv, bqkv, wproj, bproj, rel_bias,
                                      num_heads, mxu_dtype=jnp.float32)
    out_f32 = jax.block_until_ready(out_f32)
    if not jnp.allclose(out_f32, ref, atol=1e-3, rtol=1e-3):
        raise AssertionError("f32 Pallas kernel mismatch, max err %e"
                             % float(jnp.max(jnp.abs(out_f32 - ref))))

    # Default bf16-MXU run (v6e/v7x fast path): looser tolerance for bf16 operands.
    out_bf16 = window_attention_pallas(x, mask, wqkv, bqkv, wproj, bproj, rel_bias, num_heads)
    out_bf16 = jax.block_until_ready(out_bf16)
    if not jnp.allclose(out_bf16, ref, atol=1e-2, rtol=5e-2):
        raise AssertionError("bf16 Pallas kernel mismatch, max err %e"
                             % float(jnp.max(jnp.abs(out_bf16 - ref))))

    # mask=None path (W-MSA, no shift): exercises the constant zero-mask block and free BW choice.
    ref_nm = reference(x, None, wqkv, bqkv, wproj, bproj, rel_bias, num_heads)
    out_nm = window_attention_pallas(x, None, wqkv, bqkv, wproj, bproj, rel_bias,
                                     num_heads, mxu_dtype=jnp.float32)
    out_nm = jax.block_until_ready(out_nm)
    if not jnp.allclose(out_nm, ref_nm, atol=1e-3, rtol=1e-3):
        raise AssertionError("mask=None Pallas kernel mismatch, max err %e"
                             % float(jnp.max(jnp.abs(out_nm - ref_nm))))

    print("KERNEL_OK")
</pallas_src>

<mosaic_0001>
module attributes {stable_mosaic.version = 11 : i64} {
  func.func @_window_attention_kernel(%arg0: i32, %arg1: i32, %arg2: memref<2x64x128xf32, #tpu.memory_space<vmem>>, %arg3: memref<128x384xf32, #tpu.memory_space<vmem>>, %arg4: memref<1x384xf32, #tpu.memory_space<vmem>>, %arg5: memref<128x128xf32, #tpu.memory_space<vmem>>, %arg6: memref<1x128xf32, #tpu.memory_space<vmem>>, %arg7: memref<4x64x64xf32, #tpu.memory_space<vmem>>, %arg8: memref<2x64x64xf32, #tpu.memory_space<vmem>>, %arg9: memref<2x64x128xf32, #tpu.memory_space<vmem>>, %arg10: memref<128x384xf32, #tpu.memory_space<vmem>>) attributes {dimension_semantics = [#tpu.dimension_semantics<parallel>, #tpu.dimension_semantics<parallel>], iteration_bounds = array<i64: 2, 2>, scalar_prefetch = 0 : i64, scratch_operands = 1 : i64, tpu.core_type = #tpu.core_type<tc>, window_params = [{transform_indices = @transform_0, window_bounds = array<i64: 2, 64, 128>}, {pipeline_mode = #tpu.pipeline_mode<synchronous>, transform_indices = @transform_1, window_bounds = array<i64: 128, 384>}, {pipeline_mode = #tpu.pipeline_mode<synchronous>, transform_indices = @transform_2, window_bounds = array<i64: 1, 384>}, {pipeline_mode = #tpu.pipeline_mode<synchronous>, transform_indices = @transform_3, window_bounds = array<i64: 128, 128>}, {pipeline_mode = #tpu.pipeline_mode<synchronous>, transform_indices = @transform_4, window_bounds = array<i64: 1, 128>}, {pipeline_mode = #tpu.pipeline_mode<synchronous>, transform_indices = @transform_5, window_bounds = array<i64: 4, 64, 64>}, {transform_indices = @transform_6, window_bounds = array<i64: 2, 64, 64>}, {transform_indices = @transform_7, window_bounds = array<i64: 2, 64, 128>}]} {
    %c0 = arith.constant 0 : index
    %c0_0 = arith.constant 0 : index
    %c0_1 = arith.constant 0 : index
    %0 = vector.load %arg2[%c0, %c0_0, %c0_1] : memref<2x64x128xf32, #tpu.memory_space<vmem>>, vector<2x64x128xf32>
    %1 = vector.shape_cast %0 : vector<2x64x128xf32> to vector<128x128xf32>
    %c0_2 = arith.constant 0 : index
    %c0_3 = arith.constant 0 : index
    %2 = vector.load %arg3[%c0_2, %c0_3] : memref<128x384xf32, #tpu.memory_space<vmem>>, vector<128x384xf32>
    %cst = arith.constant dense<0.000000e+00> : vector<128x384xf32>
    %3 = tpu.matmul %1, %2, %cst {dimension_numbers = #tpu.dot_dimension_numbers<[1], [0], [0], [1], [0, 0, 1, 1], [], []>} : vector<128x128xf32>, vector<128x384xf32>, vector<128x384xf32> -> vector<128x384xf32>
    %c0_4 = arith.constant 0 : index
    %c0_5 = arith.constant 0 : index
    %4 = vector.load %arg4[%c0_4, %c0_5] : memref<1x384xf32, #tpu.memory_space<vmem>>, vector<1x384xf32>
    %5 = vector.broadcast %4 : vector<1x384xf32> to vector<128x384xf32>
    %6 = arith.addf %3, %5 : vector<128x384xf32>
    %c0_6 = arith.constant 0 : index
    %c0_7 = arith.constant 0 : index
    %7 = vector.load %arg10[%c0_6, %c0_7] : memref<128x384xf32, #tpu.memory_space<vmem>>, vector<128x384xf32>
    tpu.vector_store %arg10[%c0_6, %c0_7], %6 {strides = array<i32>} : memref<128x384xf32, #tpu.memory_space<vmem>>, vector<128x384xf32>,
    %c0_8 = arith.constant 0 : index
    %c0_9 = arith.constant 0 : index
    %c0_10 = arith.constant 0 : index
    %8 = vector.load %arg8[%c0_8, %c0_9, %c0_10] : memref<2x64x64xf32, #tpu.memory_space<vmem>>, vector<2x64x64xf32>
    %c0_11 = arith.constant 0 : index
    %c0_12 = arith.constant 0 : index
    %9 = vector.load %arg10[%c0_11, %c0_12] : memref<128x384xf32, #tpu.memory_space<vmem>>, vector<128x32xf32>
    %10 = vector.shape_cast %9 : vector<128x32xf32> to vector<2x64x32xf32>
    %c0_13 = arith.constant 0 : index
    %c128 = arith.constant 128 : index
    %11 = vector.load %arg10[%c0_13, %c128] : memref<128x384xf32, #tpu.memory_space<vmem>>, vector<128x32xf32>
    %12 = vector.shape_cast %11 : vector<128x32xf32> to vector<2x64x32xf32>
    %c0_14 = arith.constant 0 : index
    %c256 = arith.constant 256 : index
    %13 = vector.load %arg10[%c0_14, %c256] : memref<128x384xf32, #tpu.memory_space<vmem>>, vector<128x32xf32>
    %14 = vector.shape_cast %13 : vector<128x32xf32> to vector<2x64x32xf32>
    "tpu.trace_start"() <{level = 10 : i32, message = "bqd,bkd->bqk"}> : () -> ()
    %cst_15 = arith.constant dense<0.000000e+00> : vector<2x64x64xf32>
    %15 = tpu.matmul %10, %12, %cst_15 {dimension_numbers = #tpu.dot_dimension_numbers<[2], [2], [1], [1], [0, 0, 0, 1, 1, 1], [0], [0]>} : vector<2x64x32xf32>, vector<2x64x32xf32>, vector<2x64x64xf32> -> vector<2x64x64xf32>
    "tpu.trace_stop"() : () -> ()
    %c0_16 = arith.constant 0 : index
    %c0_17 = arith.constant 0 : index
    %c0_18 = arith.constant 0 : index
    %16 = vector.load %arg7[%c0_16, %c0_17, %c0_18] : memref<4x64x64xf32, #tpu.memory_space<vmem>>, vector<1x64x64xf32>
    %17 = vector.shape_cast %16 : vector<1x64x64xf32> to vector<64x64xf32>
    %18 = vector.shape_cast %17 : vector<64x64xf32> to vector<1x64x64xf32>
    %19 = vector.broadcast %18 : vector<1x64x64xf32> to vector<2x64x64xf32>
    %20 = arith.addf %15, %19 : vector<2x64x64xf32>
    %21 = arith.addf %20, %8 : vector<2x64x64xf32>
    %cst_19 = arith.constant dense<0xFF800000> : vector<2x64xf32>
    %22 = vector.multi_reduction <maximumf>, %21, %cst_19 [2] : vector<2x64x64xf32> to vector<2x64xf32>
    %23 = vector.shape_cast %22 : vector<2x64xf32> to vector<2x64x1xf32>
    %24 = vector.broadcast %23 : vector<2x64x1xf32> to vector<2x64x64xf32>
    %25 = arith.subf %21, %24 : vector<2x64x64xf32>
    %26 = math.exp %25 : vector<2x64x64xf32>
    %cst_20 = arith.constant dense<0.000000e+00> : vector<2x64xf32>
    %27 = vector.multi_reduction <add>, %26, %cst_20 [2] : vector<2x64x64xf32> to vector<2x64xf32>
    %28 = vector.shape_cast %27 : vector<2x64xf32> to vector<2x64x1xf32>
    %29 = tpu.reciprocal %28 {approx = true} : vector<2x64x1xf32> -> vector<2x64x1xf32>
    %30 = vector.broadcast %29 : vector<2x64x1xf32> to vector<2x64x64xf32>
    %31 = arith.mulf %26, %30 : vector<2x64x64xf32>
    "tpu.trace_start"() <{level = 10 : i32, message = "bqk,bkd->bqd"}> : () -> ()
    %cst_21 = arith.constant dense<0.000000e+00> : vector<2x64x32xf32>
    %32 = tpu.matmul %31, %14, %cst_21 {dimension_numbers = #tpu.dot_dimension_numbers<[2], [1], [1], [2], [0, 0, 0, 1, 1, 2], [0], [0]>} : vector<2x64x64xf32>, vector<2x64x32xf32>, vector<2x64x32xf32> -> vector<2x64x32xf32>
    "tpu.trace_stop"() : () -> ()
    %33 = vector.shape_cast %32 : vector<2x64x32xf32> to vector<128x32xf32>
    %c0_22 = arith.constant 0 : index
    %c32 = arith.constant 32 : index
    %34 = vector.load %arg10[%c0_22, %c32] : memref<128x384xf32, #tpu.memory_space<vmem>>, vector<128x32xf32>
    %35 = vector.shape_cast %34 : vector<128x32xf32> to vector<2x64x32xf32>
    %c0_23 = arith.constant 0 : index
    %c160 = arith.constant 160 : index
    %36 = vector.load %arg10[%c0_23, %c160] : memref<128x384xf32, #tpu.memory_space<vmem>>, vector<128x32xf32>
    %37 = vector.shape_cast %36 : vector<128x32xf32> to vector<2x64x32xf32>
    %c0_24 = arith.constant 0 : index
    %c288 = arith.constant 288 : index
    %38 = vector.load %arg10[%c0_24, %c288] : memref<128x384xf32, #tpu.memory_space<vmem>>, vector<128x32xf32>
    %39 = vector.shape_cast %38 : vector<128x32xf32> to vector<2x64x32xf32>
    "tpu.trace_start"() <{level = 10 : i32, message = "bqd,bkd->bqk"}> : () -> ()
    %cst_25 = arith.constant dense<0.000000e+00> : vector<2x64x64xf32>
    %40 = tpu.matmul %35, %37, %cst_25 {dimension_numbers = #tpu.dot_dimension_numbers<[2], [2], [1], [1], [0, 0, 0, 1, 1, 1], [0], [0]>} : vector<2x64x32xf32>, vector<2x64x32xf32>, vector<2x64x64xf32> -> vector<2x64x64xf32>
    "tpu.trace_stop"() : () -> ()
    %c1 = arith.constant 1 : index
    %c0_26 = arith.constant 0 : index
    %c0_27 = arith.constant 0 : index
    %41 = vector.load %arg7[%c1, %c0_26, %c0_27] : memref<4x64x64xf32, #tpu.memory_space<vmem>>, vector<1x64x64xf32>
    %42 = vector.shape_cast %41 : vector<1x64x64xf32> to vector<64x64xf32>
    %43 = vector.shape_cast %42 : vector<64x64xf32> to vector<1x64x64xf32>
    %44 = vector.broadcast %43 : vector<1x64x64xf32> to vector<2x64x64xf32>
    %45 = arith.addf %40, %44 : vector<2x64x64xf32>
    %46 = arith.addf %45, %8 : vector<2x64x64xf32>
    %cst_28 = arith.constant dense<0xFF800000> : vector<2x64xf32>
    %47 = vector.multi_reduction <maximumf>, %46, %cst_28 [2] : vector<2x64x64xf32> to vector<2x64xf32>
    %48 = vector.shape_cast %47 : vector<2x64xf32> to vector<2x64x1xf32>
    %49 = vector.broadcast %48 : vector<2x64x1xf32> to vector<2x64x64xf32>
    %50 = arith.subf %46, %49 : vector<2x64x64xf32>
    %51 = math.exp %50 : vector<2x64x64xf32>
    %cst_29 = arith.constant dense<0.000000e+00> : vector<2x64xf32>
    %52 = vector.multi_reduction <add>, %51, %cst_29 [2] : vector<2x64x64xf32> to vector<2x64xf32>
    %53 = vector.shape_cast %52 : vector<2x64xf32> to vector<2x64x1xf32>
    %54 = tpu.reciprocal %53 {approx = true} : vector<2x64x1xf32> -> vector<2x64x1xf32>
    %55 = vector.broadcast %54 : vector<2x64x1xf32> to vector<2x64x64xf32>
    %56 = arith.mulf %51, %55 : vector<2x64x64xf32>
    "tpu.trace_start"() <{level = 10 : i32, message = "bqk,bkd->bqd"}> : () -> ()
    %cst_30 = arith.constant dense<0.000000e+00> : vector<2x64x32xf32>
    %57 = tpu.matmul %56, %39, %cst_30 {dimension_numbers = #tpu.dot_dimension_numbers<[2], [1], [1], [2], [0, 0, 0, 1, 1, 2], [0], [0]>} : vector<2x64x64xf32>, vector<2x64x32xf32>, vector<2x64x32xf32> -> vector<2x64x32xf32>
    "tpu.trace_stop"() : () -> ()
    %58 = vector.shape_cast %57 : vector<2x64x32xf32> to vector<128x32xf32>
    %c0_31 = arith.constant 0 : index
    %c64 = arith.constant 64 : index
    %59 = vector.load %arg10[%c0_31, %c64] : memref<128x384xf32, #tpu.memory_space<vmem>>, vector<128x32xf32>
    %60 = vector.shape_cast %59 : vector<128x32xf32> to vector<2x64x32xf32>
    %c0_32 = arith.constant 0 : index
    %c192 = arith.constant 192 : index
    %61 = vector.load %arg10[%c0_32, %c192] : memref<128x384xf32, #tpu.memory_space<vmem>>, vector<128x32xf32>
    %62 = vector.shape_cast %61 : vector<128x32xf32> to vector<2x64x32xf32>
    %c0_33 = arith.constant 0 : index
    %c320 = arith.constant 320 : index
    %63 = vector.load %arg10[%c0_33, %c320] : memref<128x384xf32, #tpu.memory_space<vmem>>, vector<128x32xf32>
    %64 = vector.shape_cast %63 : vector<128x32xf32> to vector<2x64x32xf32>
    "tpu.trace_start"() <{level = 10 : i32, message = "bqd,bkd->bqk"}> : () -> ()
    %cst_34 = arith.constant dense<0.000000e+00> : vector<2x64x64xf32>
    %65 = tpu.matmul %60, %62, %cst_34 {dimension_numbers = #tpu.dot_dimension_numbers<[2], [2], [1], [1], [0, 0, 0, 1, 1, 1], [0], [0]>} : vector<2x64x32xf32>, vector<2x64x32xf32>, vector<2x64x64xf32> -> vector<2x64x64xf32>
    "tpu.trace_stop"() : () -> ()
    %c2 = arith.constant 2 : index
    %c0_35 = arith.constant 0 : index
    %c0_36 = arith.constant 0 : index
    %66 = vector.load %arg7[%c2, %c0_35, %c0_36] : memref<4x64x64xf32, #tpu.memory_space<vmem>>, vector<1x64x64xf32>
    %67 = vector.shape_cast %66 : vector<1x64x64xf32> to vector<64x64xf32>
    %68 = vector.shape_cast %67 : vector<64x64xf32> to vector<1x64x64xf32>
    %69 = vector.broadcast %68 : vector<1x64x64xf32> to vector<2x64x64xf32>
    %70 = arith.addf %65, %69 : vector<2x64x64xf32>
    %71 = arith.addf %70, %8 : vector<2x64x64xf32>
    %cst_37 = arith.constant dense<0xFF800000> : vector<2x64xf32>
    %72 = vector.multi_reduction <maximumf>, %71, %cst_37 [2] : vector<2x64x64xf32> to vector<2x64xf32>
    %73 = vector.shape_cast %72 : vector<2x64xf32> to vector<2x64x1xf32>
    %74 = vector.broadcast %73 : vector<2x64x1xf32> to vector<2x64x64xf32>
    %75 = arith.subf %71, %74 : vector<2x64x64xf32>
    %76 = math.exp %75 : vector<2x64x64xf32>
    %cst_38 = arith.constant dense<0.000000e+00> : vector<2x64xf32>
    %77 = vector.multi_reduction <add>, %76, %cst_38 [2] : vector<2x64x64xf32> to vector<2x64xf32>
    %78 = vector.shape_cast %77 : vector<2x64xf32> to vector<2x64x1xf32>
    %79 = tpu.reciprocal %78 {approx = true} : vector<2x64x1xf32> -> vector<2x64x1xf32>
    %80 = vector.broadcast %79 : vector<2x64x1xf32> to vector<2x64x64xf32>
    %81 = arith.mulf %76, %80 : vector<2x64x64xf32>
    "tpu.trace_start"() <{level = 10 : i32, message = "bqk,bkd->bqd"}> : () -> ()
    %cst_39 = arith.constant dense<0.000000e+00> : vector<2x64x32xf32>
    %82 = tpu.matmul %81, %64, %cst_39 {dimension_numbers = #tpu.dot_dimension_numbers<[2], [1], [1], [2], [0, 0, 0, 1, 1, 2], [0], [0]>} : vector<2x64x64xf32>, vector<2x64x32xf32>, vector<2x64x32xf32> -> vector<2x64x32xf32>
    "tpu.trace_stop"() : () -> ()
    %83 = vector.shape_cast %82 : vector<2x64x32xf32> to vector<128x32xf32>
    %c0_40 = arith.constant 0 : index
    %c96 = arith.constant 96 : index
    %84 = vector.load %arg10[%c0_40, %c96] : memref<128x384xf32, #tpu.memory_space<vmem>>, vector<128x32xf32>
    %85 = vector.shape_cast %84 : vector<128x32xf32> to vector<2x64x32xf32>
    %c0_41 = arith.constant 0 : index
    %c224 = arith.constant 224 : index
    %86 = vector.load %arg10[%c0_41, %c224] : memref<128x384xf32, #tpu.memory_space<vmem>>, vector<128x32xf32>
    %87 = vector.shape_cast %86 : vector<128x32xf32> to vector<2x64x32xf32>
    %c0_42 = arith.constant 0 : index
    %c352 = arith.constant 352 : index
    %88 = vector.load %arg10[%c0_42, %c352] : memref<128x384xf32, #tpu.memory_space<vmem>>, vector<128x32xf32>
    %89 = vector.shape_cast %88 : vector<128x32xf32> to vector<2x64x32xf32>
    "tpu.trace_start"() <{level = 10 : i32, message = "bqd,bkd->bqk"}> : () -> ()
    %cst_43 = arith.constant dense<0.000000e+00> : vector<2x64x64xf32>
    %90 = tpu.matmul %85, %87, %cst_43 {dimension_numbers = #tpu.dot_dimension_numbers<[2], [2], [1], [1], [0, 0, 0, 1, 1, 1], [0], [0]>} : vector<2x64x32xf32>, vector<2x64x32xf32>, vector<2x64x64xf32> -> vector<2x64x64xf32>
    "tpu.trace_stop"() : () -> ()
    %c3 = arith.constant 3 : index
    %c0_44 = arith.constant 0 : index
    %c0_45 = arith.constant 0 : index
    %91 = vector.load %arg7[%c3, %c0_44, %c0_45] : memref<4x64x64xf32, #tpu.memory_space<vmem>>, vector<1x64x64xf32>
    %92 = vector.shape_cast %91 : vector<1x64x64xf32> to vector<64x64xf32>
    %93 = vector.shape_cast %92 : vector<64x64xf32> to vector<1x64x64xf32>
    %94 = vector.broadcast %93 : vector<1x64x64xf32> to vector<2x64x64xf32>
    %95 = arith.addf %90, %94 : vector<2x64x64xf32>
    %96 = arith.addf %95, %8 : vector<2x64x64xf32>
    %cst_46 = arith.constant dense<0xFF800000> : vector<2x64xf32>
    %97 = vector.multi_reduction <maximumf>, %96, %cst_46 [2] : vector<2x64x64xf32> to vector<2x64xf32>
    %98 = vector.shape_cast %97 : vector<2x64xf32> to vector<2x64x1xf32>
    %99 = vector.broadcast %98 : vector<2x64x1xf32> to vector<2x64x64xf32>
    %100 = arith.subf %96, %99 : vector<2x64x64xf32>
    %101 = math.exp %100 : vector<2x64x64xf32>
    %cst_47 = arith.constant dense<0.000000e+00> : vector<2x64xf32>
    %102 = vector.multi_reduction <add>, %101, %cst_47 [2] : vector<2x64x64xf32> to vector<2x64xf32>
    %103 = vector.shape_cast %102 : vector<2x64xf32> to vector<2x64x1xf32>
    %104 = tpu.reciprocal %103 {approx = true} : vector<2x64x1xf32> -> vector<2x64x1xf32>
    %105 = vector.broadcast %104 : vector<2x64x1xf32> to vector<2x64x64xf32>
    %106 = arith.mulf %101, %105 : vector<2x64x64xf32>
    "tpu.trace_start"() <{level = 10 : i32, message = "bqk,bkd->bqd"}> : () -> ()
    %cst_48 = arith.constant dense<0.000000e+00> : vector<2x64x32xf32>
    %107 = tpu.matmul %106, %89, %cst_48 {dimension_numbers = #tpu.dot_dimension_numbers<[2], [1], [1], [2], [0, 0, 0, 1, 1, 2], [0], [0]>} : vector<2x64x64xf32>, vector<2x64x32xf32>, vector<2x64x32xf32> -> vector<2x64x32xf32>
    "tpu.trace_stop"() : () -> ()
    %108 = vector.shape_cast %107 : vector<2x64x32xf32> to vector<128x32xf32>
    %109 = tpu.concatenate %33, %58, %83, %108 in 1 : vector<128x32xf32>, vector<128x32xf32>, vector<128x32xf32>, vector<128x32xf32> -> vector<128x128xf32>
    %c0_49 = arith.constant 0 : index
    %c0_50 = arith.constant 0 : index
    %110 = vector.load %arg5[%c0_49, %c0_50] : memref<128x128xf32, #tpu.memory_space<vmem>>, vector<128x128xf32>
    %cst_51 = arith.constant dense<0.000000e+00> : vector<128x128xf32>
    %111 = tpu.matmul %109, %110, %cst_51 {dimension_numbers = #tpu.dot_dimension_numbers<[1], [0], [0], [1], [0, 0, 1, 1], [], []>} : vector<128x128xf32>, vector<128x128xf32>, vector<128x128xf32> -> vector<128x128xf32>
    %c0_52 = arith.constant 0 : index
    %c0_53 = arith.constant 0 : index
    %112 = vector.load %arg6[%c0_52, %c0_53] : memref<1x128xf32, #tpu.memory_space<vmem>>, vector<1x128xf32>
    %113 = vector.broadcast %112 : vector<1x128xf32> to vector<128x128xf32>
    %114 = arith.addf %111, %113 : vector<128x128xf32>
    %115 = vector.shape_cast %114 : vector<128x128xf32> to vector<2x64x128xf32>
    %c0_54 = arith.constant 0 : index
    %c0_55 = arith.constant 0 : index
    %c0_56 = arith.constant 0 : index
    %116 = vector.load %arg9[%c0_54, %c0_55, %c0_56] : memref<2x64x128xf32, #tpu.memory_space<vmem>>, vector<2x64x128xf32>
    tpu.vector_store %arg9[%c0_54, %c0_55, %c0_56], %115 {strides = array<i32>} : memref<2x64x128xf32, #tpu.memory_space<vmem>>, vector<2x64x128xf32>,
    return
  }
  func.func @transform_0(%arg0: i32, %arg1: i32) -> (i32, i32, i32) {
    %c2_i32 = arith.constant 2 : i32
    %0 = arith.muli %arg1, %c2_i32 : i32
    %1 = arith.addi %0, %arg0 : i32
    %c0_i32 = arith.constant 0 : i32
    %c0_i32_0 = arith.constant 0 : i32
    %c0_i32_1 = arith.constant 0 : i32
    return %1, %c0_i32, %c0_i32_0 : i32, i32, i32
  }
  func.func @transform_1(%arg0: i32, %arg1: i32) -> (i32, i32) {
    %c0_i32 = arith.constant 0 : i32
    %c0_i32_0 = arith.constant 0 : i32
    %c0_i32_1 = arith.constant 0 : i32
    return %c0_i32, %c0_i32_0 : i32, i32
  }
  func.func @transform_2(%arg0: i32, %arg1: i32) -> (i32, i32) {
    %c0_i32 = arith.constant 0 : i32
    %c0_i32_0 = arith.constant 0 : i32
    %c0_i32_1 = arith.constant 0 : i32
    return %c0_i32, %c0_i32_0 : i32, i32
  }
  func.func @transform_3(%arg0: i32, %arg1: i32) -> (i32, i32) {
    %c0_i32 = arith.constant 0 : i32
    %c0_i32_0 = arith.constant 0 : i32
    %c0_i32_1 = arith.constant 0 : i32
    return %c0_i32, %c0_i32_0 : i32, i32
  }
  func.func @transform_4(%arg0: i32, %arg1: i32) -> (i32, i32) {
    %c0_i32 = arith.constant 0 : i32
    %c0_i32_0 = arith.constant 0 : i32
    %c0_i32_1 = arith.constant 0 : i32
    return %c0_i32, %c0_i32_0 : i32, i32
  }
  func.func @transform_5(%arg0: i32, %arg1: i32) -> (i32, i32, i32) {
    %c0_i32 = arith.constant 0 : i32
    %c0_i32_0 = arith.constant 0 : i32
    %c0_i32_1 = arith.constant 0 : i32
    %c0_i32_2 = arith.constant 0 : i32
    return %c0_i32, %c0_i32_0, %c0_i32_1 : i32, i32, i32
  }
  func.func @transform_6(%arg0: i32, %arg1: i32) -> (i32, i32, i32) {
    %c0_i32 = arith.constant 0 : i32
    %c0_i32_0 = arith.constant 0 : i32
    %c0_i32_1 = arith.constant 0 : i32
    return %arg0, %c0_i32, %c0_i32_0 : i32, i32, i32
  }
  func.func @transform_7(%arg0: i32, %arg1: i32) -> (i32, i32, i32) {
    %c2_i32 = arith.constant 2 : i32
    %0 = arith.muli %arg1, %c2_i32 : i32
    %1 = arith.addi %0, %arg0 : i32
    %c0_i32 = arith.constant 0 : i32
    %c0_i32_0 = arith.constant 0 : i32
    %c0_i32_1 = arith.constant 0 : i32
    return %1, %c0_i32, %c0_i32_0 : i32, i32, i32
  }
}

</mosaic_0001>

<bundles_post_ra>
// kernel: tpu_custom_call.1
= control target key start
LH: loop header
LB: loop body
LE: loop exit
PB: predicated region body
PF: predicated region fallthrough
CT: control target
= control target key end

     0   :  { %s9581_s0 = inlined_call_operand.hbm [shape: f32[8,64,128], index: 0, kind: input, shape index: {}]   ;;  %s9582_s1 = inlined_call_operand.hbm [shape: f32[128,384], index: 1, kind: input, shape index: {}]   ;;  %s9583_s2 = inlined_call_operand.vmem [shape: f32[1,384], index: 2, kind: input, shape index: {}]   ;;  %s9584_s3 = inlined_call_operand.hbm [shape: f32[128,128], index: 3, kind: input, shape index: {}]   ;;  %s9585_s4 = inlined_call_operand.vmem [shape: f32[1,128], index: 4, kind: input, shape index: {}]   ;;  %s9586_s5 = inlined_call_operand.hbm [shape: f32[4,64,64], index: 5, kind: input, shape index: {}]   ;;  %s9587_s6 = inlined_call_operand.hbm [shape: f32[4,64,64], index: 6, kind: input, shape index: {}]   ;;  %s9588_s7 = inlined_call_operand.hbm [shape: f32[8,64,128], index: 7, kind: output, shape index: {}]  }
   0x1   :  { %9702 = sst [smem:[#allocation92_spill]] %s9582_s1 }
   0x2   :  { %9703 = sst [smem:[#allocation93_spill]] %s9583_s2 }
   0x3   :  { %9704 = sst [smem:[#allocation94_spill]] %s9585_s4 }
   0x4   :  { %9705 = sst [smem:[#allocation95_spill]] %s9588_s7 }
   0x5   :  { %12 = vsyncpa [#allocation4], 0 }
   0x6   :  { %14 = vsyncpa [#allocation4 + $0x1], 0 }
   0x7   :  { %15 = vsyncpa [#allocation7], 0 }
   0x8   :  { %16 = vsyncpa [#allocation10], 0 }
   0x9   :  { %17 = vsyncpa [#allocation5], 0 }
   0xa   :  { %19 = vsyncpa [#allocation5 + $0x1], 0  ;;  %s7091_s24 = smov 0   ;;  %s7093_s25 = smov 0  }
   0xb   :  { %s7095_s26 = smov 0   ;;  %s7097_s27 = smov 0  }
   0xc   :  { %s7099_s28 = smov 0   ;;  %s7101_s29 = smov 0  }
   0xd   :  { %s7103_s30 = smov 0   ;;  %s7105_s8 = smov 0  }
   0xe   :  { %s7107_s9 = smov 0   ;;  %s7109_s10 = smov 0  }
   0xf   :  { %s7111_s11 = smov 0  }
  0x10 LB: > { %9706 = sst [smem:[#allocation18_spill]] %s7005_s27  ;;  %s7145_s12 = sadd.s32 4294967295, %s7033_s11   ;;  %s7033_s11 = sphi %s7111_s11, %s25_s11   ;;  %s7029_s10 = sphi %s7109_s10, %s9947_s10   ;;  %s7025_s9 = sphi %s7107_s9, %s9939_s9   ;;  %s7021_s8 = sphi %s7105_s8, %s9946_s8   ;;  %s7017_s30 = sphi %s7103_s30, %s9938_s30   ;;  %s7013_s29 = sphi %s7101_s29, %s9945_s29   ;;  %s7009_s28 = sphi %s7099_s28, %s9944_s28   ;;  %s7005_s27 = sphi %s7097_s27, %s9943_s27   ;;  %s7001_s26 = sphi %s7095_s26, %s9942_s26   ;;  %s6997_s25 = sphi %s7093_s25, %s9941_s25   ;;  %s6993_s24 = sphi %s7091_s24, %s9940_s24  }
  0x11   : > { %9707 = sst [smem:[#allocation19_spill]] %s7017_s30  ;;  %s5077_s13 = sadd.s32 4294967294, %s7033_s11  }
  0x12   : > { %9708 = sst [smem:[#allocation20_spill]] %s7021_s8  ;;  %p61_p0 = scmp.ne.s32.totalorder %s7009_s28, %s7005_s27 }
  0x13   : > { %9709 = sst [smem:[#allocation21_spill]] %s7025_s9  ;;  %p9600_p1 = scmp.eq.s32.totalorder %s7145_s12, 0 }
  0x14   : > { %p192_p2 = scmp.ne.s32.totalorder %s6997_s25, %s6993_s24  ;;  %p226_p5 = scmp.eq.s32.totalorder %s5077_s13, 3 }
  0x15   : > { %p7155_p4 = por %p9600_p1, %p61_p0  ;;  %p5082_p7 = scmp.ge.s32.totalorder %s7033_s11, 1 }
  0x16   : > { %p7161_p6 = por %p192_p2, %p9600_p1  ;;  %p7166_p8 = por %p226_p5, %p61_p0 }
  0x17   : > { %s9710_s14 = scalar_select %p7155_p4, 1, 0 }
  0x18   : > { %s9712_s15 = scalar_select %p7161_p6, 1, 0 }
  0x19   : > { %9711 = sst [smem:[#allocation22_spill]] %s9710_s14  ;;  %p233_p9 = scmp.lt.s32.totalorder %s7033_s11, 5 }
  0x1a   : > { %9713 = sst [smem:[#allocation23_spill]] %s9712_s15  ;;  %s7035_s18 = smov [#allocation6]  }
  0x1b   : > { %s9714_s16 = scalar_select %p7166_p8, 1, 0 }
  0x1c   : > { %p7171_p10 = pnand %p5082_p7, %p233_p9  ;;  %s245_s19 = sshll.u32 %s7035_s18, 4  ;;  %s246_s19 = int_to_ptr.vmem [resolvable:$true] %s245_s19 }
  0x1d   : > { %9715 = sst [smem:[#allocation24_spill]] %s9714_s16  ;;  %s6778_s21 = scalar_lea.vmem %s246_s19, 6144 }
  0x1e   : > { %p6239_p11 = pneg %p7171_p10  ;;  %p6779_p0 = scmp.ne.s32.totalorder %s246_s19, %s6778_s21 }
  0x1f   : > { %p6786_p7 = scmp.lt.s32.totalorder %s246_s19, %s246_s19  ;;  %p6787_p9 = scmp.lt.s32.totalorder %s6778_s21, %s6778_s21 }
  0x20   : > { %p7179_p12 = pnand %p6239_p11, %p9600_p1 }
  0x21   : > { %p6788_p3 = por %p6787_p9, %p6786_p7 }
  0x22   : > { %p9603_p13 = pneg %p7179_p12 }
  0x24   : > { %p6781_p2 = pnand %p6779_p0, %p9603_p13 }
  0x26   : > { %p6782_p5 = pneg %p6781_p2 }
  0x28   : > { %p6789_p8 = pnand %p6788_p3, %p6782_p5 }
  0x2a   : > { %6792 = shalt.err (!%p6789_p8)
}
  0x2b   : > { %s7036_s22 = smov 384   ;;  %s7037_s23 = smov 24  }
  0x2c   : > { %s9718_s1 = sld [smem:[#allocation92_spill]]  ;;  %s34_s18 = sadd.s32 1, %s7025_s9 }
  0x2d   : > { %p35_p3 = scmp.ge.s32.totalorder %s34_s18, 2  ;;  %s37_s21 = sadd.s32 1, %s7029_s10 }
  0x2e   : > { %s5078_s16 = sshll.u32 %s7025_s9, 1  ;;  %s48_s27 = sadd.s32 1, %s7013_s29 }
  0x2f   : > { %s9949_s18 = smov (%p35_p3, %s34_s18), 0  ;;  %s9951_s21 = smov (!%p35_p3, %s37_s21), %s7029_s10 }
  0x30   : > { %9719 = sst [smem:[#allocation25_spill]] %s9949_s18  ;;  %s42_s7 = sadd.s32 %s7029_s10, %s5078_s16 }
  0x31   : > { %s5079_s8 = sshll.u32 %s9949_s18, 1  ;;  %p39_p8 = scmp.ge.s32.totalorder %s9951_s21, 2 }
  0x32   : > { %6242 = dma.hbm_to_vmem [thread:$0]  (!%p7179_p12), %s9718_s1, 6144, %s246_s19, [#allocation7], %s7036_s22, %s7036_s22, %s7037_s23  }
  0x33   : > { %p55_p11 = scmp.ne.s32.totalorder %s7013_s29, %s7009_s28  ;;  %p9601_p0 = scmp.eq.s32.totalorder %s7033_s11, 0 }
  0x34   : > { %s9953_s21 = smov (%p39_p8, %s9951_s21), 0  ;;  %p9721_p5 = scmp.eq.s32.totalorder %s7145_s12, 3 }
  0x35   : > { %p7209_p2 = por %p9601_p0, %p55_p11  ;;  %s44_s16 = sadd.s32 %s5079_s8, %s9953_s21 }
  0x36   : > { %p7215_p7 = por %p9721_p5, %p55_p11  ;;  %s176_s23 = ssub.s32 %s7029_s10, %s9953_s21 }
  0x37   : > { %s45_s24 = ssub.s32 %s42_s7, %s44_s16  ;;  %p7222_p9 = scmp.eq.s32.totalorder %s176_s23, 0 }
  0x38   : > { %s9722_s22 = scalar_select %p7215_p7, 1, 0 }
  0x39   : > { %p46_p3 = scmp.eq.s32.totalorder %s45_s24, 0  ;;  %p9602_p8 = scmp.lt.s32.totalorder %s7033_s11, 4 }
  0x3a   : > { %9723 = sst [smem:[#allocation26_spill]] %s9722_s22  ;;  %s291_s1 = sand.u32 1, %s7033_s11  }
  0x3b   : > { %s7229_s18 = scalar_select %p46_p3, %s7013_s29, %s48_s27  }
  0x3c   : > { %s293_s9 = sand.u32 1, %s7013_s29   ;;  %s5304_s4 = sshll.u32 %s42_s7, 11 }
  0x3d   : > { %s5087_s30 = sshll.u32 %s293_s9, 7  ;;  %s304_s14 = scalar_lea.hbm %s9581_s0, %s5304_s4 }
  0x3e   : > { %s295_s22 = scalar_lea.vmem [#allocation3], %s5087_s30  ;;  %p7239_p11 = pnand %p9602_p8, %p7209_p2 }
  0x3f   : > { %s305_s8 = sshll.u32 %s295_s22, 4  ;;  %s7038_s23 = smov [#allocation8]   ;;  %s306_s8 = int_to_ptr.vmem [resolvable:$true] %s305_s8 }
  0x40   : > { %s261_s27 = sshll.u32 %s7038_s23, 4  ;;  %s7243_s24 = scalar_lea.sflag [#allocation4], %s291_s1  ;;  %s262_s27 = int_to_ptr.vmem [resolvable:$true] %s261_s27 }
  0x41   : > { %p6795_p5 = pneg %p7239_p11  ;;  %s6806_s7 = scalar_lea.vmem %s306_s8, 2048 }
  0x42   : > { %p6807_p3 = scmp.ne.s32.totalorder %s306_s8, %s6806_s7  ;;  %s7039_s2 = smov [#allocation3]  }
  0x43   : > { %s6811_s4 = sshll.u32 %s7039_s2, 4  ;;  %s6812_s4 = int_to_ptr.vmem [resolvable:$false] %s6811_s4 }
  0x44   : > { %p6809_p1 = pnand %p6807_p3, %p6795_p5  ;;  %s6813_s30 = scalar_lea.vmem %s6812_s4, 4096 }
  0x45   : > { %p6814_p2 = scmp.lt.s32.totalorder %s306_s8, %s6812_s4  ;;  %p6815_p8 = scmp.lt.s32.totalorder %s6813_s30, %s6806_s7 }
  0x46   : > { %p6810_p0 = pneg %p6809_p1 }
  0x47   : > { %p6816_p13 = por %p6815_p8, %p6814_p2 }
  0x49   : > { %p6817_p7 = pnand %p6816_p13, %p6810_p0 }
  0x4b   : > { %6820 = shalt.err (!%p6817_p7)
}
  0x4c   : > { %s7040_s9 = smov 128   ;;  %s7041_s1 = smov 8  }
  0x4d   : > { %6252 = dma.hbm_to_vmem [thread:$0]  (!%p7239_p11), %s304_s14, 2048, %s306_s8, %s7243_s24, %s7040_s9, %s7040_s9, %s7041_s1  }
  0x4e   : > { %s6832_s15 = scalar_lea.vmem %s262_s27, 2048  ;;  %p9726_p5 = pneg %p7179_p12 }
  0x4f   : > { %p6833_p1 = scmp.ne.s32.totalorder %s262_s27, %s6832_s15  ;;  %p6840_p8 = scmp.lt.s32.totalorder %s262_s27, %s262_s27 }
  0x50   : > { %p6841_p13 = scmp.lt.s32.totalorder %s6832_s15, %s6832_s15 }
  0x51   : > { %p6835_p3 = pnand %p6833_p1, %p9726_p5 }
  0x52   : > { %p6842_p0 = por %p6841_p13, %p6840_p8 }
  0x53   : > { %p6836_p6 = pneg %p6835_p3 }
  0x55   : > { %p6843_p7 = pnand %p6842_p0, %p6836_p6 }
  0x57   : > { %6846 = shalt.err (!%p6843_p7)
}
  0x58   : > { %6245 = dma.hbm_to_vmem [thread:$0]  (!%p7179_p12), %s9584_s3, 2048, %s262_s27, [#allocation7], %s7040_s9, %s7040_s9, %s7041_s1  }
  0x59   : > { %s7042_s14 = smov [#allocation9]   ;;  %p9727_p2 = pmov %p9726_p5 }
  0x5a   : > { %s277_s8 = sshll.u32 %s7042_s14, 4  ;;  %s278_s8 = int_to_ptr.vmem [resolvable:$true] %s277_s8 }
  0x5b   : > { %s6858_s16 = scalar_lea.vmem %s278_s8, 4096  ;;  %p6866_p5 = scmp.lt.s32.totalorder %s278_s8, %s278_s8 }
  0x5c   : > { %p6859_p11 = scmp.ne.s32.totalorder %s278_s8, %s6858_s16  ;;  %p6867_p3 = scmp.lt.s32.totalorder %s6858_s16, %s6858_s16 }
  0x5e   : > { %p6861_p1 = pnand %p6859_p11, %p9727_p2  ;;  %p6868_p8 = por %p6867_p3, %p6866_p5 }
  0x60   : > { %p6862_p6 = pneg %p6861_p1 }
  0x62   : > { %p6869_p13 = pnand %p6868_p8, %p6862_p6 }
  0x64   : > { %6872 = shalt.err (!%p6869_p13)
}
  0x65   : > { %6248 = dma.hbm_to_vmem [thread:$0]  (!%p7179_p12), %s9586_s5, 4096, %s278_s8, [#allocation10], %s7040_s9, %s7040_s9, %s7041_s1  }
  0x66   : > { %s179_s7 = sadd.s32 1, %s7001_s26  ;;  %p186_p0 = scmp.ne.s32.totalorder %s7001_s26, %s6997_s25 }
  0x67   : > { %s7281_s20 = scalar_select %p7222_p9, %s7001_s26, %s179_s7  }
  0x68   : > { %p9728_p7 = scmp.eq.s32.totalorder %s7033_s11, 0  ;;  %s317_s2 = sand.u32 1, %s7001_s26  }
  0x69   : > { %s5092_s4 = sshll.u32 %s317_s2, 7  ;;  %s5306_s30 = sshll.u32 %s7029_s10, 11 }
  0x6a   : > { %p188_p11 = por %p186_p0, %p9728_p7  ;;  %s326_s22 = scalar_lea.hbm %s9587_s6, %s5306_s30 }
  0x6b   : > { %s319_s14 = scalar_lea.vmem [#allocation11], %s5092_s4  ;;  %p9729_p2 = scmp.lt.s32.totalorder %s7033_s11, 4 }
  0x6c   : > { %s327_s16 = sshll.u32 %s319_s14, 4  ;;  %s7043_s8 = smov [#allocation11]   ;;  %s328_s16 = int_to_ptr.vmem [resolvable:$true] %s327_s16 }
  0x6d   : > { %p7292_p1 = pnand %p9729_p2, %p188_p11  ;;  %s6886_s13 = scalar_lea.vmem %s328_s16, 2048 }
  0x6e   : > { %p6887_p9 = scmp.ne.s32.totalorder %s328_s16, %s6886_s13  ;;  %s6891_s27 = sshll.u32 %s7043_s8, 4  ;;  %s6892_s27 = int_to_ptr.vmem [resolvable:$false] %s6891_s27 }
  0x6f   : > { %p6875_p12 = pneg %p7292_p1  ;;  %s6893_s7 = scalar_lea.vmem %s6892_s27, 4096 }
  0x70   : > { %p6894_p3 = scmp.lt.s32.totalorder %s328_s16, %s6892_s27  ;;  %p6895_p8 = scmp.lt.s32.totalorder %s6893_s7, %s6886_s13 }
  0x71   : > { %p6889_p6 = pnand %p6887_p9, %p6875_p12 }
  0x72   : > { %p6896_p13 = por %p6895_p8, %p6894_p3 }
  0x73   : > { %p6890_p5 = pneg %p6889_p6 }
  0x75   : > { %p6897_p0 = pnand %p6896_p13, %p6890_p5 }
  0x77   : > { %6900 = shalt.err (!%p6897_p0)
}
  0x78   : > { %6255 = dma.hbm_to_vmem [thread:$0]  (!%p7292_p1), %s326_s22, 2048, %s328_s16, %s7243_s24, %s7040_s9, %s7040_s9, %s7041_s1  }
  0x79   : > { %339 = sbr.rel (%p7171_p10) target bundleno = 3708 (0xe7c), region = 48 }
  0x7e   : > { %s341_s4 = sand.u32 1, %s7145_s12   ;;  %s343_s30 = sand.u32 1, %s7009_s28  }
  0x7f   : > { %s7310_s15 = sshll.u32 %s343_s30, 7  ;;  %s342_s19 = scalar_lea.sflag [#allocation4], %s341_s4 }
  0x80   : > { %s7313_s14 = scalar_lea.vmem [#allocation3], %s7310_s15 }
  0x81   : > { %6972 = dma.done.wait (%p7155_p4), %s342_s19, 2048  }
  0x82   : > { %6974 = vsyncadd (%p7155_p4), %s342_s19, 4294965248  ;;  %p9732_p10 = scmp.eq.s32.totalorder %s7145_s12, 0 }
  0x84   : > { %6976 = dma.done.wait (%p9732_p10), [#allocation7], 8192   ;;  %p9733_p7 = pmov %p9732_p10 }
  0x86   : > { %6978 = vsyncadd (%p9733_p7), [#allocation7], 4294959104  ;;  %p9734_p11 = pmov %p9733_p7 }
  0x87   : > { %p9735_p2 = pmov %p9733_p7 }
  0x88   : > { %6980 = dma.done.wait (%p9734_p11), [#allocation10], 4096  }
  0x89   : > { %6982 = vsyncadd (%p9735_p2), [#allocation10], 4294963200  ;;  %s9736_s17 = sld [smem:[#allocation23_spill]]  ;;  %s364_s24 = sand.u32 1, %s6997_s25  }
  0x8a   : > { %s5101_s9 = sshll.u32 %s364_s24, 7 }
  0x8b   : > { %s7328_s1 = scalar_lea.vmem [#allocation11], %s5101_s9 }
  0x8f   : > { %p9737_p1 = scmp.ne.s32.totalorder %s9736_s17, 0 }
  0x91   : > { %6984 = dma.done.wait (%p9737_p1), %s342_s19, 2048  }
  0x92   : > { %6986 = vsyncadd (%p9737_p1), %s342_s19, 4294965248  ;;  %v7044_v0 = vmov 0.0   ;;  %v471_v1 = vld [vmem:[#allocation6 + $0x170] sm:$0xff]  ;;  %v470_v2 = vld [vmem:[#allocation6 + $0x168] sm:$0xff]  ;;  %s9738_s16 = sld [smem:[#allocation93_spill]]  ;;  %vm916_vm0 = vcmask 261120  }
  0x93   : > { %554 = vmatprep.mubr.f32.mxu0 %v7044_v0  ;;  %602 = vmatprep.mubr.f32.mxu1 %v7044_v0  ;;  %v468_v3 = vld [vmem:[#allocation6 + $0x158] sm:$0xff]  ;;  %v467_v4 = vld [vmem:[#allocation6 + $0x150] sm:$0xff]  ;;  %v465_v5 = vld [vmem:[#allocation6 + $0x140] sm:$0xff]  ;;  %s7045_s23 = smov 96   ;;  %vm1239_vm1 = vcmask 523264   ;;  %s7046_s13 = smov 64  }
  0x94   : > { %490 = vmatprep.subr.mxu0 %v471_v1  ;;  %6189 = vmatprep.subr.mxu1 %v471_v1  ;;  %v464_v6 = vld [vmem:[#allocation6 + $0x138] sm:$0xff]  ;;  %v462_v7 = vld [vmem:[#allocation6 + $0x128] sm:$0xff]  ;;  %v461_v8 = vld [vmem:[#allocation6 + $0x120] sm:$0xff]  ;;  %v475_v1 = vlaneseq  ;;  %s7047_s8 = smov 32   ;;  %vm4721_vm2 = vcmask 785408   ;;  %s9929_s2 = sld [smem:[#allocation94_spill]] }
  0x95   : > { %491 = vmatpush1.msra.mxu0 %v470_v2  ;;  %6205 = vmatpush1.msra.mxu1 %v470_v2  ;;  %v459_v9 = vld [vmem:[#allocation6 + $0x110] sm:$0xff]  ;;  %v458_v10 = vld [vmem:[#allocation6 + $0x108] sm:$0xff]  ;;  %v456_v11 = vld [vmem:[#allocation6 + $0xf8] sm:$0xff]  ;;  %s9491_s4 = scalar_lea.vmem [#allocation12], %s7310_s15  ;;  %s9930_s15 = sld [smem:[#allocation19_spill]] }
  0x96   : > { %492 = vmatprep.subr.mxu0 %v468_v3  ;;  %6190 = vmatprep.subr.mxu1 %v468_v3  ;;  %v455_v12 = vld [vmem:[#allocation6 + $0xf0] sm:$0xff]  ;;  %v453_v13 = vld [vmem:[#allocation6 + $0xe0] sm:$0xff]  ;;  %v452_v14 = vld [vmem:[#allocation6 + $0xd8] sm:$0xff]  ;;  %v7406_v2 = vshrl.u32 %v475_v1, 7  ;;  %s9931_s19 = sld [smem:[#allocation20_spill]]  ;;  %s7048_s27 = smov [#allocation12]  }
  0x97   : > { %493 = vmatpush1.msra.mxu0 %v467_v4  ;;  %6206 = vmatpush1.msra.mxu1 %v467_v4  ;;  %v450_v15 = vld [vmem:[#allocation6 + $0xc8] sm:$0xff]  ;;  %v449_v16 = vld [vmem:[#allocation6 + $0xc0] sm:$0xff]  ;;  %v447_v17 = vld [vmem:[#allocation6 + $0xb0] sm:$0xff]  ;;  %s9932_s24 = sld [smem:[#allocation26_spill]]  ;;  %s6905_s7 = sshll.u32 %s7048_s27, 4  ;;  %s6906_s7 = int_to_ptr.vmem [resolvable:$false] %s6905_s7 }
  0x98   : > { %494 = vmatprep.subr.mxu0 %v465_v5  ;;  %6191 = vmatprep.subr.mxu1 %v465_v5  ;;  %v446_v18 = vld [vmem:[#allocation6 + $0xa8] sm:$0xff]  ;;  %v444_v19 = vld [vmem:[#allocation6 + $0x98] sm:$0xff]  ;;  %v443_v20 = vld [vmem:[#allocation6 + $0x90] sm:$0xff]  ;;  %v477_v3 = vsub.s32 0, %v7406_v2 }
  0x99   : > { %495 = vmatpush1.msra.mxu0 %v464_v6  ;;  %6207 = vmatpush1.msra.mxu1 %v464_v6  ;;  %v441_v21 = vld [vmem:[#allocation6 + $0x80] sm:$0xff]  ;;  %v440_v22 = vld [vmem:[#allocation6 + $0x78] sm:$0xff]  ;;  %v438_v23 = vld [vmem:[#allocation6 + $0x68] sm:$0xff]  ;;  %v481_v6 = vsub.s32 1, %v7406_v2 }
  0x9a   : > { %496 = vmatprep.subr.mxu0 %v462_v7  ;;  %6192 = vmatprep.subr.mxu1 %v462_v7  ;;  %v437_v24 = vld [vmem:[#allocation6 + $0x60] sm:$0xff]  ;;  %v435_v25 = vld [vmem:[#allocation6 + $0x50] sm:$0xff]  ;;  %v434_v26 = vld [vmem:[#allocation6 + $0x48] sm:$0xff] }
  0x9b   : > { %497 = vmatpush1.msra.mxu0 %v461_v8  ;;  %6208 = vmatpush1.msra.mxu1 %v461_v8  ;;  %v432_v27 = vld [vmem:[#allocation6 + $0x38] sm:$0xff]  ;;  %v431_v28 = vld [vmem:[#allocation6 + $0x30] sm:$0xff]  ;;  %v429_v29 = vld [vmem:[#allocation6 + $0x20] sm:$0xff] }
  0x9c   : > { %498 = vmatprep.subr.mxu0 %v459_v9  ;;  %6193 = vmatprep.subr.mxu1 %v459_v9  ;;  %v428_v30 = vld [vmem:[#allocation6 + $0x18] sm:$0xff]  ;;  %v426_v31 = vld [vmem:[#allocation6 + $0x8] sm:$0xff]  ;;  %v425_v32 = vld [vmem:[#allocation6] sm:$0xff] }
  0x9d   : > { %499 = vmatpush1.msra.mxu0 %v458_v10  ;;  %6209 = vmatpush1.msra.mxu1 %v458_v10  ;;  %v7337_v33 = vld [vmem:[%s7313_s14] sm:$0xff]  ;;  %v472_v35 = vld [vmem:[#allocation6 + $0x178] sm:$0xff]  ;;  %v7347_v36 = vld [vmem:[%s7313_s14 + $0x8] sm:$0xff]  ;;  %p9934_p12 = scmp.ne.s32.totalorder %s9932_s24, 0 }
  0x9e   : > { %500 = vmatprep.subr.mxu0 %v456_v11  ;;  %6194 = vmatprep.subr.mxu1 %v456_v11  ;;  %v7340_v34 = vld [vmem:[%s7313_s14 + $0x40] sm:$0xff]  ;;  %v7350_v37 = vld [vmem:[%s7313_s14 + $0x48] sm:$0xff]  ;;  %v7357_v39 = vld [vmem:[%s7313_s14 + $0x10] sm:$0xff] }
  0x9f   : > { %501 = vmatpush1.msra.mxu0 %v455_v12  ;;  %6210 = vmatpush1.msra.mxu1 %v455_v12  ;;  %v469_v38 = vld [vmem:[#allocation6 + $0x160] sm:$0xff]  ;;  %v7360_v40 = vld [vmem:[%s7313_s14 + $0x50] sm:$0xff]  ;;  %v466_v41 = vld [vmem:[#allocation6 + $0x148] sm:$0xff] }
  0xa0   : > { %502 = vmatprep.subr.mxu0 %v453_v13  ;;  %6195 = vmatprep.subr.mxu1 %v453_v13  ;;  %v7367_v42 = vld [vmem:[%s7313_s14 + $0x18] sm:$0xff]  ;;  %v463_v44 = vld [vmem:[#allocation6 + $0x130] sm:$0xff]  ;;  %v7377_v45 = vld [vmem:[%s7313_s14 + $0x20] sm:$0xff] }
  0xa1   : > { %503 = vmatpush1.msra.mxu0 %v452_v14  ;;  %6211 = vmatpush1.msra.mxu1 %v452_v14  ;;  %v7370_v43 = vld [vmem:[%s7313_s14 + $0x58] sm:$0xff]  ;;  %v7380_v46 = vld [vmem:[%s7313_s14 + $0x60] sm:$0xff]  ;;  %v414_v48 = vld [vmem:[%s7313_s14 + $0x28] sm:$0xff] }
  0xa2   : > { %504 = vmatprep.subr.mxu0 %v450_v15  ;;  %6196 = vmatprep.subr.mxu1 %v450_v15  ;;  %v460_v47 = vld [vmem:[#allocation6 + $0x118] sm:$0xff]  ;;  %v422_v49 = vld [vmem:[%s7313_s14 + $0x68] sm:$0xff]  ;;  %v457_v50 = vld [vmem:[#allocation6 + $0x100] sm:$0xff] }
  0xa3   : > { %505 = vmatpush1.msra.mxu0 %v449_v16  ;;  %6212 = vmatpush1.msra.mxu1 %v449_v16  ;;  %v415_v51 = vld [vmem:[%s7313_s14 + $0x30] sm:$0xff]  ;;  %v454_v53 = vld [vmem:[#allocation6 + $0xe8] sm:$0xff]  ;;  %v416_v54 = vld [vmem:[%s7313_s14 + $0x38] sm:$0xff] }
  0xa4   : > { %506 = vmatprep.subr.mxu0 %v447_v17  ;;  %6197 = vmatprep.subr.mxu1 %v447_v17  ;;  %v423_v52 = vld [vmem:[%s7313_s14 + $0x70] sm:$0xff]  ;;  %v424_v55 = vld [vmem:[%s7313_s14 + $0x78] sm:$0xff]  ;;  %v445_v58 = vld [vmem:[#allocation6 + $0xa0] sm:$0xff]  ;;  %s5297_s14 = sshll.u32 %s9930_s15, 1 }
  0xa5   : > { %507 = vmatpush1.msra.mxu0 %v446_v18  ;;  %6213 = vmatpush1.msra.mxu1 %v446_v18  ;;  %v451_v56 = vld [vmem:[#allocation6 + $0xd0] sm:$0xff]  ;;  %v448_v57 = vld [vmem:[#allocation6 + $0xb8] sm:$0xff]  ;;  %v442_v59 = vld [vmem:[#allocation6 + $0x88] sm:$0xff]  ;;  %s4931_s17 = sadd.s32 %s9931_s19, %s5297_s14 }
  0xa6   : > { %508 = vmatprep.subr.mxu0 %v444_v19  ;;  %6198 = vmatprep.subr.mxu1 %v444_v19  ;;  %v439_v60 = vld [vmem:[#allocation6 + $0x70] sm:$0xff]  ;;  %v436_v61 = vld [vmem:[#allocation6 + $0x58] sm:$0xff]  ;;  %v433_v62 = vld [vmem:[#allocation6 + $0x40] sm:$0xff]  ;;  %s5308_s9 = sshll.u32 %s4931_s17, 11 }
  0xa7   : > { %509 = vmatpush1.msra.mxu0 %v443_v20  ;;  %6214 = vmatpush1.msra.mxu1 %v443_v20  ;;  %v430_v63 = vld [vmem:[#allocation6 + $0x28] sm:$0xff]  ;;  %v7412_v4 = vld [vmem:[%s9738_s16] sm:$0x7]  ;;  %s9933_s16 = sld [smem:[#allocation95_spill]] }
  0xa8   : > { %510 = vmatprep.subr.mxu0 %v441_v21  ;;  %6199 = vmatprep.subr.mxu1 %v441_v21  ;;  %v7415_v5 = vrot.slane %v7412_v4, %v477_v3  ;;  %v7425_v11 = vrot.slane %v7412_v4, %v481_v6 }
  0xa9   : > { %511 = vmatpush1.msra.mxu0 %v440_v22  ;;  %6215 = vmatpush1.msra.mxu1 %v440_v22 }
  0xaa   : > { %512 = vmatprep.subr.mxu0 %v438_v23  ;;  %6200 = vmatprep.subr.mxu1 %v438_v23 }
  0xab   : > { %513 = vmatpush1.msra.mxu0 %v437_v24  ;;  %6216 = vmatpush1.msra.mxu1 %v437_v24 }
  0xac   : > { %514 = vmatprep.subr.mxu0 %v435_v25  ;;  %6201 = vmatprep.subr.mxu1 %v435_v25 }
  0xad   : > { %515 = vmatpush1.msra.mxu0 %v434_v26  ;;  %6217 = vmatpush1.msra.mxu1 %v434_v26 }
  0xae   : > { %516 = vmatprep.subr.mxu0 %v432_v27  ;;  %6202 = vmatprep.subr.mxu1 %v432_v27 }
  0xaf   : > { %517 = vmatpush1.msra.mxu0 %v431_v28  ;;  %6218 = vmatpush1.msra.mxu1 %v431_v28 }
  0xb0   : > { %518 = vmatprep.subr.mxu0 %v429_v29  ;;  %6203 = vmatprep.subr.mxu1 %v429_v29 }
  0xb1   : > { %519 = vmatpush1.msra.mxu0 %v428_v30  ;;  %6219 = vmatpush1.msra.mxu1 %v428_v30 }
  0xb2   : > { %520 = vmatprep.subr.mxu0 %v426_v31  ;;  %6204 = vmatprep.subr.mxu1 %v426_v31 }
  0xb3   : > { %521 = vmatpush1.msra.mxu0 %v425_v32  ;;  %6220 = vmatpush1.msra.mxu1 %v425_v32 }
  0xb4   : > { %555 = vmatmul.mubr.f32.vlgmr.msra.gmra.mxu0 %v7337_v33  ;;  %603 = vmatmul.mubr.f32.vlgmr.msra.gmra.mxu1 %v7340_v34 }
  0xb5   : > { %560 = vmatprep.mubr.f32.mxu0 %v7044_v0  ;;  %608 = vmatprep.mubr.f32.mxu1 %v7044_v0 }
  0xb6   : > { %5629 = vmatprep.subr.mxu1 %v472_v35 }
  0xb7   : > { %5630 = vmatpush3.msra.mxu1 %v472_v35 }
  0xb8   : > { %561 = vmatmul.mubr.f32.gmra.mxu0 %v7347_v36  ;;  %609 = vmatmul.mubr.f32.gmra.mxu1 %v7350_v37 }
  0xb9   : > { %566 = vmatprep.mubr.f32.mxu0 %v7044_v0  ;;  %614 = vmatprep.mubr.f32.mxu1 %v7044_v0 }
  0xba   : > { %5631 = vmatprep.subr.mxu1 %v469_v38 }
  0xbb   : > { %5632 = vmatpush3.msra.mxu1 %v469_v38 }
  0xbc   : > { %567 = vmatmul.mubr.f32.gmra.mxu0 %v7357_v39  ;;  %615 = vmatmul.mubr.f32.gmra.mxu1 %v7360_v40 }
  0xbd   : > { %572 = vmatprep.mubr.f32.mxu0 %v7044_v0  ;;  %620 = vmatprep.mubr.f32.mxu1 %v7044_v0 }
  0xbe   : > { %5633 = vmatprep.subr.mxu1 %v466_v41 }
  0xbf   : > { %5634 = vmatpush3.msra.mxu1 %v466_v41 }
  0xc0   : > { %573 = vmatmul.mubr.f32.gmra.mxu0 %v7367_v42  ;;  %621 = vmatmul.mubr.f32.gmra.mxu1 %v7370_v43 }
  0xc1   : > { %578 = vmatprep.mubr.f32.mxu0 %v7044_v0  ;;  %626 = vmatprep.mubr.f32.mxu1 %v7044_v0 }
  0xc2   : > { %5635 = vmatprep.subr.mxu1 %v463_v44 }
  0xc3   : > { %5636 = vmatpush3.msra.mxu1 %v463_v44 }
  0xc4   : > { %579 = vmatmul.mubr.f32.gmra.mxu0 %v7377_v45  ;;  %627 = vmatmul.mubr.f32.gmra.mxu1 %v7380_v46 }
  0xc5   : > { %584 = vmatprep.mubr.f32.mxu0 %v7044_v0  ;;  %632 = vmatprep.mubr.f32.mxu1 %v7044_v0 }
  0xc6   : > { %5637 = vmatprep.subr.mxu1 %v460_v47 }
  0xc7   : > { %5638 = vmatpush3.msra.mxu1 %v460_v47 }
  0xc8   : > { %585 = vmatmul.mubr.f32.gmra.mxu0 %v414_v48  ;;  %633 = vmatmul.mubr.f32.gmra.mxu1 %v422_v49 }
  0xc9   : > { %590 = vmatprep.mubr.f32.mxu0 %v7044_v0  ;;  %638 = vmatprep.mubr.f32.mxu1 %v7044_v0 }
  0xca   : > { %5639 = vmatprep.subr.mxu1 %v457_v50 }
  0xcb   : > { %5640 = vmatpush3.msra.mxu1 %v457_v50 }
  0xcc   : > { %591 = vmatmul.mubr.f32.gmra.mxu0 %v415_v51  ;;  %639 = vmatmul.mubr.f32.gmra.mxu1 %v423_v52 }
  0xcd   : > { %596 = vmatprep.mubr.f32.mxu0 %v7044_v0  ;;  %644 = vmatprep.mubr.f32.mxu1 %v7044_v0  ;;  %v427_v0 = vld [vmem:[#allocation6 + $0x10] sm:$0xff] }
  0xce   : > { %5641 = vmatprep.subr.mxu1 %v454_v53 }
  0xcf   : > { %5642 = vmatpush3.msra.mxu1 %v454_v53 }
  0xd0   : > { %597 = vmatmul.mubr.f32.gmra.mxu0 %v416_v54  ;;  %645 = vmatmul.mubr.f32.gmra.mxu1 %v424_v55 }
  0xd1   : > { %5643 = vmatprep.subr.mxu1 %v451_v56  ;;  %5661 = vmatprep.mubr.f32.mxu1 %v7337_v33 }
  0xd2   : > { %5644 = vmatpush3.msra.mxu1 %v451_v56 }
  0xd3   : > { %5645 = vmatprep.subr.mxu1 %v448_v57 }
  0xd4   : > { %5646 = vmatpush3.msra.mxu1 %v448_v57 }
  0xd5   : > { %5647 = vmatprep.subr.mxu1 %v445_v58 }
  0xd6   : > { %5648 = vmatpush3.msra.mxu1 %v445_v58 }
  0xd7   : > { %5649 = vmatprep.subr.mxu1 %v442_v59 }
  0xd8   : > { %5650 = vmatpush3.msra.mxu1 %v442_v59 }
  0xd9   : > { %5651 = vmatprep.subr.mxu1 %v439_v60 }
  0xda   : > { %5652 = vmatpush3.msra.mxu1 %v439_v60  ;;  %v485_v60 = vsub.s32 2, %v7406_v2 }
  0xdb   : > { %5653 = vmatprep.subr.mxu1 %v436_v61 }
  0xdc   : > { %5654 = vmatpush3.msra.mxu1 %v436_v61 }
  0xdd   : > { %5655 = vmatprep.subr.mxu1 %v433_v62 }
  0xde   : > { %5656 = vmatpush3.msra.mxu1 %v433_v62 }
  0xdf   : > { %5657 = vmatprep.subr.mxu1 %v430_v63 }
  0xe0   : > { %5658 = vmatpush3.msra.mxu1 %v430_v63 }
  0xe1   : > { %5659 = vmatprep.subr.mxu1 %v427_v0 }
  0xe2   : > { %5660 = vmatpush3.msra.mxu1 %v427_v0  ;;  %v7605_v0 = vrot.slane %v7412_v4, %v485_v60 }
  0xe3   : > { %5662 = vmatmul.mubr.f32.vlgmr.msra.gmra.mxu1 %v7347_v36 }
  0xe4   : > { %5664 = vmatprep.mubr.f32.mxu1 %v7357_v39 }
  0xe7   : > { %5665 = vmatmul.mubr.f32.gmra.mxu1 %v7367_v42 }
  0xe8   : > { %5667 = vmatprep.mubr.f32.mxu1 %v7377_v45 }
  0xeb   : > { %5668 = vmatmul.mubr.f32.gmra.mxu1 %v414_v48 }
  0xec   : > { %5670 = vmatprep.mubr.f32.mxu1 %v415_v51 }
  0xef   : > { %5671 = vmatmul.mubr.f32.gmra.mxu1 %v416_v54 }
  0xf0   : > { %5673 = vmatprep.mubr.f32.mxu1 %v7340_v34 }
  0xf3   : > { %5674 = vmatmul.mubr.f32.gmra.mxu1 %v7350_v37 }
  0xf4   : > { %5676 = vmatprep.mubr.f32.mxu1 %v7360_v40 }
  0xf7   : > { %5677 = vmatmul.mubr.f32.gmra.mxu1 %v7370_v43 }
  0xf8   : > { %5679 = vmatprep.mubr.f32.mxu1 %v7380_v46 }
  0xfb   : > { %5680 = vmatmul.mubr.f32.gmra.mxu1 %v422_v49 }
  0xfc   : > { %5682 = vmatprep.mubr.f32.mxu1 %v423_v52 }
  0xff   : > { %5683 = vmatmul.mubr.f32.gmra.mxu1 %v424_v55 }
 0x174   : > { %v556_v7 = vpop.f32.mrf.mxu0  ;;  %v604_v8 = vpop.f32.mrf.mxu1 }
 0x175   : > { %v7419_v9 = vadd.f32 %v556_v7, %v7415_v5  ;;  %v7422_v10 = vadd.f32 %v604_v8, %v7415_v5 }
 0x176   : > { %v558_v12 = vpop.f32.mrf.mxu0  ;;  %v7427_v13 = vpop.f32.mrf.mxu1 }
 0x177   : > { %9739 = vst [vmem:[#allocation27_spill] sm:$0xff] %v7419_v9  ;;  %5729 = vmatprep.mubr.msk.f32.mxu0 %vm916_vm0, %v7422_v10  ;;  %1739 = vrot.lane.b32.xlu0 %v7419_v9, %s7045_s23  ;;  %v7440_v16 = vadd.f32 %v558_v12, %v7425_v11  ;;  %v7598_v62 = vadd.f32 %v7427_v13, %v7425_v11 }
 0x178   : > { %5701 = vmatprep.mubr.msk.f32.mxu1 %vm916_vm0, %v7419_v9  ;;  %v7435_v14 = vpop.f32.mrf.mxu0  ;;  %v7437_v15 = vpop.f32.mrf.mxu1 }
 0x179   : > { %9740 = vst [vmem:[#allocation28_spill] sm:$0xff] %v7440_v16  ;;  %v7620_v4 = vadd.f32 %v7435_v14, %v7415_v5  ;;  %v7624_v6 = vadd.f32 %v7437_v15, %v7415_v5 }
 0x17a   : > { %v564_v17 = vpop.f32.mrf.mxu0  ;;  %v7442_v18 = vpop.f32.mrf.mxu1 }
 0x17b   : > { %1763 = vrot.lane.b32.xlu0 %v7440_v16, %s7045_s23  ;;  %v7451_v21 = vadd.f32 %v564_v17, %v7425_v11  ;;  %v7581_v58 = vadd.f32 %v7442_v18, %v7425_v11  ;;  %9755 = vst [vmem:[#allocation43_spill] sm:$0xff] %v7620_v4 }
 0x17c   : > { %v7446_v19 = vpop.f32.mrf.mxu0  ;;  %v7448_v20 = vpop.f32.mrf.mxu1 }
 0x17d   : > { %9741 = vst [vmem:[#allocation29_spill] sm:$0xff] %v7451_v21  ;;  %v7628_v8 = vadd.f32 %v7446_v19, %v7415_v5 }
 0x17e   : > { %v570_v22 = vpop.f32.mrf.mxu0  ;;  %v618_v23 = vpop.f32.mrf.mxu1 }
 0x17f   : > { %1765 = vrot.lane.b32.xlu0 %v7451_v21, %s7045_s23  ;;  %v7460_v26 = vadd.f32 %v570_v22, %v7425_v11  ;;  %v7565_v55 = vadd.f32 %v618_v23, %v7425_v11 }
 0x180   : > { %v7455_v24 = vpop.f32.mrf.mxu0  ;;  %v7457_v25 = vpop.f32.mrf.mxu1 }
 0x181   : > { %9742 = vst [vmem:[#allocation30_spill] sm:$0xff] %v7460_v26  ;;  %9753 = vst [vmem:[#allocation41_spill] sm:$0xff] %v7565_v55  ;;  %v7651_v15 = vadd.f32 %v7455_v24, %v7415_v5  ;;  %v7655_v17 = vadd.f32 %v7457_v25, %v7415_v5 }
 0x182   : > { %v576_v27 = vpop.f32.mrf.mxu0  ;;  %v624_v28 = vpop.f32.mrf.mxu1 }
 0x183   : > { %1767 = vrot.lane.b32.xlu0 %v7460_v26, %s7045_s23  ;;  %v7469_v31 = vadd.f32 %v576_v27, %v7425_v11  ;;  %v7554_v54 = vadd.f32 %v624_v28, %v7425_v11 }
 0x184   : > { %v7464_v29 = vpop.f32.mrf.mxu0  ;;  %v7466_v30 = vpop.f32.mrf.mxu1 }
 0x185   : > { %9743 = vst [vmem:[#allocation31_spill] sm:$0xff] %v7469_v31  ;;  %9752 = vst [vmem:[#allocation40_spill] sm:$0xff] %v7554_v54  ;;  %v7660_v19 = vadd.f32 %v7464_v29, %v7415_v5 }
 0x186   : > { %v582_v32 = vpop.f32.mrf.mxu0  ;;  %v630_v33 = vpop.f32.mrf.mxu1 }
 0x187   : > { %v7472_v34 = vadd.f32 %v582_v32, %v7425_v11  ;;  %1769 = vrot.lane.b32.xlu0 %v7469_v31, %s7045_s23  ;;  %v7483_v39 = vadd.f32 %v630_v33, %v7425_v11 }
 0x188   : > { %v7476_v35 = vpop.f32.mrf.mxu0  ;;  %v7478_v36 = vpop.f32.mrf.mxu1 }
 0x189   : > { %9744 = vst [vmem:[#allocation32_spill] sm:$0xff] %v7472_v34  ;;  %1771 = vrot.lane.b32.xlu1 %v7472_v34, %s7045_s23  ;;  %9745 = vst [vmem:[#allocation33_spill] sm:$0xff] %v7483_v39  ;;  %v7686_v27 = vadd.f32 %v7476_v35, %v7415_v5  ;;  %v7690_v28 = vadd.f32 %v7478_v36, %v7415_v5 }
 0x18a   : > { %v588_v37 = vpop.f32.mrf.mxu0  ;;  %v636_v38 = vpop.f32.mrf.mxu1 }
 0x18b   : > { %v7486_v40 = vadd.f32 %v588_v37, %v7425_v11  ;;  %v7497_v45 = vadd.f32 %v636_v38, %v7425_v11 }
 0x18c   : > { %v7488_v41 = vpop.f32.mrf.mxu0  ;;  %v7490_v42 = vpop.f32.mrf.mxu1 }
 0x18d   : > { %9746 = vst [vmem:[#allocation34_spill] sm:$0xff] %v7486_v40  ;;  %1956 = vrot.lane.b32.xlu1 %v7483_v39, %s7045_s23  ;;  %1773 = vrot.lane.b32.xlu0 %v7486_v40, %s7045_s23  ;;  %9747 = vst [vmem:[#allocation35_spill] sm:$0xff] %v7497_v45  ;;  %v7699_v32 = vadd.f32 %v7490_v42, %v7415_v5 }
 0x18e   : > { %v594_v43 = vpop.f32.mrf.mxu0  ;;  %v642_v44 = vpop.f32.mrf.mxu1 }
 0x18f   : > { %v7512_v52 = vadd.f32 %v594_v43, %v7425_v11  ;;  %v7519_v53 = vadd.f32 %v642_v44, %v7425_v11  ;;  %9761 = vst [vmem:[#allocation49_spill] sm:$0xff] %v7699_v32 }
 0x190   : > { %v7499_v46 = vpop.f32.mrf.mxu0  ;;  %v7501_v47 = vpop.f32.mrf.mxu1 }
 0x191   : > { %1958 = vrot.lane.b32.xlu1 %v7497_v45, %s7045_s23  ;;  %9750 = vst [vmem:[#allocation38_spill] sm:$0xff] %v7512_v52  ;;  %9751 = vst [vmem:[#allocation39_spill] sm:$0xff] %v7519_v53  ;;  %v7721_v38 = vadd.f32 %v7499_v46, %v7415_v5 }
 0x192   : > { %v600_v48 = vpop.f32.mrf.mxu0  ;;  %v648_v49 = vpop.f32.mrf.mxu1 }
 0x193   : > { %v7506_v50 = vadd.f32 %v600_v48, %v7425_v11  ;;  %v7509_v51 = vadd.f32 %v648_v49, %v7425_v11  ;;  %v7632_v11 = vadd.f32 %v7448_v20, %v7415_v5  ;;  %v7664_v20 = vadd.f32 %v7466_v30, %v7415_v5 }
 0x194   : > { %v7695_v30 = vadd.f32 %v7488_v41, %v7415_v5  ;;  %v7725_v41 = vadd.f32 %v7501_v47, %v7415_v5 }
 0x195   : > { %9748 = vst [vmem:[#allocation36_spill] sm:$0xff] %v7506_v50  ;;  %9749 = vst [vmem:[#allocation37_spill] sm:$0xff] %v7509_v51  ;;  %5685 = vmatprep.subr.msk.mxu1 %vm916_vm0, %v7506_v50  ;;  %5713 = vmatprep.subr.msk.mxu0 %vm916_vm0, %v7509_v51 }
 0x196   : > { %1775 = vrot.lane.b32.xlu1 %v7512_v52, %s7045_s23  ;;  %1777 = vrot.lane.b32.xlu0 %v7506_v50, %s7045_s23 }
 0x197   : > { %5686 = vmatpush3.xpose.msk.msra.mxu1 %vm916_vm0, %v7506_v50  ;;  %5714 = vmatpush3.xpose.msk.msra.mxu0 %vm916_vm0, %v7509_v51 }
 0x198   : > { %5687 = vmatprep.subr.msk.mxu1 %vm916_vm0, %v7512_v52  ;;  %5715 = vmatprep.subr.msk.mxu0 %vm916_vm0, %v7519_v53 }
 0x19a   : > { %1960 = vrot.lane.b32.xlu1 %v7519_v53, %s7045_s23 }
 0x19b   : > { %5688 = vmatpush3.xpose.msk.msra.mxu1 %vm916_vm0, %v7512_v52  ;;  %5716 = vmatpush3.xpose.msk.msra.mxu0 %vm916_vm0, %v7519_v53  ;;  %v912_v52 = vld [vmem:[#allocation9 + $0x20] sm:$0xff] }
 0x19c   : > { %5689 = vmatprep.subr.msk.mxu1 %vm916_vm0, %v7486_v40  ;;  %5717 = vmatprep.subr.msk.mxu0 %vm916_vm0, %v7497_v45 }
 0x19e   : > { %1962 = vrot.lane.b32.xlu1 %v7509_v51, %s7045_s23  ;;  %v7801_v51 = vld [vmem:[%s7328_s1 + $0x18] sm:$0xff] }
 0x19f   : > { %5690 = vmatpush3.xpose.msk.msra.mxu1 %vm916_vm0, %v7486_v40  ;;  %5718 = vmatpush3.xpose.msk.msra.mxu0 %vm916_vm0, %v7497_v45  ;;  %v7798_v45 = vld [vmem:[%s7328_s1] sm:$0xff] }
 0x1a0   : > { %5691 = vmatprep.subr.msk.mxu1 %vm916_vm0, %v7472_v34  ;;  %5719 = vmatprep.subr.msk.mxu0 %vm916_vm0, %v7483_v39 }
 0x1a3   : > { %5692 = vmatpush3.xpose.msk.msra.mxu1 %vm916_vm0, %v7472_v34  ;;  %5720 = vmatpush3.xpose.msk.msra.mxu0 %vm916_vm0, %v7483_v39  ;;  %v7567_v56 = vpop.f32.mrf.mxu1 }
 0x1a4   : > { %5693 = vmatprep.subr.msk.mxu1 %vm916_vm0, %v7469_v31  ;;  %5721 = vmatprep.subr.msk.mxu0 %vm916_vm0, %v7554_v54  ;;  %v7747_v46 = vadd.f32 %v7567_v56, %v7605_v0 }
 0x1a5   : > { %v7577_v57 = vpop.f32.mrf.mxu1 }
 0x1a6   : > { %9768 = vst [vmem:[#allocation56_spill] sm:$0xff] %v7747_v46  ;;  %v7753_v47 = vadd.f32 %v7577_v57, %v7605_v0 }
 0x1a7   : > { %5694 = vmatpush3.xpose.msk.msra.mxu1 %vm916_vm0, %v7469_v31  ;;  %5722 = vmatpush3.xpose.msk.msra.mxu0 %vm916_vm0, %v7554_v54  ;;  %v7583_v59 = vpop.f32.mrf.mxu1  ;;  %v913_v31 = vld [vmem:[#allocation9 + $0x28] sm:$0xff] }
 0x1a8   : > { %5695 = vmatprep.subr.msk.mxu1 %vm916_vm0, %v7460_v26  ;;  %5723 = vmatprep.subr.msk.mxu0 %vm916_vm0, %v7565_v55  ;;  %v7729_v42 = vadd.f32 %v7583_v59, %v7605_v0  ;;  %9769 = vst [vmem:[#allocation57_spill] sm:$0xff] %v7753_v47 }
 0x1a9   : > { %v7594_v61 = vpop.f32.mrf.mxu1 }
 0x1aa   : > { %9765 = vst [vmem:[#allocation53_spill] sm:$0xff] %v7729_v42  ;;  %v7742_v5 = vadd.f32 %v7594_v61, %v7605_v0 }
 0x1ab   : > { %5696 = vmatpush3.xpose.msk.msra.mxu1 %vm916_vm0, %v7460_v26  ;;  %5724 = vmatpush3.xpose.msk.msra.mxu0 %vm916_vm0, %v7565_v55  ;;  %v5669_v63 = vpop.f32.mrf.mxu1 }
 0x1ac   : > { %5697 = vmatprep.subr.msk.mxu1 %vm916_vm0, %v7451_v21  ;;  %5725 = vmatprep.subr.msk.mxu0 %vm916_vm0, %v7581_v58  ;;  %v7667_v22 = vadd.f32 %v5669_v63, %v7605_v0  ;;  %9767 = vst [vmem:[#allocation55_spill] sm:$0xff] %v7742_v5 }
 0x1ad   : > { %v737_v1 = vpop.f32.mrf.mxu1 }
 0x1ae   : > { %9758 = vst [vmem:[#allocation46_spill] sm:$0xff] %v7667_v22  ;;  %v7702_v33 = vadd.f32 %v737_v1, %v7605_v0 }
 0x1af   : > { %5698 = vmatpush3.xpose.msk.msra.mxu1 %vm916_vm0, %v7451_v21  ;;  %5726 = vmatpush3.xpose.msk.msra.mxu0 %vm916_vm0, %v7581_v58  ;;  %v5672_v2 = vpop.f32.mrf.mxu1 }
 0x1b0   : > { %5699 = vmatprep.subr.msk.mxu1 %vm916_vm0, %v7440_v16  ;;  %5727 = vmatprep.subr.msk.mxu0 %vm916_vm0, %v7598_v62  ;;  %v7616_v3 = vadd.f32 %v5672_v2, %v7605_v0  ;;  %9762 = vst [vmem:[#allocation50_spill] sm:$0xff] %v7702_v33 }
 0x1b1   : > { %v747_v7 = vpop.f32.mrf.mxu1 }
 0x1b2   : > { %9754 = vst [vmem:[#allocation42_spill] sm:$0xff] %v7616_v3  ;;  %v7635_v12 = vadd.f32 %v747_v7, %v7605_v0 }
 0x1b3   : > { %5700 = vmatpush3.xpose.msk.msra.mxu1 %vm916_vm0, %v7440_v16  ;;  %5728 = vmatpush3.xpose.msk.msra.mxu0 %vm916_vm0, %v7598_v62  ;;  %v5675_v13 = vpop.f32.mrf.mxu1 }
 0x1b4   : > { %9756 = vst [vmem:[#allocation44_spill] sm:$0xff] %v7635_v12  ;;  %5741 = vmatprep.subr.mxu1 %v7616_v3  ;;  %v7647_v14 = vadd.f32 %v5675_v13, %v7605_v0 }
 0x1b5   : > { %v757_v18 = vpop.f32.mrf.mxu1 }
 0x1b6   : > { %5702 = vmatmul.mubr.msk.f32.vlgmr.msra.gmra.mxu1 %vm916_vm0, %v7620_v4  ;;  %5730 = vmatmul.mubr.msk.f32.vlgmr.msra.gmra.mxu0 %vm916_vm0, %v7624_v6  ;;  %9757 = vst [vmem:[#allocation45_spill] sm:$0xff] %v7647_v14  ;;  %v7671_v23 = vadd.f32 %v757_v18, %v7605_v0 }
 0x1b7   : > { %5704 = vmatprep.mubr.msk.f32.mxu1 %vm916_vm0, %v7628_v8  ;;  %5732 = vmatprep.mubr.msk.f32.mxu0 %vm916_vm0, %v7632_v11  ;;  %v5678_v24 = vpop.f32.mrf.mxu1 }
 0x1b8   : > { %5742 = vmatpush3.msra.mxu1 %v7616_v3  ;;  %9759 = vst [vmem:[#allocation47_spill] sm:$0xff] %v7671_v23  ;;  %v7682_v25 = vadd.f32 %v5678_v24, %v7605_v0 }
 0x1b9   : > { %5743 = vmatprep.subr.mxu1 %v7635_v12  ;;  %v767_v29 = vpop.f32.mrf.mxu1 }
 0x1ba   : > { %5705 = vmatmul.mubr.msk.f32.gmra.mxu1 %vm916_vm0, %v7651_v15  ;;  %5733 = vmatmul.mubr.msk.f32.gmra.mxu0 %vm916_vm0, %v7655_v17  ;;  %9760 = vst [vmem:[#allocation48_spill] sm:$0xff] %v7682_v25  ;;  %v7706_v35 = vadd.f32 %v767_v29, %v7605_v0  ;;  %v909_v29 = vld [vmem:[#allocation9 + $0x8] sm:$0xff] }
 0x1bb   : > { %5707 = vmatprep.mubr.msk.f32.mxu1 %vm916_vm0, %v7660_v19  ;;  %5735 = vmatprep.mubr.msk.f32.mxu0 %vm916_vm0, %v7664_v20  ;;  %v5681_v36 = vpop.f32.mrf.mxu1 }
 0x1bc   : > { %5744 = vmatpush3.msra.mxu1 %v7635_v12  ;;  %9763 = vst [vmem:[#allocation51_spill] sm:$0xff] %v7706_v35  ;;  %v7717_v37 = vadd.f32 %v5681_v36, %v7605_v0 }
 0x1bd   : > { %5745 = vmatprep.subr.mxu1 %v7667_v22  ;;  %v777_v43 = vpop.f32.mrf.mxu1 }
 0x1be   : > { %5708 = vmatmul.mubr.msk.f32.gmra.mxu1 %vm916_vm0, %v7686_v27  ;;  %5736 = vmatmul.mubr.msk.f32.gmra.mxu0 %vm916_vm0, %v7690_v28  ;;  %9764 = vst [vmem:[#allocation52_spill] sm:$0xff] %v7717_v37  ;;  %v7734_v44 = vadd.f32 %v777_v43, %v7605_v0 }
 0x1bf   : > { %5710 = vmatprep.mubr.msk.f32.mxu1 %vm916_vm0, %v7695_v30  ;;  %5738 = vmatprep.mubr.msk.f32.mxu0 %vm916_vm0, %v7699_v32  ;;  %v5684_v48 = vpop.f32.mrf.mxu1 }
 0x1c0   : > { %5746 = vmatpush3.msra.mxu1 %v7667_v22  ;;  %9766 = vst [vmem:[#allocation54_spill] sm:$0xff] %v7734_v44  ;;  %v7759_v49 = vadd.f32 %v5684_v48, %v7605_v0  ;;  %v908_v48 = vld [vmem:[#allocation9] sm:$0xff] }
 0x1c1   : > { %5747 = vmatprep.subr.mxu1 %v7702_v33  ;;  %v7786_v24 = vpop.f32.mrf.mxu1 }
 0x1c2   : > { %5711 = vmatmul.mubr.msk.f32.gmra.mxu1 %vm916_vm0, %v7721_v38  ;;  %5739 = vmatmul.mubr.msk.f32.gmra.mxu0 %vm916_vm0, %v7725_v41  ;;  %9770 = vst [vmem:[#allocation58_spill] sm:$0xff] %v7759_v49 }
 0x1c3   : > { %5748 = vmatpush3.msra.mxu1 %v7702_v33 }
 0x1c4   : > { %5749 = vmatprep.subr.mxu1 %v7729_v42 }
 0x1c5   : > { %5750 = vmatpush3.msra.mxu1 %v7729_v42 }
 0x1c6   : > { %5751 = vmatprep.subr.mxu1 %v7742_v5 }
 0x1c7   : > { %5752 = vmatpush3.msra.mxu1 %v7742_v5 }
 0x1c8   : > { %5753 = vmatprep.subr.mxu1 %v7747_v46 }
 0x1c9   : > { %5754 = vmatpush3.msra.mxu1 %v7747_v46 }
 0x1ca   : > { %5755 = vmatprep.subr.mxu1 %v7753_v47 }
 0x1cb   : > { %5756 = vmatpush3.msra.mxu1 %v7753_v47 }
 0x1cc   : > { %5769 = vmatprep.subr.mxu1 %v7759_v49 }
 0x1e9   : > { %v1740_v56 = vpop.permute.xlu0 %1739 }
 0x1ea   : > { %5813 = vmatprep.mubr.msk.f32.mxu0 %vm916_vm0, %v1740_v56  ;;  %v853_v56 = vld [vmem:[%s7328_s1 + $0x48] sm:$0xff] }
 0x1ed   : > { %v1764_v57 = vpop.permute.xlu0 %1763 }
 0x1f1   : > { %v1766_v59 = vpop.permute.xlu0 %1765 }
 0x1f5   : > { %v1768_v60 = vpop.permute.xlu0 %1767 }
 0x1f9   : > { %v1770_v1 = vpop.permute.xlu0 %1769 }
 0x1fb   : > { %v1772_v61 = vpop.permute.xlu1 %1771 }
 0x1ff   : > { %v7766_v63 = vpop.permute.xlu1 %1956  ;;  %v1774_v2 = vpop.permute.xlu0 %1773 }
 0x203   : > { %v7768_v7 = vpop.permute.xlu1 %1958 }
 0x208   : > { %v1778_v13 = vpop.permute.xlu0 %1777  ;;  %v1776_v18 = vpop.permute.xlu1 %1775 }
 0x209   : > { %5797 = vmatprep.subr.msk.mxu0 %vm916_vm0, %v1778_v13 }
 0x20a   : > { %5798 = vmatpush3.xpose.msk.msra.mxu0 %vm916_vm0, %v1778_v13 }
 0x20b   : > { %5799 = vmatprep.subr.msk.mxu0 %vm916_vm0, %v1776_v18 }
 0x20e   : > { %5800 = vmatpush3.xpose.msk.msra.mxu0 %vm916_vm0, %v1776_v18 }
 0x20f   : > { %5801 = vmatprep.subr.msk.mxu0 %vm916_vm0, %v1774_v2 }
 0x212   : > { %5802 = vmatpush3.xpose.msk.msra.mxu0 %vm916_vm0, %v1774_v2 }
 0x213   : > { %5803 = vmatprep.subr.msk.mxu0 %vm916_vm0, %v1772_v61 }
 0x216   : > { %5804 = vmatpush3.xpose.msk.msra.mxu0 %vm916_vm0, %v1772_v61  ;;  %v7790_v61 = vld [vmem:[%s7328_s1 + $0x8] sm:$0xff] }
 0x217   : > { %5805 = vmatprep.subr.msk.mxu0 %vm916_vm0, %v1770_v1 }
 0x21a   : > { %5806 = vmatpush3.xpose.msk.msra.mxu0 %vm916_vm0, %v1770_v1 }
 0x21b   : > { %5807 = vmatprep.subr.msk.mxu0 %vm916_vm0, %v1768_v60 }
 0x21e   : > { %5808 = vmatpush3.xpose.msk.msra.mxu0 %vm916_vm0, %v1768_v60 }
 0x21f   : > { %5809 = vmatprep.subr.msk.mxu0 %vm916_vm0, %v1766_v59 }
 0x222   : > { %5810 = vmatpush3.xpose.msk.msra.mxu0 %vm916_vm0, %v1766_v59  ;;  %v911_v59 = vld [vmem:[#allocation9 + $0x18] sm:$0xff] }
 0x223   : > { %5811 = vmatprep.subr.msk.mxu0 %vm916_vm0, %v1764_v57 }
 0x226   : > { %5812 = vmatpush3.xpose.msk.msra.mxu0 %vm916_vm0, %v1764_v57 }
 0x276   : > { %v5703_v36 = vpop.f32.mrf.mxu1  ;;  %v5731_v43 = vpop.f32.mrf.mxu0 }
 0x277   : > { %v1037_v60 = vadd.f32 %v5703_v36, %v909_v29  ;;  %v1190_v1 = vadd.f32 %v5731_v43, %v909_v29  ;;  %v910_v43 = vld [vmem:[#allocation9 + $0x10] sm:$0xff] }
 0x278   : > { %v1031_v2 = vpop.f32.mrf.mxu1  ;;  %v1184_v13 = vpop.f32.mrf.mxu0 }
 0x279   : > { %v1032_v18 = vadd.f32 %v1031_v2, %v908_v48  ;;  %v7792_v57 = vadd.f32 %v1190_v1, %v853_v56  ;;  %v7795_v39 = vadd.f32 %v1037_v60, %v7790_v61  ;;  %v1185_v9 = vadd.f32 %v1184_v13, %v908_v48  ;;  %v852_v1 = vld [vmem:[%s7328_s1 + $0x40] sm:$0xff]  ;;  %v855_v13 = vld [vmem:[%s7328_s1 + $0x58] sm:$0xff] }
 0x27a   : > { %v5706_v53 = vpop.f32.mrf.mxu1  ;;  %v5734_v16 = vpop.f32.mrf.mxu0 }
 0x27b   : > { %v1047_v29 = vadd.f32 %v5706_v53, %v911_v59  ;;  %v1200_v36 = vadd.f32 %v5734_v16, %v911_v59  ;;  %v1267_v21 = vsel %vm1239_vm1, %v7792_v57, -inf  ;;  %v1243_v56 = vsel %vm1239_vm1, %v7795_v39, -inf }
 0x27c   : > { %v1194_v60 = vpop.f32.mrf.mxu0  ;;  %1268 = vmax.xlane.f32.xlu1 %v1267_v21  ;;  %1244 = vmax.xlane.f32.xlu0 %v1243_v56  ;;  %v1041_v2 = vpop.f32.mrf.mxu1  ;;  %v7809_v48 = vadd.f32 %v1032_v18, %v7798_v45  ;;  %v7815_v26 = vadd.f32 %v1185_v9, %v852_v1  ;;  %v854_v9 = vld [vmem:[%s7328_s1 + $0x50] sm:$0xff] }
 0x27d   : > { %v7813_v16 = vadd.f32 %v1047_v29, %v7801_v51  ;;  %v1195_v53 = vadd.f32 %v1194_v60, %v910_v43  ;;  %v1042_v34 = vadd.f32 %v1041_v2, %v910_v43  ;;  %v7821_v56 = vadd.f32 %v1200_v36, %v855_v13  ;;  %v7824_v60 = vld [vmem:[%s7328_s1 + $0x10] sm:$0xff] }
 0x27e   : > { %v5709_v59 = vpop.f32.mrf.mxu1  ;;  %v5737_v40 = vpop.f32.mrf.mxu0  ;;  %v1240_v18 = vsel %vm1239_vm1, %v7809_v48, -inf  ;;  %9771 = vst [vmem:[#allocation59_spill] sm:$0xff] %v7824_v60  ;;  %v1264_v1 = vsel %vm1239_vm1, %v7815_v26, -inf }
 0x27f   : > { %v1249_v21 = vsel %vm1239_vm1, %v7813_v16, -inf  ;;  %v1057_v43 = vadd.f32 %v5709_v59, %v913_v31  ;;  %v1273_v36 = vsel %vm1239_vm1, %v7821_v56, -inf  ;;  %v7832_v13 = vadd.f32 %v1042_v34, %v7824_v60  ;;  %v7840_v59 = vld [vmem:[%s7328_s1 + $0x20] sm:$0xff] }
 0x280   : > { %1250 = vmax.xlane.f32.xlu1 %v1249_v21  ;;  %v1051_v29 = vpop.f32.mrf.mxu1  ;;  %1241 = vmax.xlane.f32.xlu0 %v1240_v18  ;;  %v1204_v2 = vpop.f32.mrf.mxu0  ;;  %v7834_v21 = vadd.f32 %v1195_v53, %v854_v9  ;;  %v7837_v18 = vld [vmem:[%s7328_s1 + $0x28] sm:$0xff]  ;;  %9773 = vst [vmem:[#allocation61_spill] sm:$0xff] %v7840_v59  ;;  %v1210_v42 = vadd.f32 %v5737_v40, %v913_v31  ;;  %v914_v31 = vld [vmem:[#allocation9 + $0x30] sm:$0xff] }
 0x281   : > { %v1052_v50 = vadd.f32 %v1051_v29, %v912_v52  ;;  %9772 = vst [vmem:[#allocation60_spill] sm:$0xff] %v7837_v18  ;;  %v1205_v46 = vadd.f32 %v1204_v2, %v912_v52  ;;  %v915_v29 = vld [vmem:[#allocation9 + $0x38] sm:$0xff]  ;;  %v1246_v22 = vsel %vm1239_vm1, %v7832_v13, -inf  ;;  %v7847_v53 = vadd.f32 %v1057_v43, %v7837_v18  ;;  %v856_v52 = vld [vmem:[%s7328_s1 + $0x60] sm:$0xff] }
 0x282   : > { %v5712_v47 = vpop.f32.mrf.mxu1  ;;  %v1270_v34 = vsel %vm1239_vm1, %v7834_v21, -inf }
 0x283   : > { %v7850_v9 = vadd.f32 %v1052_v50, %v7840_v59  ;;  %v1067_v2 = vadd.f32 %v5712_v47, %v915_v29  ;;  %v1255_v50 = vsel %vm1239_vm1, %v7847_v53, -inf  ;;  %v7863_v33 = vadd.f32 %v1205_v46, %v856_v52  ;;  %v858_v52 = vld [vmem:[%s7328_s1 + $0x70] sm:$0xff] }
 0x284   : > { %1274 = vmax.xlane.f32.xlu1 %v1273_v36  ;;  %1265 = vmax.xlane.f32.xlu0 %v1264_v1  ;;  %v7853_v1 = vld [vmem:[%s7328_s1 + $0x68] sm:$0xff]  ;;  %v5740_v36 = vpop.f32.mrf.mxu0  ;;  %v1061_v40 = vpop.f32.mrf.mxu1 }
 0x285   : > { %9774 = vst [vmem:[#allocation62_spill] sm:$0xff] %v7853_v1  ;;  %v7857_v5 = vadd.f32 %v1210_v42, %v7853_v1  ;;  %v1062_v3 = vadd.f32 %v1061_v40, %v914_v31  ;;  %v1252_v43 = vsel %vm1239_vm1, %v7850_v9, -inf  ;;  %v1276_v40 = vsel %vm1239_vm1, %v7863_v33, -inf }
 0x286   : > { %v1214_v12 = vpop.f32.mrf.mxu0 }
 0x287   : > { %v1279_v42 = vsel %vm1239_vm1, %v7857_v5, -inf  ;;  %v1215_v47 = vadd.f32 %v1214_v12, %v914_v31 }
 0x288   : > { %1247 = vmax.xlane.f32.xlu1 %v1246_v22  ;;  %1271 = vmax.xlane.f32.xlu0 %v1270_v34  ;;  %v7866_v22 = vld [vmem:[%s7328_s1 + $0x38] sm:$0xff]  ;;  %v7869_v34 = vld [vmem:[%s7328_s1 + $0x30] sm:$0xff] }
 0x289   : > { %9775 = vst [vmem:[#allocation63_spill] sm:$0xff] %v7866_v22  ;;  %9776 = vst [vmem:[#allocation64_spill] sm:$0xff] %v7869_v34  ;;  %v7876_v1 = vadd.f32 %v1067_v2, %v7866_v22  ;;  %v7879_v46 = vadd.f32 %v1062_v3, %v7869_v34  ;;  %v7886_v12 = vadd.f32 %v1215_v47, %v858_v52  ;;  %v7895_v2 = vld [vmem:[%s7328_s1 + $0x78] sm:$0xff] }
 0x28a   : > { %v1220_v3 = vadd.f32 %v5740_v36, %v915_v29  ;;  %9777 = vst [vmem:[#allocation65_spill] sm:$0xff] %v7895_v2 }
 0x28b   : > { %v1282_v31 = vsel %vm1239_vm1, %v7886_v12, -inf }
 0x28c   : > { %1256 = vmax.xlane.f32.xlu1 %v1255_v50  ;;  %1253 = vmax.xlane.f32.xlu0 %v1252_v43  ;;  %v1261_v50 = vsel %vm1239_vm1, %v7876_v1, -inf  ;;  %v1258_v43 = vsel %vm1239_vm1, %v7879_v46, -inf }
 0x290   : > { %1280 = vmax.xlane.f32.xlu1 %v1279_v42  ;;  %1277 = vmax.xlane.f32.xlu0 %v1276_v40  ;;  %v7898_v42 = vadd.f32 %v1220_v3, %v7895_v2  ;;  %v7902_v40 = vpop.permute.xlu1 %1960 }
 0x292   : > { %v1285_v47 = vsel %vm1239_vm1, %v7898_v42, -inf }
 0x294   : > { %1262 = vmax.xlane.f32.xlu1 %v1261_v50  ;;  %1259 = vmax.xlane.f32.xlu0 %v1258_v43  ;;  %v7904_v52 = vpop.permute.xlu1 %1962 }
 0x298   : > { %1283 = vmax.xlane.f32.xlu0 %v1282_v31 }
 0x2a5   : > { %1741 = vrot.lane.b32.xlu1 %v7620_v4, %s7045_s23 }
 0x2ae   : > { %1954 = vrot.lane.b32.xlu0 %v7554_v54, %s7045_s23 }
 0x2c9   : > { %1286 = vmax.xlane.f32.xlu1 %v1285_v47 }
 0x305   : > { %v1269_v50 = vpop.xlane.xlu1 %1268  ;;  %v1245_v43 = vpop.xlane.xlu0 %1244 }
 0x306   : > { %v1297_v31 = vsub.f32 %v7792_v57, %v1269_v50  ;;  %v1289_v54 = vsub.f32 %v7795_v39, %v1245_v43 }
 0x308   : > { %v1306_v29 = vmul.f32 1.442695, %v1289_v54  ;;  %v1322_v36 = vmul.f32 1.442695, %v1297_v31 }
 0x309   : > { %v1251_v4 = vpop.xlane.xlu1 %1250  ;;  %v1242_v34 = vpop.xlane.xlu0 %1241 }
 0x30a   : > { %v1291_v3 = vsub.f32 %v7813_v16, %v1251_v4  ;;  %v1288_v2 = vsub.f32 %v7809_v48, %v1242_v34  ;;  %6489 = vpow2.f32 %v1306_v29 }
 0x30b   : > { %6491 = vpow2.f32 %v1322_v36 }
 0x30c   : > { %v1304_v47 = vmul.f32 1.442695, %v1288_v2  ;;  %v1310_v22 = vmul.f32 1.442695, %v1291_v3 }
 0x30d   : > { %v1275_v59 = vpop.xlane.xlu1 %1274  ;;  %v1266_v18 = vpop.xlane.xlu0 %1265 }
 0x30e   : > { %v1299_v60 = vsub.f32 %v7821_v56, %v1275_v59  ;;  %v1296_v57 = vsub.f32 %v7815_v26, %v1266_v18  ;;  %6493 = vpow2.f32 %v1304_v47 }
 0x30f   : > { %6495 = vpow2.f32 %v1310_v22 }
 0x310   : > { %v1320_v39 = vmul.f32 1.442695, %v1296_v57  ;;  %v1326_v54 = vmul.f32 1.442695, %v1299_v60 }
 0x311   : > { %v1248_v50 = vpop.xlane.xlu1 %1247  ;;  %v1272_v43 = vpop.xlane.xlu0 %1271 }
 0x312   : > { %v1290_v4 = vsub.f32 %v7832_v13, %v1248_v50  ;;  %v1298_v48 = vsub.f32 %v7834_v21, %v1272_v43  ;;  %6497 = vpow2.f32 %v1320_v39 }
 0x313   : > { %6499 = vpow2.f32 %v1326_v54 }
 0x314   : > { %v1324_v16 = vmul.f32 1.442695, %v1298_v48  ;;  %v1308_v34 = vmul.f32 1.442695, %v1290_v4 }
 0x315   : > { %v1257_v2 = vpop.xlane.xlu1 %1256  ;;  %v1254_v31 = vpop.xlane.xlu0 %1253 }
 0x316   : > { %v1293_v56 = vsub.f32 %v7847_v53, %v1257_v2  ;;  %v1292_v26 = vsub.f32 %v7850_v9, %v1254_v31  ;;  %6501 = vpow2.f32 %v1324_v16 }
 0x317   : > { %v7916_v18 = vpop.eup %6489  ;;  %6503 = vpow2.f32 %v1308_v34 }
 0x318   : > { %v1314_v60 = vmul.f32 1.442695, %v1293_v56  ;;  %v1312_v59 = vmul.f32 1.442695, %v1292_v26  ;;  %v1339_v13 = vsel %vm1239_vm1, %v7916_v18, 0.0  ;;  %v7920_v29 = vpop.eup %6491 }
 0x319   : > { %v1281_v21 = vpop.xlane.xlu1 %1280  ;;  %v1278_v22 = vpop.xlane.xlu0 %1277  ;;  %1340 = vadd.xlane.f32.xlu1 %v1339_v13  ;;  %v1363_v57 = vsel %vm1239_vm1, %v7920_v29, 0.0 }
 0x31a   : > { %6505 = vpow2.f32 %v1314_v60  ;;  %v1301_v36 = vsub.f32 %v7857_v5, %v1281_v21  ;;  %v1300_v53 = vsub.f32 %v7863_v33, %v1278_v22 }
 0x31b   : > { %v7924_v9 = vpop.eup %6493  ;;  %6507 = vpow2.f32 %v1312_v59 }
 0x31c   : > { %v1330_v3 = vmul.f32 1.442695, %v1301_v36  ;;  %v1328_v47 = vmul.f32 1.442695, %v1300_v53  ;;  %v1336_v54 = vsel %vm1239_vm1, %v7924_v9, 0.0  ;;  %v7930_v43 = vpop.eup %6495 }
 0x31d   : > { %v1263_v39 = vpop.xlane.xlu1 %1262  ;;  %v1260_v50 = vpop.xlane.xlu0 %1259  ;;  %1364 = vadd.xlane.f32.xlu1 %v1363_v57  ;;  %1337 = vadd.xlane.f32.xlu0 %v1336_v54  ;;  %v1345_v34 = vsel %vm1239_vm1, %v7930_v43, 0.0 }
 0x31e   : > { %6509 = vpow2.f32 %v1330_v3  ;;  %v1295_v5 = vsub.f32 %v7876_v1, %v1263_v39  ;;  %v1294_v33 = vsub.f32 %v7879_v46, %v1260_v50 }
 0x31f   : > { %v7934_v4 = vpop.eup %6497  ;;  %6511 = vpow2.f32 %v1328_v47 }
 0x320   : > { %v1316_v48 = vmul.f32 1.442695, %v1294_v33  ;;  %v1318_v16 = vmul.f32 1.442695, %v1295_v5  ;;  %v1360_v31 = vsel %vm1239_vm1, %v7934_v4, 0.0  ;;  %v7940_v56 = vpop.eup %6499 }
 0x321   : > { %v1742_v2 = vpop.permute.xlu1 %1741  ;;  %1346 = vadd.xlane.f32.xlu1 %v1345_v34  ;;  %1361 = vadd.xlane.f32.xlu0 %v1360_v31  ;;  %v1369_v46 = vsel %vm1239_vm1, %v7940_v56, 0.0  ;;  %v1284_v33 = vpop.xlane.xlu0 %1283 }
 0x322   : > { %6513 = vpow2.f32 %v1316_v48  ;;  %5814 = vmatmul.mubr.msk.f32.vlgmr.msra.gmra.mxu0 %vm916_vm0, %v1742_v2  ;;  %v1302_v48 = vsub.f32 %v7886_v12, %v1284_v33 }
 0x323   : > { %v7943_v1 = vpop.eup %6501  ;;  %6515 = vpow2.f32 %v1318_v16 }
 0x324   : > { %v1366_v26 = vsel %vm1239_vm1, %v7943_v1, 0.0  ;;  %v7949_v60 = vpop.eup %6503  ;;  %v1332_v16 = vmul.f32 1.442695, %v1302_v48 }
 0x325   : > { %1370 = vadd.xlane.f32.xlu0 %v1369_v46  ;;  %1367 = vadd.xlane.f32.xlu1 %v1366_v26  ;;  %v1342_v21 = vsel %vm1239_vm1, %v7949_v60, 0.0  ;;  %v8021_v12 = vpop.permute.xlu0 %1954 }
 0x326   : > { %6517 = vpow2.f32 %v1332_v16 }
 0x327   : > { %v7951_v59 = vpop.eup %6505 }
 0x328   : > { %v1351_v13 = vsel %vm1239_vm1, %v7951_v59, 0.0  ;;  %v7957_v22 = vpop.eup %6507 }
 0x329   : > { %1343 = vadd.xlane.f32.xlu0 %v1342_v21  ;;  %1352 = vadd.xlane.f32.xlu1 %v1351_v13  ;;  %v1348_v3 = vsel %vm1239_vm1, %v7957_v22, 0.0 }
 0x32b   : > { %v7959_v36 = vpop.eup %6509 }
 0x32c   : > { %v1375_v53 = vsel %vm1239_vm1, %v7959_v36, 0.0  ;;  %v7965_v47 = vpop.eup %6511 }
 0x32d   : > { %1376 = vadd.xlane.f32.xlu1 %v1375_v53  ;;  %1349 = vadd.xlane.f32.xlu0 %v1348_v3  ;;  %v1372_v39 = vsel %vm1239_vm1, %v7965_v47, 0.0 }
 0x32f   : > { %v7967_v57 = vpop.eup %6513 }
 0x330   : > { %v1354_v54 = vsel %vm1239_vm1, %v7967_v57, 0.0  ;;  %v7973_v50 = vpop.eup %6515 }
 0x331   : > { %1373 = vadd.xlane.f32.xlu1 %v1372_v39  ;;  %1355 = vadd.xlane.f32.xlu0 %v1354_v54  ;;  %v1357_v5 = vsel %vm1239_vm1, %v7973_v50, 0.0 }
 0x333   : > { %v7983_v46 = vpop.eup %6517 }
 0x334   : > { %v1378_v26 = vsel %vm1239_vm1, %v7983_v46, 0.0 }
 0x335   : > { %1358 = vadd.xlane.f32.xlu1 %v1357_v5 }
 0x346   : > { %1952 = vrot.lane.b32.xlu1 %v7565_v55, %s7045_s23 }
 0x347   : > { %1950 = vrot.lane.b32.xlu0 %v7581_v58, %s7045_s23 }
 0x352   : > { %v1287_v34 = vpop.xlane.xlu1 %1286 }
 0x353   : > { %v1303_v2 = vsub.f32 %v7898_v42, %v1287_v34 }
 0x355   : > { %v1334_v31 = vmul.f32 1.442695, %v1303_v2 }
 0x357   : > { %6519 = vpow2.f32 %v1334_v31 }
 0x364   : > { %v7987_v13 = vpop.eup %6519 }
 0x365   : > { %v1381_v21 = vsel %vm1239_vm1, %v7987_v13, 0.0 }
 0x366   : > { %1379 = vadd.xlane.f32.xlu0 %v1378_v26 }
 0x36a   : > { %1382 = vadd.xlane.f32.xlu1 %v1381_v21 }
 0x37b   : > { %1948 = vrot.lane.b32.xlu1 %v7598_v62, %s7045_s23 }
 0x37c   : > { %1924 = vrot.lane.b32.xlu0 %v7422_v10, %s7045_s23 }
 0x37f   : > { %1926 = vrot.lane.b32.xlu1 %v7624_v6, %s7045_s23 }
 0x380   : > { %1743 = vrot.lane.b32.xlu0 %v7628_v8, %s7045_s23 }
 0x383   : > { %1745 = vrot.lane.b32.xlu1 %v7651_v15, %s7045_s23 }
 0x384   : > { %1747 = vrot.lane.b32.xlu0 %v7660_v19, %s7045_s23 }
 0x387   : > { %1749 = vrot.lane.b32.xlu1 %v7686_v27, %s7045_s23 }
 0x388   : > { %1751 = vrot.lane.b32.xlu0 %v7695_v30, %s7045_s23 }
 0x38b   : > { %1753 = vrot.lane.b32.xlu1 %v7721_v38, %s7045_s23 }
 0x38c   : > { %1928 = vrot.lane.b32.xlu0 %v7632_v11, %s7045_s23 }
 0x38f   : > { %1930 = vrot.lane.b32.xlu1 %v7655_v17, %s7045_s23 }
 0x390   : > { %1932 = vrot.lane.b32.xlu0 %v7664_v20, %s7045_s23 }
 0x393   : > { %1934 = vrot.lane.b32.xlu1 %v7690_v28, %s7045_s23 }
 0x394   : > { %1936 = vrot.lane.b32.xlu0 %v7699_v32, %s7045_s23 }
 0x397   : > { %1938 = vrot.lane.b32.xlu1 %v7725_v41, %s7045_s23 }
 0x3a2   : > { %v1341_v42 = vpop.xlane.xlu1 %1340 }
 0x3a3   : > { %6521 = vrcp.f32 %v1341_v42  ;;  %v8028_v42 = vadd.f32 %v7786_v24, %v7605_v0 }
 0x3a5   : > { %9778 = vst [vmem:[#allocation66_spill] sm:$0xff] %v8028_v42 }
 0x3a6   : > { %v1365_v53 = vpop.xlane.xlu1 %1364  ;;  %v1338_v3 = vpop.xlane.xlu0 %1337 }
 0x3a7   : > { %6523 = vrcp.f32 %v1338_v3 }
 0x3aa   : > { %v1347_v39 = vpop.xlane.xlu1 %1346  ;;  %v1362_v54 = vpop.xlane.xlu0 %1361 }
 0x3ab   : > { %6525 = vrcp.f32 %v1347_v39 }
 0x3ae   : > { %v1368_v5 = vpop.xlane.xlu1 %1367  ;;  %v1371_v33 = vpop.xlane.xlu0 %1370 }
 0x3b0   : > { %v6522_v34 = vpop.eup %6521 }
 0x3b1   : > { %v1401_v32 = vmul.f32 %v6522_v34, %v7916_v18 }
 0x3b2   : > { %v1353_v48 = vpop.xlane.xlu1 %1352  ;;  %v1344_v16 = vpop.xlane.xlu0 %1343 }
 0x3b3   : > { %6527 = vrcp.f32 %v1344_v16 }
 0x3b4   : > { %v6524_v2 = vpop.eup %6523  ;;  %6529 = vrcp.f32 %v1353_v48 }
 0x3b5   : > { %v1400_v21 = vmul.f32 %v6524_v2, %v7924_v9 }
 0x3b6   : > { %v1377_v31 = vpop.xlane.xlu1 %1376  ;;  %v1350_v26 = vpop.xlane.xlu0 %1349 }
 0x3b7   : > { %6531 = vrcp.f32 %v1350_v26  ;;  %5757 = vmatprep.mubr.msk.f32.mxu1 %vm1239_vm1, %v1400_v21 }
 0x3b8   : > { %5758 = vmatmul.mubr.msk.f32.vlgmr.msra.gmra.mxu1 %vm1239_vm1, %v1401_v32  ;;  %v6526_v0 = vpop.eup %6525 }
 0x3b9   : > { %5770 = vmatpush3.msra.mxu1 %v7759_v49  ;;  %v1403_v9 = vmul.f32 %v6526_v0, %v7930_v43 }
 0x3ba   : > { %v1374_v3 = vpop.xlane.xlu1 %1373  ;;  %v1356_v39 = vpop.xlane.xlu0 %1355  ;;  %5771 = vmatprep.subr.mxu1 %v8028_v42 }
 0x3bb   : > { %5772 = vmatpush3.msra.mxu1 %v8028_v42  ;;  %6533 = vrcp.f32 %v1356_v39 }
 0x3bc   : > { %5773 = vmatprep.subr.mxu1 %v7717_v37  ;;  %6535 = vrcp.f32 %v1362_v54 }
 0x3bd   : > { %5774 = vmatpush3.msra.mxu1 %v7717_v37 }
 0x3be   : > { %v1359_v18 = vpop.xlane.xlu1 %1358  ;;  %5775 = vmatprep.subr.mxu1 %v7734_v44  ;;  %v1951_v0 = vpop.permute.xlu0 %1950 }
 0x3bf   : > { %6537 = vrcp.f32 %v1359_v18  ;;  %5776 = vmatpush3.msra.mxu1 %v7734_v44 }
 0x3c0   : > { %v6528_v32 = vpop.eup %6527  ;;  %6539 = vrcp.f32 %v1365_v53  ;;  %5777 = vmatprep.subr.mxu1 %v7682_v25 }
 0x3c1   : > { %6541 = vrcp.f32 %v1368_v5  ;;  %5778 = vmatpush3.msra.mxu1 %v7682_v25  ;;  %v1402_v24 = vmul.f32 %v6528_v32, %v7949_v60  ;;  %v6530_v54 = vpop.eup %6529 }
 0x3c2   : > { %5779 = vmatprep.subr.mxu1 %v7706_v35  ;;  %6543 = vrcp.f32 %v1371_v33  ;;  %v1405_v43 = vmul.f32 %v6530_v54, %v7951_v59 }
 0x3c3   : > { %5780 = vmatpush3.msra.mxu1 %v7706_v35  ;;  %5760 = vmatprep.mubr.msk.f32.mxu1 %vm1239_vm1, %v1402_v24  ;;  %6545 = vrcp.f32 %v1374_v3 }
 0x3c4   : > { %v6532_v48 = vpop.eup %6531  ;;  %5781 = vmatprep.subr.mxu1 %v7647_v14  ;;  %5761 = vmatmul.mubr.msk.f32.gmra.mxu1 %vm1239_vm1, %v1403_v9  ;;  %6547 = vrcp.f32 %v1377_v31 }
 0x3c5   : > { %5782 = vmatpush3.msra.mxu1 %v7647_v14  ;;  %v1404_v60 = vmul.f32 %v6532_v48, %v7957_v22 }
 0x3c6   : > { %5783 = vmatprep.subr.mxu1 %v7671_v23 }
 0x3c7   : > { %5784 = vmatpush3.msra.mxu1 %v7671_v23  ;;  %5763 = vmatprep.mubr.msk.f32.mxu1 %vm1239_vm1, %v1404_v60 }
 0x3c8   : > { %v6534_v53 = vpop.eup %6533  ;;  %5825 = vmatprep.subr.msk.mxu1 %vm916_vm0, %v7904_v52  ;;  %5764 = vmatmul.mubr.msk.f32.gmra.mxu1 %vm1239_vm1, %v1405_v43 }
 0x3c9   : > { %v1406_v5 = vmul.f32 %v6534_v53, %v7967_v57  ;;  %v6536_v33 = vpop.eup %6535 }
 0x3ca   : > { %v1408_v34 = vmul.f32 %v6536_v33, %v7934_v4 }
 0x3cb   : > { %5766 = vmatprep.mubr.msk.f32.mxu1 %vm1239_vm1, %v1406_v5 }
 0x3cc   : > { %v6538_v16 = vpop.eup %6537 }
 0x3cd   : > { %v1407_v22 = vmul.f32 %v6538_v16, %v7973_v50  ;;  %v6540_v59 = vpop.eup %6539 }
 0x3ce   : > { %v6542_v2 = vpop.eup %6541  ;;  %v1409_v31 = vmul.f32 %v6540_v59, %v7920_v29  ;;  %v8086_v29 = vld [vmem:[#allocation9 + $0x48] sm:$0xff] }
 0x3cf   : > { %5767 = vmatmul.mubr.msk.f32.gmra.mxu1 %vm1239_vm1, %v1407_v22  ;;  %v6544_v26 = vpop.eup %6543  ;;  %v1410_v21 = vmul.f32 %v6542_v2, %v7943_v1 }
 0x3d0   : > { %5785 = vmatprep.mubr.msk.f32.mxu1 %vm1239_vm1, %v1408_v34  ;;  %v6546_v57 = vpop.eup %6545  ;;  %v1411_v4 = vmul.f32 %v6544_v26, %v7940_v56  ;;  %v8090_v56 = vld [vmem:[#allocation9 + $0x40] sm:$0xff] }
 0x3d1   : > { %v6548_v50 = vpop.eup %6547  ;;  %v1412_v3 = vmul.f32 %v6546_v57, %v7965_v47 }
 0x3d3   : > { %5786 = vmatmul.mubr.msk.f32.vlgmr.msra.gmra.mxu1 %vm1239_vm1, %v1409_v31 }
 0x3d4   : > { %5826 = vmatpush3.xpose.msk.msra.mxu1 %vm916_vm0, %v7904_v52  ;;  %5788 = vmatprep.mubr.msk.f32.mxu1 %vm1239_vm1, %v1410_v21  ;;  %v1413_v52 = vmul.f32 %v6548_v50, %v7959_v36  ;;  %v1953_v36 = vpop.permute.xlu1 %1952  ;;  %v8130_v21 = vld [vmem:[#allocation9 + $0x58] sm:$0xff] }
 0x3d5   : > { %5827 = vmatprep.subr.msk.mxu1 %vm916_vm0, %v7902_v40 }
 0x3d7   : > { %5789 = vmatmul.mubr.msk.f32.gmra.mxu1 %vm1239_vm1, %v1411_v4  ;;  %v8132_v4 = vld [vmem:[#allocation9 + $0x50] sm:$0xff] }
 0x3d8   : > { %5828 = vmatpush3.xpose.msk.msra.mxu1 %vm916_vm0, %v7902_v40  ;;  %5791 = vmatprep.mubr.msk.f32.mxu1 %vm1239_vm1, %v1412_v3 }
 0x3d9   : > { %5829 = vmatprep.subr.msk.mxu1 %vm916_vm0, %v7768_v7 }
 0x3db   : > { %5792 = vmatmul.mubr.msk.f32.gmra.mxu1 %vm1239_vm1, %v1413_v52  ;;  %v8135_v52 = vld [vmem:[#allocation9 + $0x68] sm:$0xff] }
 0x3dc   : > { %5830 = vmatpush3.xpose.msk.msra.mxu1 %vm916_vm0, %v7768_v7 }
 0x3dd   : > { %5831 = vmatprep.subr.msk.mxu1 %vm916_vm0, %v7766_v63 }
 0x3e0   : > { %5832 = vmatpush3.xpose.msk.msra.mxu1 %vm916_vm0, %v7766_v63 }
 0x3e1   : > { %5833 = vmatprep.subr.msk.mxu1 %vm916_vm0, %v8021_v12 }
 0x3e2   : > { %v5815_v40 = vpop.f32.mrf.mxu0 }
 0x3e3   : > { %v1883_v1 = vadd.f32 %v5815_v40, %v8086_v29 }
 0x3e4   : > { %5834 = vmatpush3.xpose.msk.msra.mxu1 %vm916_vm0, %v8021_v12  ;;  %v1877_v7 = vpop.f32.mrf.mxu0 }
 0x3e5   : > { %v1878_v47 = vadd.f32 %v1877_v7, %v8090_v56  ;;  %5835 = vmatprep.subr.msk.mxu1 %vm916_vm0, %v1953_v36  ;;  %v8098_v63 = vadd.f32 %v1883_v1, %v7790_v61  ;;  %v8141_v7 = vld [vmem:[#allocation9 + $0x60] sm:$0xff] }
 0x3e7   : > { %v2120_v39 = vsel %vm1239_vm1, %v8098_v63, -inf  ;;  %v8103_v18 = vadd.f32 %v1878_v47, %v7798_v45 }
 0x3e8   : > { %5836 = vmatpush3.xpose.msk.msra.mxu1 %vm916_vm0, %v1953_v36  ;;  %2121 = vmax.xlane.f32.xlu1 %v2120_v39 }
 0x3e9   : > { %5837 = vmatprep.subr.msk.mxu1 %vm916_vm0, %v1951_v0  ;;  %v2117_v12 = vsel %vm1239_vm1, %v8103_v18, -inf }
 0x3ea   : > { %2118 = vmax.xlane.f32.xlu0 %v2117_v12 }
 0x3ec   : > { %5838 = vmatpush3.xpose.msk.msra.mxu1 %vm916_vm0, %v1951_v0  ;;  %v9779_v0 = vld [vmem:[#allocation59_spill] sm:$0xff] }
 0x3ef   : > { %v1380_v61 = vpop.xlane.xlu0 %1379 }
 0x3f0   : > { %6549 = vrcp.f32 %v1380_v61 }
 0x3f3   : > { %v1383_v32 = vpop.xlane.xlu1 %1382  ;;  %v1925_v24 = vpop.permute.xlu0 %1924 }
 0x3f4   : > { %6551 = vrcp.f32 %v1383_v32  ;;  %v8149_v32 = vld [vmem:[#allocation9 + $0x78] sm:$0xff] }
 0x3f7   : > { %v1949_v9 = vpop.permute.xlu1 %1948  ;;  %v1744_v45 = vpop.permute.xlu0 %1743 }
 0x3f8   : > { %5816 = vmatprep.mubr.msk.f32.mxu0 %vm916_vm0, %v1744_v45  ;;  %5839 = vmatprep.subr.msk.mxu1 %vm916_vm0, %v1949_v9 }
 0x3f9   : > { %5840 = vmatpush3.xpose.msk.msra.mxu1 %vm916_vm0, %v1949_v9  ;;  %v9780_v9 = vld [vmem:[#allocation60_spill] sm:$0xff] }
 0x3fb   : > { %v1927_v54 = vpop.permute.xlu1 %1926  ;;  %v1748_v48 = vpop.permute.xlu0 %1747 }
 0x3fd   : > { %v6550_v60 = vpop.eup %6549 }
 0x3fe   : > { %v1414_v43 = vmul.f32 %v6550_v60, %v7983_v46 }
 0x3ff   : > { %v1746_v53 = vpop.permute.xlu1 %1745  ;;  %v1752_v5 = vpop.permute.xlu0 %1751 }
 0x400   : > { %5794 = vmatprep.mubr.msk.f32.mxu1 %vm1239_vm1, %v1414_v43  ;;  %5817 = vmatmul.mubr.msk.f32.gmra.mxu0 %vm916_vm0, %v1746_v53  ;;  %v9781_v53 = vld [vmem:[#allocation61_spill] sm:$0xff] }
 0x401   : > { %v6552_v33 = vpop.eup %6551  ;;  %5819 = vmatprep.mubr.msk.f32.mxu0 %vm916_vm0, %v1748_v48  ;;  %v8157_v48 = vld [vmem:[#allocation9 + $0x70] sm:$0xff] }
 0x402   : > { %v1415_v16 = vmul.f32 %v6552_v33, %v7987_v13 }
 0x403   : > { %v1750_v22 = vpop.permute.xlu1 %1749  ;;  %v1929_v59 = vpop.permute.xlu0 %1928 }
 0x404   : > { %5795 = vmatmul.mubr.msk.f32.gmra.mxu1 %vm1239_vm1, %v1415_v16  ;;  %5820 = vmatmul.mubr.msk.f32.gmra.mxu0 %vm916_vm0, %v1750_v22 }
 0x405   : > { %5822 = vmatprep.mubr.msk.f32.mxu0 %vm916_vm0, %v1752_v5  ;;  %5841 = vmatprep.mubr.msk.f32.mxu1 %vm916_vm0, %v1925_v24 }
 0x407   : > { %v1754_v46 = vpop.permute.xlu1 %1753  ;;  %v1933_v34 = vpop.permute.xlu0 %1932 }
 0x408   : > { %5823 = vmatmul.mubr.msk.f32.gmra.mxu0 %vm916_vm0, %v1754_v46  ;;  %5842 = vmatmul.mubr.msk.f32.vlgmr.msra.gmra.mxu1 %vm916_vm0, %v1927_v54 }
 0x409   : > { %5844 = vmatprep.mubr.msk.f32.mxu1 %vm916_vm0, %v1929_v59  ;;  %v9782_v59 = vld [vmem:[#allocation63_spill] sm:$0xff] }
 0x40b   : > { %v1931_v2 = vpop.permute.xlu1 %1930  ;;  %v1937_v31 = vpop.permute.xlu0 %1936 }
 0x40c   : > { %5845 = vmatmul.mubr.msk.f32.gmra.mxu1 %vm916_vm0, %v1931_v2 }
 0x40d   : > { %5847 = vmatprep.mubr.msk.f32.mxu1 %vm916_vm0, %v1933_v34  ;;  %v9783_v34 = vld [vmem:[#allocation64_spill] sm:$0xff] }
 0x40f   : > { %v1935_v13 = vpop.permute.xlu1 %1934 }
 0x410   : > { %5848 = vmatmul.mubr.msk.f32.gmra.mxu1 %vm916_vm0, %v1935_v13 }
 0x411   : > { %5850 = vmatprep.mubr.msk.f32.mxu1 %vm916_vm0, %v1937_v31 }
 0x413   : > { %v1939_v26 = vpop.permute.xlu1 %1938 }
 0x414   : > { %5851 = vmatmul.mubr.msk.f32.gmra.mxu1 %vm916_vm0, %v1939_v26  ;;  %v9784_v26 = vld [vmem:[#allocation44_spill] sm:$0xff] }
 0x4c0   : > { %v5818_v57 = vpop.f32.mrf.mxu0 }
 0x4c1   : > { %v1893_v50 = vadd.f32 %v5818_v57, %v8130_v21  ;;  %v9785_v57 = vld [vmem:[#allocation50_spill] sm:$0xff] }
 0x4c2   : > { %v1887_v3 = vpop.f32.mrf.mxu0 }
 0x4c3   : > { %v1888_v40 = vadd.f32 %v1887_v3, %v8132_v4  ;;  %v8139_v1 = vadd.f32 %v1893_v50, %v7801_v51  ;;  %v9786_v50 = vld [vmem:[#allocation42_spill] sm:$0xff]  ;;  %v9787_v3 = vld [vmem:[#allocation55_spill] sm:$0xff] }
 0x4c4   : > { %v5821_v36 = vpop.f32.mrf.mxu0 }
 0x4c5   : > { %v1903_v47 = vadd.f32 %v5821_v36, %v8135_v52  ;;  %v2126_v39 = vsel %vm1239_vm1, %v8139_v1, -inf  ;;  %v8147_v12 = vadd.f32 %v1888_v40, %v9779_v0  ;;  %v9788_v40 = vld [vmem:[#allocation46_spill] sm:$0xff]  ;;  %v9789_v36 = vld [vmem:[#allocation56_spill] sm:$0xff] }
 0x4c6   : > { %2127 = vmax.xlane.f32.xlu1 %v2126_v39  ;;  %v1897_v61 = vpop.f32.mrf.mxu0  ;;  %v9791_v39 = vld [vmem:[#allocation57_spill] sm:$0xff]  ;;  %v9792_v0 = vld [vmem:[#allocation36_spill] sm:$0xff] }
 0x4c7   : > { %v1898_v24 = vadd.f32 %v1897_v61, %v8141_v7  ;;  %v2123_v51 = vsel %vm1239_vm1, %v8147_v12, -inf  ;;  %v8155_v45 = vadd.f32 %v1903_v47, %v9780_v9  ;;  %v9790_v47 = vld [vmem:[#allocation53_spill] sm:$0xff]  ;;  %v9793_v61 = vld [vmem:[#allocation38_spill] sm:$0xff]  ;;  %v9796_v9 = vld [vmem:[#allocation32_spill] sm:$0xff] }
 0x4c8   : > { %2124 = vmax.xlane.f32.xlu0 %v2123_v51  ;;  %v5824_v54 = vpop.f32.mrf.mxu0  ;;  %v9795_v51 = vld [vmem:[#allocation31_spill] sm:$0xff] }
 0x4c9   : > { %v1913_v60 = vadd.f32 %v5824_v54, %v8149_v32  ;;  %v2132_v43 = vsel %vm1239_vm1, %v8155_v45, -inf  ;;  %v8163_v5 = vadd.f32 %v1898_v24, %v9781_v53  ;;  %v9794_v24 = vld [vmem:[#allocation34_spill] sm:$0xff]  ;;  %v9800_v53 = vld [vmem:[#allocation28_spill] sm:$0xff] }
 0x4ca   : > { %2133 = vmax.xlane.f32.xlu1 %v2132_v43  ;;  %v1907_v33 = vpop.f32.mrf.mxu0  ;;  %v9797_v54 = vld [vmem:[#allocation30_spill] sm:$0xff]  ;;  %v9799_v43 = vld [vmem:[#allocation37_spill] sm:$0xff] }
 0x4cb   : > { %v1908_v16 = vadd.f32 %v1907_v33, %v8157_v48  ;;  %v2129_v22 = vsel %vm1239_vm1, %v8163_v5, -inf  ;;  %v8169_v46 = vadd.f32 %v1913_v60, %v9782_v59  ;;  %v9798_v60 = vld [vmem:[#allocation29_spill] sm:$0xff]  ;;  %v9801_v33 = vld [vmem:[#allocation39_spill] sm:$0xff]  ;;  %v2119_v59 = vpop.xlane.xlu0 %2118 }
 0x4cc   : > { %2130 = vmax.xlane.f32.xlu0 %v2129_v22  ;;  %v9803_v22 = vld [vmem:[#allocation35_spill] sm:$0xff] }
 0x4cd   : > { %v8172_v2 = vadd.f32 %v1908_v16, %v9783_v34  ;;  %v2138_v13 = vsel %vm1239_vm1, %v8169_v46, -inf  ;;  %v9802_v16 = vld [vmem:[#allocation27_spill] sm:$0xff]  ;;  %v8234_v34 = vpop.f32.mrf.mxu1 }
 0x4ce   : > { %2139 = vmax.xlane.f32.xlu1 %v2138_v13  ;;  %9804 = vst [vmem:[#allocation59_spill] sm:$0xff] %v8234_v34  ;;  %v2165_v13 = vsub.f32 %v8103_v18, %v2119_v59 }
 0x4cf   : > { %v2135_v31 = vsel %vm1239_vm1, %v8172_v2, -inf }
 0x4d0   : > { %2136 = vmax.xlane.f32.xlu0 %v2135_v31  ;;  %v9805_v31 = vld [vmem:[#allocation33_spill] sm:$0xff] }
 0x4df   : > { %2313 = vrot.lane.b32.xlu1 %v9784_v26, %s7045_s23 }
 0x4e3   : > { %2309 = vrot.lane.b32.xlu1 %v9785_v57, %s7045_s23 }
 0x4e6   : > { %2315 = vrot.lane.b32.xlu0 %v9786_v50, %s7045_s23 }
 0x4e7   : > { %2305 = vrot.lane.b32.xlu1 %v9787_v3, %s7045_s23 }
 0x4ea   : > { %2311 = vrot.lane.b32.xlu0 %v9788_v40, %s7045_s23 }
 0x4eb   : > { %2303 = vrot.lane.b32.xlu1 %v9789_v36, %s7045_s23 }
 0x4ee   : > { %2307 = vrot.lane.b32.xlu0 %v9790_v47, %s7045_s23 }
 0x4ef   : > { %2476 = vrot.lane.b32.xlu1 %v7759_v49, %s7045_s23 }
 0x4f2   : > { %2301 = vrot.lane.b32.xlu0 %v9791_v39, %s7045_s23 }
 0x4f3   : > { %2474 = vrot.lane.b32.xlu1 %v8028_v42, %s7045_s23 }
 0x4f6   : > { %2718 = vrot.lane.b32.xlu0 %v9792_v0, %s7046_s13 }
 0x4f7   : > { %2472 = vrot.lane.b32.xlu1 %v7717_v37, %s7045_s23 }
 0x4fa   : > { %2468 = vrot.lane.b32.xlu0 %v7682_v25, %s7045_s23 }
 0x4fb   : > { %2716 = vrot.lane.b32.xlu1 %v9793_v61, %s7046_s13 }
 0x4fe   : > { %2466 = vrot.lane.b32.xlu0 %v7706_v35, %s7045_s23 }
 0x4ff   : > { %2470 = vrot.lane.b32.xlu1 %v7734_v44, %s7045_s23 }
 0x502   : > { %2464 = vrot.lane.b32.xlu0 %v7647_v14, %s7045_s23 }
 0x503   : > { %2714 = vrot.lane.b32.xlu1 %v9794_v24, %s7046_s13 }
 0x506   : > { %2710 = vrot.lane.b32.xlu0 %v9795_v51, %s7046_s13 }
 0x507   : > { %2712 = vrot.lane.b32.xlu1 %v9796_v9, %s7046_s13 }
 0x50a   : > { %2708 = vrot.lane.b32.xlu0 %v9797_v54, %s7046_s13 }
 0x50b   : > { %2462 = vrot.lane.b32.xlu1 %v7671_v23, %s7045_s23 }
 0x50e   : > { %2706 = vrot.lane.b32.xlu0 %v9798_v60, %s7046_s13  ;;  %v9807_v60 = vld [vmem:[#allocation43_spill] sm:$0xff] }
 0x50f   : > { %2903 = vrot.lane.b32.xlu1 %v9799_v43, %s7046_s13  ;;  %v8239_v43 = vpop.f32.mrf.mxu1 }
 0x510   : > { %9806 = vst [vmem:[#allocation60_spill] sm:$0xff] %v8239_v43 }
 0x512   : > { %2704 = vrot.lane.b32.xlu0 %v9800_v53, %s7046_s13  ;;  %v2181_v53 = vmul.f32 1.442695, %v2165_v13 }
 0x513   : > { %2901 = vrot.lane.b32.xlu1 %v9801_v33, %s7046_s13  ;;  %v8243_v33 = vpop.f32.mrf.mxu1 }
 0x514   : > { %9808 = vst [vmem:[#allocation61_spill] sm:$0xff] %v8243_v33  ;;  %6553 = vpow2.f32 %v2181_v53 }
 0x516   : > { %2680 = vrot.lane.b32.xlu0 %v9802_v16, %s7046_s13  ;;  %v8245_v16 = vpop.f32.mrf.mxu1 }
 0x517   : > { %2899 = vrot.lane.b32.xlu1 %v9803_v22, %s7046_s13  ;;  %9809 = vst [vmem:[#allocation63_spill] sm:$0xff] %v8245_v16  ;;  %v2122_v22 = vpop.xlane.xlu1 %2121 }
 0x518   : > { %v8247_v23 = vpop.f32.mrf.mxu1  ;;  %v2166_v34 = vsub.f32 %v8098_v63, %v2122_v22 }
 0x519   : > { %9810 = vst [vmem:[#allocation64_spill] sm:$0xff] %v8247_v23 }
 0x51a   : > { %v8250_v18 = vpop.f32.mrf.mxu1  ;;  %v2183_v59 = vmul.f32 1.442695, %v2166_v34 }
 0x51b   : > { %2897 = vrot.lane.b32.xlu1 %v9805_v31, %s7046_s13  ;;  %9811 = vst [vmem:[#allocation44_spill] sm:$0xff] %v8250_v18 }
 0x51c   : > { %v8252_v31 = vpop.f32.mrf.mxu1  ;;  %6555 = vpow2.f32 %v2183_v59 }
 0x51d   : > { %9812 = vst [vmem:[#allocation50_spill] sm:$0xff] %v8252_v31 }
 0x51e   : > { %v8256_v13 = vpop.f32.mrf.mxu1 }
 0x51f   : > { %2682 = vrot.lane.b32.xlu1 %v9807_v60, %s7046_s13  ;;  %9813 = vst [vmem:[#allocation42_spill] sm:$0xff] %v8256_v13 }
 0x520   : > { %v8260_v33 = vpop.f32.mrf.mxu1 }
 0x521   : > { %v8254_v43 = vpop.eup %6553  ;;  %9814 = vst [vmem:[#allocation55_spill] sm:$0xff] %v8260_v33 }
 0x522   : > { %v2213_v53 = vsel %vm1239_vm1, %v8254_v43, 0.0  ;;  %v8262_v16 = vpop.f32.mrf.mxu1 }
 0x523   : > { %9815 = vst [vmem:[#allocation36_spill] sm:$0xff] %v8262_v16 }
 0x524   : > { %v8264_v23 = vpop.f32.mrf.mxu1 }
 0x525   : > { %9816 = vst [vmem:[#allocation67_spill] sm:$0xff] %v8264_v23 }
 0x526   : > { %v8268_v22 = vpop.f32.mrf.mxu1 }
 0x527   : > { %9817 = vst [vmem:[#allocation68_spill] sm:$0xff] %v8268_v22 }
 0x528   : > { %v8272_v59 = vpop.f32.mrf.mxu1 }
 0x529   : > { %v8266_v63 = vpop.eup %6555  ;;  %9818 = vst [vmem:[#allocation69_spill] sm:$0xff] %v8272_v59 }
 0x52a   : > { %v2216_v34 = vsel %vm1239_vm1, %v8266_v63, 0.0  ;;  %v8274_v31 = vpop.f32.mrf.mxu1 }
 0x52b   : > { %9819 = vst [vmem:[#allocation70_spill] sm:$0xff] %v8274_v31 }
 0x52c   : > { %v8276_v13 = vpop.f32.mrf.mxu1 }
 0x52d   : > { %9820 = vst [vmem:[#allocation71_spill] sm:$0xff] %v8276_v13 }
 0x52e   : > { %v8279_v16 = vpop.f32.mrf.mxu1 }
 0x52f   : > { %9821 = vst [vmem:[#allocation72_spill] sm:$0xff] %v8279_v16 }
 0x530   : > { %v5843_v9 = vpop.f32.mrf.mxu1 }
 0x535   : > { %2214 = vadd.xlane.f32.xlu0 %v2213_v53 }
 0x543   : > { %2217 = vadd.xlane.f32.xlu1 %v2216_v34 }
 0x54f   : > { %v2128_v53 = vpop.xlane.xlu1 %2127 }
 0x550   : > { %v2168_v33 = vsub.f32 %v8139_v1, %v2128_v53  ;;  %v8284_v1 = vpop.f32.mrf.mxu1 }
 0x551   : > { %v2125_v23 = vpop.xlane.xlu0 %2124 }
 0x552   : > { %v2187_v18 = vmul.f32 1.442695, %v2168_v33  ;;  %v2167_v60 = vsub.f32 %v8147_v12, %v2125_v23 }
 0x553   : > { %v2134_v22 = vpop.xlane.xlu1 %2133 }
 0x554   : > { %6557 = vpow2.f32 %v2187_v18  ;;  %v2185_v54 = vmul.f32 1.442695, %v2167_v60  ;;  %v2170_v34 = vsub.f32 %v8155_v45, %v2134_v22  ;;  %v5846_v18 = vpop.f32.mrf.mxu1 }
 0x555   : > { %v2131_v59 = vpop.xlane.xlu0 %2130 }
 0x556   : > { %6559 = vpow2.f32 %v2185_v54  ;;  %v2191_v31 = vmul.f32 1.442695, %v2170_v34  ;;  %v2169_v13 = vsub.f32 %v8163_v5, %v2131_v59 }
 0x557   : > { %v2140_v24 = vpop.xlane.xlu1 %2139 }
 0x558   : > { %v2189_v51 = vmul.f32 1.442695, %v2169_v13  ;;  %6561 = vpow2.f32 %v2191_v31  ;;  %v2172_v33 = vsub.f32 %v8169_v46, %v2140_v24  ;;  %v2072_v31 = vpop.f32.mrf.mxu1 }
 0x559   : > { %v2137_v53 = vpop.xlane.xlu0 %2136 }
 0x55a   : > { %6563 = vpow2.f32 %v2189_v51  ;;  %v2171_v23 = vsub.f32 %v8172_v2, %v2137_v53  ;;  %v2195_v12 = vmul.f32 1.442695, %v2172_v33  ;;  %v5849_v22 = vpop.f32.mrf.mxu1 }
 0x55b   : > { %v2314_v45 = vpop.permute.xlu1 %2313 }
 0x55c   : > { %v2193_v60 = vmul.f32 1.442695, %v2171_v23  ;;  %6565 = vpow2.f32 %v2195_v12  ;;  %v2078_v23 = vadd.f32 %v5846_v18, %v8130_v21  ;;  %v8311_v21 = vld [vmem:[%s7328_s1 + $0x58] sm:$0xff] }
 0x55d   : > { %v2316_v54 = vpop.permute.xlu0 %2315  ;;  %9822 = vst [vmem:[#allocation73_spill] sm:$0xff] %v8311_v21 }
 0x55e   : > { %6567 = vpow2.f32 %v2193_v60  ;;  %5853 = vmatprep.subr.mxu0 %v2316_v54  ;;  %v8314_v18 = vadd.f32 %v8311_v21, %v2078_v23  ;;  %v2063_v23 = vadd.f32 %v8284_v1, %v8090_v56  ;;  %v8340_v56 = vld [vmem:[%s7328_s1 + $0x40] sm:$0xff] }
 0x55f   : > { %5854 = vmatpush3.msra.mxu0 %v2316_v54  ;;  %v2310_v5 = vpop.permute.xlu1 %2309 }
 0x560   : > { %5855 = vmatprep.subr.mxu0 %v2314_v45  ;;  %v8343_v1 = vadd.f32 %v8340_v56, %v2063_v23 }
 0x561   : > { %v8288_v13 = vpop.eup %6557  ;;  %5856 = vmatpush3.msra.mxu0 %v2314_v45  ;;  %v2312_v46 = vpop.permute.xlu0 %2311 }
 0x562   : > { %5857 = vmatprep.subr.mxu0 %v2312_v46  ;;  %v2222_v2 = vsel %vm1239_vm1, %v8288_v13, 0.0  ;;  %v2082_v45 = vpop.f32.mrf.mxu1 }
 0x563   : > { %v8292_v24 = vpop.eup %6559  ;;  %2223 = vadd.xlane.f32.xlu0 %v2222_v2  ;;  %5858 = vmatpush3.msra.mxu0 %v2312_v46  ;;  %v2306_v51 = vpop.permute.xlu1 %2305  ;;  %v2068_v46 = vadd.f32 %v5843_v9, %v8086_v29 }
 0x564   : > { %5859 = vmatprep.subr.mxu0 %v2310_v5  ;;  %v2219_v33 = vsel %vm1239_vm1, %v8292_v24, 0.0  ;;  %v5852_v9 = vpop.f32.mrf.mxu1 }
 0x565   : > { %5860 = vmatpush3.msra.mxu0 %v2310_v5  ;;  %v2308_v59 = vpop.permute.xlu0 %2307  ;;  %v8294_v34 = vpop.eup %6561  ;;  %v2098_v16 = vadd.f32 %v5852_v9, %v8149_v32  ;;  %v9826_v32 = vld [vmem:[#allocation65_spill] sm:$0xff] }
 0x566   : > { %5861 = vmatprep.subr.mxu0 %v2308_v59  ;;  %v2228_v2 = vsel %vm1239_vm1, %v8294_v34, 0.0 }
 0x567   : > { %v8298_v53 = vpop.eup %6563  ;;  %2220 = vadd.xlane.f32.xlu0 %v2219_v33  ;;  %5862 = vmatpush3.msra.mxu0 %v2308_v59  ;;  %v2304_v12 = vpop.permute.xlu1 %2303 }
 0x568   : > { %5863 = vmatprep.subr.mxu0 %v2306_v51  ;;  %v2225_v60 = vsel %vm1239_vm1, %v8298_v53, 0.0 }
 0x569   : > { %2226 = vadd.xlane.f32.xlu1 %v2225_v60  ;;  %5864 = vmatpush3.msra.mxu0 %v2306_v51  ;;  %v2302_v54 = vpop.permute.xlu0 %2301  ;;  %v8303_v5 = vpop.eup %6565  ;;  %v2088_v51 = vadd.f32 %v5849_v22, %v8135_v52  ;;  %v9824_v22 = vld [vmem:[#allocation62_spill] sm:$0xff] }
 0x56a   : > { %5865 = vmatprep.subr.mxu0 %v2304_v12  ;;  %v2234_v52 = vsel %vm1239_vm1, %v8303_v5, 0.0  ;;  %9825 = vst [vmem:[#allocation62_spill] sm:$0xff] %v8340_v56 }
 0x56b   : > { %v8308_v59 = vpop.eup %6567  ;;  %2229 = vadd.xlane.f32.xlu0 %v2228_v2  ;;  %5866 = vmatpush3.msra.mxu0 %v2304_v12  ;;  %v2477_v33 = vpop.permute.xlu1 %2476  ;;  %v8322_v2 = vld [vmem:[%s7328_s1 + $0x48] sm:$0xff] }
 0x56c   : > { %5867 = vmatprep.subr.mxu0 %v2302_v54  ;;  %v2231_v29 = vsel %vm1239_vm1, %v8308_v59, 0.0  ;;  %5881 = vmatprep.subr.mxu1 %v2477_v33  ;;  %9823 = vst [vmem:[#allocation74_spill] sm:$0xff] %v8322_v2  ;;  %v8325_v12 = vadd.f32 %v8322_v2, %v2068_v46  ;;  %v2150_v2 = vsel %vm1239_vm1, %v8314_v18, -inf }
 0x56d   : > { %2232 = vadd.xlane.f32.xlu1 %v2231_v29  ;;  %v8319_v60 = vpop.permute.xlu0 %2718  ;;  %5882 = vmatpush3.msra.mxu1 %v2477_v33  ;;  %v8334_v29 = vadd.f32 %v2088_v51, %v9824_v22  ;;  %v8349_v33 = vadd.f32 %v2098_v16, %v9826_v32  ;;  %v2141_v16 = vsel %vm1239_vm1, %v8343_v1, -inf  ;;  %v2092_v22 = vpop.f32.mrf.mxu1  ;;  %v8365_v32 = vld [vmem:[%s7328_s1 + $0x60] sm:$0xff] }
 0x56e   : > { %5868 = vmatpush3.msra.mxu0 %v2302_v54  ;;  %v2073_v54 = vadd.f32 %v2072_v31, %v8132_v4  ;;  %v2144_v51 = vsel %vm1239_vm1, %v8325_v12, -inf  ;;  %v2083_v4 = vadd.f32 %v2082_v45, %v8141_v7  ;;  %9828 = vst [vmem:[#allocation75_spill] sm:$0xff] %v8365_v32  ;;  %v2093_v7 = vadd.f32 %v2092_v22, %v8157_v48 }
 0x56f   : > { %5909 = vmatprep.subr.msk.mxu0 %vm916_vm0, %v8319_v60  ;;  %2235 = vadd.xlane.f32.xlu0 %v2234_v52  ;;  %v2475_v46 = vpop.permute.xlu1 %2474  ;;  %v8354_v52 = vld [vmem:[%s7328_s1 + $0x50] sm:$0xff] }
 0x570   : > { %5883 = vmatprep.subr.mxu1 %v2475_v46  ;;  %9827 = vst [vmem:[#allocation65_spill] sm:$0xff] %v8354_v52  ;;  %v8357_v23 = vadd.f32 %v8354_v52, %v2073_v54  ;;  %v8368_v54 = vadd.f32 %v8365_v32, %v2083_v4 }
 0x571   : > { %2151 = vmax.xlane.f32.xlu1 %v2150_v2  ;;  %5884 = vmatpush3.msra.mxu1 %v2475_v46  ;;  %v2156_v2 = vsel %vm1239_vm1, %v8334_v29, -inf  ;;  %v2469_v31 = vpop.permute.xlu0 %2468 }
 0x572   : > { %v2147_v45 = vsel %vm1239_vm1, %v8357_v23, -inf }
 0x573   : > { %2145 = vmax.xlane.f32.xlu0 %v2144_v51  ;;  %v2473_v9 = vpop.permute.xlu1 %2472  ;;  %v2162_v51 = vsel %vm1239_vm1, %v8349_v33, -inf }
 0x574   : > { %5885 = vmatprep.subr.mxu1 %v2473_v9 }
 0x575   : > { %2157 = vmax.xlane.f32.xlu1 %v2156_v2  ;;  %5886 = vmatpush3.msra.mxu1 %v2473_v9  ;;  %v2467_v9 = vpop.permute.xlu0 %2466 }
 0x577   : > { %2142 = vmax.xlane.f32.xlu0 %v2141_v16  ;;  %v2717_v46 = vpop.permute.xlu1 %2716  ;;  %v8374_v16 = vld [vmem:[%s7328_s1 + $0x70] sm:$0xff] }
 0x578   : > { %9829 = vst [vmem:[#allocation76_spill] sm:$0xff] %v8374_v16  ;;  %v8377_v52 = vadd.f32 %v8374_v16, %v2093_v7 }
 0x579   : > { %2163 = vmax.xlane.f32.xlu1 %v2162_v51  ;;  %v2153_v51 = vsel %vm1239_vm1, %v8368_v54, -inf  ;;  %v2465_v48 = vpop.permute.xlu0 %2464 }
 0x57a   : > { %v2159_v22 = vsel %vm1239_vm1, %v8377_v52, -inf }
 0x57b   : > { %2148 = vmax.xlane.f32.xlu0 %v2147_v45  ;;  %v2471_v2 = vpop.permute.xlu1 %2470 }
 0x57c   : > { %5887 = vmatprep.subr.mxu1 %v2471_v2 }
 0x57d   : > { %5888 = vmatpush3.msra.mxu1 %v2471_v2 }
 0x57e   : > { %5889 = vmatprep.subr.mxu1 %v2469_v31 }
 0x57f   : > { %2154 = vmax.xlane.f32.xlu0 %v2153_v51  ;;  %v2715_v4 = vpop.permute.xlu1 %2714  ;;  %5890 = vmatpush3.msra.mxu1 %v2469_v31  ;;  %v9830_v31 = vld [vmem:[#allocation40_spill] sm:$0xff] }
 0x580   : > { %5891 = vmatprep.subr.mxu1 %v2467_v9 }
 0x581   : > { %5892 = vmatpush3.msra.mxu1 %v2467_v9  ;;  %v2711_v9 = vpop.permute.xlu0 %2710 }
 0x582   : > { %5893 = vmatprep.subr.mxu1 %v2465_v48 }
 0x583   : > { %2160 = vmax.xlane.f32.xlu0 %v2159_v22  ;;  %v2713_v45 = vpop.permute.xlu1 %2712  ;;  %5894 = vmatpush3.msra.mxu1 %v2465_v48 }
 0x585   : > { %v2709_v51 = vpop.permute.xlu0 %2708 }
 0x587   : > { %v2463_v7 = vpop.permute.xlu1 %2462 }
 0x588   : > { %5895 = vmatprep.subr.mxu1 %v2463_v7 }
 0x589   : > { %5896 = vmatpush3.msra.mxu1 %v2463_v7  ;;  %v2707_v16 = vpop.permute.xlu0 %2706 }
 0x58a   : > { %2893 = vrot.lane.b32.xlu1 %v7565_v55, %s7046_s13 }
 0x58b   : > { %v8385_v2 = vpop.permute.xlu1 %2903 }
 0x58c   : > { %5937 = vmatprep.subr.msk.mxu1 %vm916_vm0, %v8385_v2 }
 0x58d   : > { %v2705_v22 = vpop.permute.xlu0 %2704 }
 0x58f   : > { %v8391_v32 = vpop.permute.xlu1 %2901 }
 0x591   : > { %v8393_v48 = vpop.permute.xlu0 %2680 }
 0x593   : > { %v8395_v7 = vpop.permute.xlu1 %2899 }
 0x597   : > { %v8397_v21 = vpop.permute.xlu1 %2897 }
 0x599   : > { %2895 = vrot.lane.b32.xlu0 %v9830_v31, %s7046_s13 }
 0x59b   : > { %v8399_v55 = vpop.permute.xlu1 %2682 }
 0x5be   : > { %v2215_v56 = vpop.xlane.xlu0 %2214 }
 0x5bf   : > { %6569 = vrcp.f32 %v2215_v56 }
 0x5cc   : > { %v6570_v14 = vpop.eup %6569  ;;  %v2218_v44 = vpop.xlane.xlu1 %2217 }
 0x5cd   : > { %v2277_v31 = vmul.f32 %v6570_v14, %v8254_v43  ;;  %6571 = vrcp.f32 %v2218_v44 }
 0x5cf   : > { %5869 = vmatprep.mubr.msk.f32.mxu0 %vm1239_vm1, %v2277_v31 }
 0x5da   : > { %v6572_v35 = vpop.eup %6571 }
 0x5db   : > { %v2278_v61 = vmul.f32 %v6572_v35, %v8266_v63 }
 0x5dd   : > { %5870 = vmatmul.mubr.msk.f32.vlgmr.msra.gmra.mxu0 %vm1239_vm1, %v2278_v61 }
 0x5de   : > { %5910 = vmatpush3.xpose.msk.msra.mxu0 %vm916_vm0, %v8319_v60 }
 0x5df   : > { %5911 = vmatprep.subr.msk.mxu0 %vm916_vm0, %v2717_v46 }
 0x5e2   : > { %5912 = vmatpush3.xpose.msk.msra.mxu0 %vm916_vm0, %v2717_v46 }
 0x5e3   : > { %5913 = vmatprep.subr.msk.mxu0 %vm916_vm0, %v2715_v4 }
 0x5e6   : > { %5914 = vmatpush3.xpose.msk.msra.mxu0 %vm916_vm0, %v2715_v4 }
 0x5e7   : > { %5915 = vmatprep.subr.msk.mxu0 %vm916_vm0, %v2713_v45 }
 0x5ea   : > { %5916 = vmatpush3.xpose.msk.msra.mxu0 %vm916_vm0, %v2713_v45 }
 0x5eb   : > { %5917 = vmatprep.subr.msk.mxu0 %vm916_vm0, %v2711_v9 }
 0x5ec   : > { %v2224_v14 = vpop.xlane.xlu0 %2223 }
 0x5ed   : > { %6573 = vrcp.f32 %v2224_v14 }
 0x5ee   : > { %5918 = vmatpush3.xpose.msk.msra.mxu0 %vm916_vm0, %v2711_v9 }
 0x5ef   : > { %5919 = vmatprep.subr.msk.mxu0 %vm916_vm0, %v2709_v51 }
 0x5f0   : > { %v2221_v35 = vpop.xlane.xlu0 %2220 }
 0x5f1   : > { %6575 = vrcp.f32 %v2221_v35 }
 0x5f2   : > { %v2227_v44 = vpop.xlane.xlu1 %2226  ;;  %5920 = vmatpush3.xpose.msk.msra.mxu0 %vm916_vm0, %v2709_v51 }
 0x5f3   : > { %6577 = vrcp.f32 %v2227_v44  ;;  %5921 = vmatprep.subr.msk.mxu0 %vm916_vm0, %v2707_v16 }
 0x5f4   : > { %v2230_v61 = vpop.xlane.xlu0 %2229 }
 0x5f5   : > { %6579 = vrcp.f32 %v2230_v61 }
 0x5f6   : > { %v2233_v43 = vpop.xlane.xlu1 %2232  ;;  %5922 = vmatpush3.xpose.msk.msra.mxu0 %vm916_vm0, %v2707_v16 }
 0x5f7   : > { %6581 = vrcp.f32 %v2233_v43  ;;  %5923 = vmatprep.subr.msk.mxu0 %vm916_vm0, %v2705_v22 }
 0x5f8   : > { %v2236_v63 = vpop.xlane.xlu0 %2235 }
 0x5f9   : > { %6583 = vrcp.f32 %v2236_v63 }
 0x5fa   : > { %5924 = vmatpush3.xpose.msk.msra.mxu0 %vm916_vm0, %v2705_v22  ;;  %v6574_v56 = vpop.eup %6573 }
 0x5fb   : > { %v2280_v14 = vmul.f32 %v6574_v56, %v8288_v13 }
 0x5fc   : > { %v2146_v60 = vpop.xlane.xlu0 %2145 }
 0x5fd   : > { %v2174_v46 = vsub.f32 %v8325_v12, %v2146_v60 }
 0x5fe   : > { %v6576_v4 = vpop.eup %6575 }
 0x5ff   : > { %v2199_v45 = vmul.f32 1.442695, %v2174_v46  ;;  %v2279_v31 = vmul.f32 %v6576_v4, %v8292_v24 }
 0x600   : > { %v6578_v9 = vpop.eup %6577  ;;  %v2143_v51 = vpop.xlane.xlu0 %2142 }
 0x601   : > { %6585 = vpow2.f32 %v2199_v45  ;;  %v2173_v16 = vsub.f32 %v8343_v1, %v2143_v51  ;;  %5872 = vmatprep.mubr.msk.f32.mxu0 %vm1239_vm1, %v2279_v31  ;;  %v2281_v35 = vmul.f32 %v6578_v9, %v8298_v53 }
 0x602   : > { %v6580_v22 = vpop.eup %6579  ;;  %5873 = vmatmul.mubr.msk.f32.gmra.mxu0 %vm1239_vm1, %v2280_v14 }
 0x603   : > { %v2197_v44 = vmul.f32 1.442695, %v2173_v16  ;;  %5875 = vmatprep.mubr.msk.f32.mxu0 %vm1239_vm1, %v2281_v35  ;;  %v2282_v12 = vmul.f32 %v6580_v22, %v8294_v34 }
 0x604   : > { %v6582_v24 = vpop.eup %6581 }
 0x605   : > { %6587 = vpow2.f32 %v2197_v44  ;;  %v2283_v61 = vmul.f32 %v6582_v24, %v8308_v59 }
 0x606   : > { %v6584_v13 = vpop.eup %6583  ;;  %5876 = vmatmul.mubr.msk.f32.gmra.mxu0 %vm1239_vm1, %v2282_v12 }
 0x607   : > { %5878 = vmatprep.mubr.msk.f32.mxu0 %vm1239_vm1, %v2283_v61  ;;  %v2284_v1 = vmul.f32 %v6584_v13, %v8303_v5  ;;  %v2149_v5 = vpop.xlane.xlu0 %2148 }
 0x60a   : > { %5879 = vmatmul.mubr.msk.f32.gmra.mxu0 %vm1239_vm1, %v2284_v1 }
 0x60b   : > { %5925 = vmatprep.mubr.msk.f32.mxu0 %vm916_vm0, %v8393_v48  ;;  %v2152_v48 = vpop.xlane.xlu1 %2151  ;;  %v2155_v63 = vpop.xlane.xlu0 %2154 }
 0x60c   : > { %v2176_v56 = vsub.f32 %v8314_v18, %v2152_v48  ;;  %v2177_v9 = vsub.f32 %v8368_v54, %v2155_v63 }
 0x60e   : > { %v8437_v53 = vpop.eup %6585  ;;  %5926 = vmatmul.mubr.msk.f32.vlgmr.msra.gmra.mxu0 %vm916_vm0, %v8399_v55  ;;  %v2175_v55 = vsub.f32 %v8357_v23, %v2149_v5  ;;  %v2203_v31 = vmul.f32 1.442695, %v2176_v56  ;;  %v2205_v35 = vmul.f32 1.442695, %v2177_v9  ;;  %v9831_v5 = vld [vmem:[#allocation49_spill] sm:$0xff] }
 0x60f   : > { %v2240_v34 = vsel %vm1239_vm1, %v8437_v53, 0.0  ;;  %v2158_v60 = vpop.xlane.xlu1 %2157  ;;  %v2161_v45 = vpop.xlane.xlu0 %2160 }
 0x610   : > { %2241 = vadd.xlane.f32.xlu0 %v2240_v34  ;;  %v2178_v46 = vsub.f32 %v8334_v29, %v2158_v60  ;;  %v2201_v4 = vmul.f32 1.442695, %v2175_v55  ;;  %v2179_v14 = vsub.f32 %v8377_v52, %v2161_v45 }
 0x612   : > { %v8443_v59 = vpop.eup %6587  ;;  %v2207_v51 = vmul.f32 1.442695, %v2178_v46  ;;  %6589 = vpow2.f32 %v2201_v4  ;;  %v2209_v22 = vmul.f32 1.442695, %v2179_v14 }
 0x613   : > { %v2237_v43 = vsel %vm1239_vm1, %v8443_v59, 0.0  ;;  %v2164_v16 = vpop.xlane.xlu1 %2163  ;;  %6591 = vpow2.f32 %v2203_v31  ;;  %v2896_v48 = vpop.permute.xlu0 %2895 }
 0x614   : > { %2238 = vadd.xlane.f32.xlu1 %v2237_v43  ;;  %6593 = vpow2.f32 %v2207_v51  ;;  %v2180_v23 = vsub.f32 %v8349_v33, %v2164_v16 }
 0x615   : > { %6595 = vpow2.f32 %v2205_v35 }
 0x616   : > { %v2211_v18 = vmul.f32 1.442695, %v2180_v23  ;;  %6597 = vpow2.f32 %v2209_v22  ;;  %v8557_v22 = vld [vmem:[#allocation9 + $0x88] sm:$0xff] }
 0x617   : > { %v2894_v63 = vpop.permute.xlu1 %2893 }
 0x618   : > { %6599 = vpow2.f32 %v2211_v18 }
 0x61f   : > { %v8457_v29 = vpop.eup %6589 }
 0x620   : > { %v8459_v44 = vpop.eup %6591  ;;  %v2243_v54 = vsel %vm1239_vm1, %v8457_v29, 0.0 }
 0x621   : > { %v8463_v12 = vpop.eup %6593  ;;  %v2246_v33 = vsel %vm1239_vm1, %v8459_v44, 0.0 }
 0x622   : > { %v8465_v52 = vpop.eup %6595  ;;  %v2252_v24 = vsel %vm1239_vm1, %v8463_v12, 0.0 }
 0x623   : > { %v8471_v61 = vpop.eup %6597  ;;  %v2249_v13 = vsel %vm1239_vm1, %v8465_v52, 0.0 }
 0x624   : > { %v2255_v1 = vsel %vm1239_vm1, %v8471_v61, 0.0 }
 0x625   : > { %2889 = vrot.lane.b32.xlu1 %v7598_v62, %s7046_s13  ;;  %v8477_v34 = vpop.eup %6599 }
 0x626   : > { %2891 = vrot.lane.b32.xlu0 %v7581_v58, %s7046_s13  ;;  %v2258_v43 = vsel %vm1239_vm1, %v8477_v34, 0.0 }
 0x645   : > { %2244 = vadd.xlane.f32.xlu0 %v2243_v54 }
 0x649   : > { %2247 = vadd.xlane.f32.xlu1 %v2246_v33  ;;  %2253 = vadd.xlane.f32.xlu0 %v2252_v24  ;;  %v8561_v24 = vld [vmem:[#allocation9 + $0x80] sm:$0xff] }
 0x64d   : > { %2250 = vadd.xlane.f32.xlu1 %v2249_v13  ;;  %2256 = vadd.xlane.f32.xlu0 %v2255_v1 }
 0x651   : > { %2259 = vadd.xlane.f32.xlu1 %v2258_v43  ;;  %v8565_v43 = vld [vmem:[%s7328_s1 + $0x8] sm:$0xff] }
 0x662   : > { %2867 = vrot.lane.b32.xlu1 %v7624_v6, %s7046_s13 }
 0x663   : > { %2865 = vrot.lane.b32.xlu0 %v7422_v10, %s7046_s13 }
 0x666   : > { %2686 = vrot.lane.b32.xlu1 %v7651_v15, %s7046_s13 }
 0x667   : > { %2684 = vrot.lane.b32.xlu0 %v7628_v8, %s7046_s13 }
 0x66a   : > { %2690 = vrot.lane.b32.xlu1 %v7686_v27, %s7046_s13 }
 0x66b   : > { %2688 = vrot.lane.b32.xlu0 %v7660_v19, %s7046_s13 }
 0x66e   : > { %2694 = vrot.lane.b32.xlu1 %v7721_v38, %s7046_s13 }
 0x66f   : > { %2692 = vrot.lane.b32.xlu0 %v7695_v30, %s7046_s13 }
 0x672   : > { %2871 = vrot.lane.b32.xlu1 %v7655_v17, %s7046_s13 }
 0x673   : > { %2869 = vrot.lane.b32.xlu0 %v7632_v11, %s7046_s13 }
 0x676   : > { %2875 = vrot.lane.b32.xlu1 %v7690_v28, %s7046_s13 }
 0x677   : > { %2873 = vrot.lane.b32.xlu0 %v7664_v20, %s7046_s13 }
 0x67a   : > { %2879 = vrot.lane.b32.xlu1 %v7725_v41, %s7046_s13 }
 0x67b   : > { %2877 = vrot.lane.b32.xlu0 %v9831_v5, %s7046_s13 }
 0x699   : > { %v2242_v55 = vpop.xlane.xlu0 %2241 }
 0x69a   : > { %6601 = vrcp.f32 %v2242_v55 }
 0x69d   : > { %v2239_v60 = vpop.xlane.xlu1 %2238  ;;  %v8509_v56 = vpop.f32.mrf.mxu0 }
 0x69e   : > { %9832 = vst [vmem:[#allocation49_spill] sm:$0xff] %v8509_v56  ;;  %6603 = vrcp.f32 %v2239_v60 }
 0x69f   : > { %v8511_v46 = vpop.f32.mrf.mxu0 }
 0x6a0   : > { %9833 = vst [vmem:[#allocation77_spill] sm:$0xff] %v8511_v46  ;;  %v9863_v46 = vld [vmem:[#allocation40_spill] sm:$0xff] }
 0x6a7   : > { %v6602_v45 = vpop.eup %6601 }
 0x6a8   : > { %v2286_v51 = vmul.f32 %v6602_v45, %v8437_v53  ;;  %v8572_v45 = vld [vmem:[%s7328_s1] sm:$0xff] }
 0x6ab   : > { %v6604_v31 = vpop.eup %6603 }
 0x6ac   : > { %v2285_v9 = vmul.f32 %v6604_v31, %v8443_v59 }
 0x6ae   : > { %5897 = vmatprep.mubr.msk.f32.mxu1 %vm1239_vm1, %v2285_v9 }
 0x6af   : > { %5898 = vmatmul.mubr.msk.f32.vlgmr.msra.gmra.mxu1 %vm1239_vm1, %v2286_v51 }
 0x6b0   : > { %5938 = vmatpush3.xpose.msk.msra.mxu1 %vm916_vm0, %v8385_v2 }
 0x6b1   : > { %5939 = vmatprep.subr.msk.mxu1 %vm916_vm0, %v8391_v32 }
 0x6b4   : > { %5940 = vmatpush3.xpose.msk.msra.mxu1 %vm916_vm0, %v8391_v32  ;;  %v2892_v32 = vpop.permute.xlu0 %2891 }
 0x6b5   : > { %5941 = vmatprep.subr.msk.mxu1 %vm916_vm0, %v8395_v7 }
 0x6b8   : > { %5942 = vmatpush3.xpose.msk.msra.mxu1 %vm916_vm0, %v8395_v7  ;;  %v8646_v7 = vld [vmem:[#allocation9 + $0xb8] sm:$0xff] }
 0x6b9   : > { %5943 = vmatprep.subr.msk.mxu1 %vm916_vm0, %v8397_v21 }
 0x6bc   : > { %5944 = vmatpush3.xpose.msk.msra.mxu1 %vm916_vm0, %v8397_v21  ;;  %v2890_v21 = vpop.permute.xlu1 %2889 }
 0x6bd   : > { %5945 = vmatprep.subr.msk.mxu1 %vm916_vm0, %v2896_v48 }
 0x6c0   : > { %5946 = vmatpush3.xpose.msk.msra.mxu1 %vm916_vm0, %v2896_v48 }
 0x6c1   : > { %5947 = vmatprep.subr.msk.mxu1 %vm916_vm0, %v2894_v63 }
 0x6c2   : > { %v8536_v2 = vpop.f32.mrf.mxu0 }
 0x6c3   : > { %9834 = vst [vmem:[#allocation78_spill] sm:$0xff] %v8536_v2  ;;  %v9858_v2 = vld [vmem:[#allocation37_spill] sm:$0xff] }
 0x6c4   : > { %5948 = vmatpush3.xpose.msk.msra.mxu1 %vm916_vm0, %v2894_v63  ;;  %v8539_v53 = vpop.f32.mrf.mxu0 }
 0x6c5   : > { %9835 = vst [vmem:[#allocation79_spill] sm:$0xff] %v8539_v53  ;;  %5949 = vmatprep.subr.msk.mxu1 %vm916_vm0, %v2892_v32  ;;  %v9857_v53 = vld [vmem:[#allocation29_spill] sm:$0xff] }
 0x6c6   : > { %v8544_v59 = vpop.f32.mrf.mxu0 }
 0x6c7   : > { %9836 = vst [vmem:[#allocation80_spill] sm:$0xff] %v8544_v59  ;;  %v8688_v59 = vld [vmem:[%s7328_s1 + $0x30] sm:$0xff] }
 0x6c8   : > { %5950 = vmatpush3.xpose.msk.msra.mxu1 %vm916_vm0, %v2892_v32  ;;  %v8547_v14 = vpop.f32.mrf.mxu0 }
 0x6c9   : > { %9837 = vst [vmem:[#allocation81_spill] sm:$0xff] %v8547_v14  ;;  %5951 = vmatprep.subr.msk.mxu1 %vm916_vm0, %v2890_v21 }
 0x6ca   : > { %v8552_v35 = vpop.f32.mrf.mxu0 }
 0x6cb   : > { %9838 = vst [vmem:[#allocation82_spill] sm:$0xff] %v8552_v35 }
 0x6cc   : > { %5952 = vmatpush3.xpose.msk.msra.mxu1 %vm916_vm0, %v2890_v21  ;;  %v8555_v23 = vpop.f32.mrf.mxu0 }
 0x6cd   : > { %9839 = vst [vmem:[#allocation83_spill] sm:$0xff] %v8555_v23 }
 0x6ce   : > { %v5927_v54 = vpop.f32.mrf.mxu0  ;;  %v2245_v33 = vpop.xlane.xlu0 %2244 }
 0x6cf   : > { %v2824_v13 = vadd.f32 %v5927_v54, %v8557_v22  ;;  %6605 = vrcp.f32 %v2245_v33 }
 0x6d0   : > { %v2818_v1 = vpop.f32.mrf.mxu0 }
 0x6d1   : > { %v8568_v48 = vadd.f32 %v8565_v43, %v2824_v13  ;;  %v2819_v63 = vadd.f32 %v2818_v1, %v8561_v24 }
 0x6d2   : > { %v2248_v55 = vpop.xlane.xlu1 %2247  ;;  %v2254_v60 = vpop.xlane.xlu0 %2253 }
 0x6d3   : > { %v8575_v31 = vadd.f32 %v8572_v45, %v2819_v63  ;;  %6607 = vrcp.f32 %v2248_v55  ;;  %v3061_v9 = vsel %vm1239_vm1, %v8568_v48, -inf }
 0x6d4   : > { %3062 = vmax.xlane.f32.xlu1 %v3061_v9  ;;  %6609 = vrcp.f32 %v2254_v60 }
 0x6d5   : > { %v3058_v51 = vsel %vm1239_vm1, %v8575_v31, -inf }
 0x6d6   : > { %v2251_v32 = vpop.xlane.xlu1 %2250  ;;  %3059 = vmax.xlane.f32.xlu0 %v3058_v51  ;;  %v2257_v21 = vpop.xlane.xlu0 %2256 }
 0x6d7   : > { %6611 = vrcp.f32 %v2251_v32 }
 0x6d8   : > { %6613 = vrcp.f32 %v2257_v21 }
 0x6da   : > { %v2260_v54 = vpop.xlane.xlu1 %2259  ;;  %v2866_v33 = vpop.permute.xlu0 %2865 }
 0x6db   : > { %6615 = vrcp.f32 %v2260_v54 }
 0x6dc   : > { %v6606_v13 = vpop.eup %6605 }
 0x6dd   : > { %v2287_v1 = vmul.f32 %v6606_v13, %v8457_v29 }
 0x6de   : > { %v2868_v63 = vpop.permute.xlu1 %2867  ;;  %v2685_v55 = vpop.permute.xlu0 %2684 }
 0x6df   : > { %5900 = vmatprep.mubr.msk.f32.mxu1 %vm1239_vm1, %v2287_v1  ;;  %5928 = vmatprep.mubr.msk.f32.mxu0 %vm916_vm0, %v2685_v55 }
 0x6e0   : > { %v6608_v9 = vpop.eup %6607 }
 0x6e1   : > { %v2288_v60 = vmul.f32 %v6608_v9, %v8459_v44  ;;  %v6610_v16 = vpop.eup %6609 }
 0x6e2   : > { %v2687_v18 = vpop.permute.xlu1 %2686  ;;  %v2689_v51 = vpop.permute.xlu0 %2688  ;;  %v2290_v1 = vmul.f32 %v6610_v16, %v8463_v12 }
 0x6e3   : > { %5901 = vmatmul.mubr.msk.f32.gmra.mxu1 %vm1239_vm1, %v2288_v60  ;;  %5929 = vmatmul.mubr.msk.f32.gmra.mxu0 %vm916_vm0, %v2687_v18 }
 0x6e4   : > { %v6612_v32 = vpop.eup %6611  ;;  %5931 = vmatprep.mubr.msk.f32.mxu0 %vm916_vm0, %v2689_v51 }
 0x6e5   : > { %v6614_v29 = vpop.eup %6613  ;;  %v2289_v21 = vmul.f32 %v6612_v32, %v8465_v52  ;;  %v8613_v32 = vld [vmem:[#allocation9 + $0x98] sm:$0xff] }
 0x6e6   : > { %v2691_v54 = vpop.permute.xlu1 %2690  ;;  %v2693_v13 = vpop.permute.xlu0 %2692  ;;  %v2291_v44 = vmul.f32 %v6614_v29, %v8471_v61 }
 0x6e7   : > { %5903 = vmatprep.mubr.msk.f32.mxu1 %vm1239_vm1, %v2289_v21  ;;  %5932 = vmatmul.mubr.msk.f32.gmra.mxu0 %vm916_vm0, %v2691_v54  ;;  %v8617_v54 = vld [vmem:[#allocation9 + $0x90] sm:$0xff] }
 0x6e8   : > { %v6616_v55 = vpop.eup %6615  ;;  %5904 = vmatmul.mubr.msk.f32.gmra.mxu1 %vm1239_vm1, %v2290_v1  ;;  %5934 = vmatprep.mubr.msk.f32.mxu0 %vm916_vm0, %v2693_v13 }
 0x6e9   : > { %5906 = vmatprep.mubr.msk.f32.mxu1 %vm1239_vm1, %v2291_v44  ;;  %v2292_v18 = vmul.f32 %v6616_v55, %v8477_v34  ;;  %v8622_v55 = vld [vmem:[#allocation9 + $0xa8] sm:$0xff] }
 0x6ea   : > { %v2695_v52 = vpop.permute.xlu1 %2694  ;;  %v2870_v9 = vpop.permute.xlu0 %2869 }
 0x6eb   : > { %5935 = vmatmul.mubr.msk.f32.gmra.mxu0 %vm916_vm0, %v2695_v52 }
 0x6ec   : > { %5907 = vmatmul.mubr.msk.f32.gmra.mxu1 %vm1239_vm1, %v2292_v18  ;;  %v8625_v18 = vld [vmem:[%s7328_s1 + $0x18] sm:$0xff] }
 0x6ed   : > { %5953 = vmatprep.mubr.msk.f32.mxu1 %vm916_vm0, %v2866_v33 }
 0x6ee   : > { %v2872_v12 = vpop.permute.xlu1 %2871  ;;  %v2874_v61 = vpop.permute.xlu0 %2873 }
 0x6f0   : > { %5954 = vmatmul.mubr.msk.f32.vlgmr.msra.gmra.mxu1 %vm916_vm0, %v2868_v63 }
 0x6f1   : > { %5956 = vmatprep.mubr.msk.f32.mxu1 %vm916_vm0, %v2870_v9 }
 0x6f2   : > { %v2876_v16 = vpop.permute.xlu1 %2875  ;;  %v2878_v34 = vpop.permute.xlu0 %2877 }
 0x6f4   : > { %5957 = vmatmul.mubr.msk.f32.gmra.mxu1 %vm916_vm0, %v2872_v12 }
 0x6f5   : > { %5959 = vmatprep.mubr.msk.f32.mxu1 %vm916_vm0, %v2874_v61 }
 0x6f6   : > { %v2880_v60 = vpop.permute.xlu1 %2879 }
 0x6f8   : > { %5960 = vmatmul.mubr.msk.f32.gmra.mxu1 %vm916_vm0, %v2876_v16  ;;  %v8633_v16 = vld [vmem:[#allocation9 + $0xa0] sm:$0xff] }
 0x6f9   : > { %5962 = vmatprep.mubr.msk.f32.mxu1 %vm916_vm0, %v2878_v34  ;;  %v8636_v34 = vld [vmem:[%s7328_s1 + $0x10] sm:$0xff] }
 0x6fc   : > { %5963 = vmatmul.mubr.msk.f32.gmra.mxu1 %vm916_vm0, %v2880_v60 }
 0x76f   : > { %v8607_v33 = vpop.f32.mrf.mxu1 }
 0x770   : > { %9840 = vst [vmem:[#allocation84_spill] sm:$0xff] %v8607_v33  ;;  %v8664_v33 = vld [vmem:[%s7328_s1 + $0x20] sm:$0xff] }
 0x771   : > { %v8609_v63 = vpop.f32.mrf.mxu1 }
 0x772   : > { %9841 = vst [vmem:[#allocation85_spill] sm:$0xff] %v8609_v63  ;;  %v8661_v63 = vld [vmem:[#allocation9 + $0xb0] sm:$0xff] }
 0x7a3   : > { %v8615_v29 = vpop.f32.mrf.mxu1  ;;  %v5930_v21 = vpop.f32.mrf.mxu0 }
 0x7a4   : > { %9842 = vst [vmem:[#allocation86_spill] sm:$0xff] %v8615_v29  ;;  %v2834_v13 = vadd.f32 %v5930_v21, %v8613_v32  ;;  %v8675_v29 = vld [vmem:[%s7328_s1 + $0x38] sm:$0xff] }
 0x7a5   : > { %v8620_v1 = vpop.f32.mrf.mxu1  ;;  %v2828_v44 = vpop.f32.mrf.mxu0 }
 0x7a6   : > { %9843 = vst [vmem:[#allocation87_spill] sm:$0xff] %v8620_v1  ;;  %v8628_v52 = vadd.f32 %v8625_v18, %v2834_v13  ;;  %v2829_v12 = vadd.f32 %v2828_v44, %v8617_v54  ;;  %v8649_v44 = vld [vmem:[%s7328_s1 + $0x28] sm:$0xff] }
 0x7a7   : > { %v5933_v61 = vpop.f32.mrf.mxu0 }
 0x7a8   : > { %v8639_v60 = vadd.f32 %v8636_v34, %v2829_v12  ;;  %v2844_v21 = vadd.f32 %v5933_v61, %v8622_v55  ;;  %v8642_v51 = vpop.f32.mrf.mxu1  ;;  %v3067_v13 = vsel %vm1239_vm1, %v8628_v52, -inf }
 0x7a9   : > { %9844 = vst [vmem:[#allocation88_spill] sm:$0xff] %v8642_v51  ;;  %3068 = vmax.xlane.f32.xlu1 %v3067_v13  ;;  %v2838_v9 = vpop.f32.mrf.mxu0 }
 0x7aa   : > { %v8652_v4 = vadd.f32 %v8649_v44, %v2844_v21  ;;  %v2839_v12 = vadd.f32 %v2838_v9, %v8633_v16  ;;  %v8655_v1 = vpop.f32.mrf.mxu1  ;;  %v3064_v61 = vsel %vm1239_vm1, %v8639_v60, -inf }
 0x7ab   : > { %9845 = vst [vmem:[#allocation89_spill] sm:$0xff] %v8655_v1  ;;  %3065 = vmax.xlane.f32.xlu0 %v3064_v61  ;;  %v5936_v13 = vpop.f32.mrf.mxu0 }
 0x7ac   : > { %v8667_v21 = vadd.f32 %v8664_v33, %v2839_v12  ;;  %v2854_v9 = vadd.f32 %v5936_v13, %v8646_v7  ;;  %v8670_v23 = vpop.f32.mrf.mxu1  ;;  %v3073_v35 = vsel %vm1239_vm1, %v8652_v4, -inf  ;;  %v9853_v13 = vld [vmem:[#allocation31_spill] sm:$0xff] }
 0x7ad   : > { %9846 = vst [vmem:[#allocation90_spill] sm:$0xff] %v8670_v23  ;;  %3074 = vmax.xlane.f32.xlu1 %v3073_v35  ;;  %v2848_v14 = vpop.f32.mrf.mxu0  ;;  %v9856_v23 = vld [vmem:[#allocation47_spill] sm:$0xff] }
 0x7ae   : > { %v8678_v61 = vadd.f32 %v8675_v29, %v2854_v9  ;;  %v2849_v1 = vadd.f32 %v2848_v14, %v8661_v63  ;;  %v8681_v51 = vpop.f32.mrf.mxu1  ;;  %v3070_v12 = vsel %vm1239_vm1, %v8667_v21, -inf }
 0x7af   : > { %9847 = vst [vmem:[#allocation91_spill] sm:$0xff] %v8681_v51  ;;  %3071 = vmax.xlane.f32.xlu0 %v3070_v12  ;;  %v9849_v12 = vld [vmem:[#allocation51_spill] sm:$0xff]  ;;  %v9854_v51 = vld [vmem:[#allocation32_spill] sm:$0xff] }
 0x7b0   : > { %v8691_v35 = vadd.f32 %v8688_v59, %v2849_v1  ;;  %v3079_v9 = vsel %vm1239_vm1, %v8678_v61, -inf  ;;  %v9848_v1 = vld [vmem:[#allocation38_spill] sm:$0xff] }
 0x7b1   : > { %3080 = vmax.xlane.f32.xlu1 %v3079_v9  ;;  %v9850_v9 = vld [vmem:[#allocation54_spill] sm:$0xff] }
 0x7b2   : > { %v3076_v14 = vsel %vm1239_vm1, %v8691_v35, -inf }
 0x7b3   : > { %3077 = vmax.xlane.f32.xlu0 %v3076_v14  ;;  %v9851_v14 = vld [vmem:[#allocation45_spill] sm:$0xff] }
 0x7c2   : > { %3254 = vrot.lane.b32.xlu1 %v9784_v26, %s7046_s13 }
 0x7c6   : > { %3250 = vrot.lane.b32.xlu1 %v9785_v57, %s7046_s13 }
 0x7c9   : > { %3256 = vrot.lane.b32.xlu0 %v9786_v50, %s7046_s13 }
 0x7ca   : > { %3246 = vrot.lane.b32.xlu1 %v9787_v3, %s7046_s13 }
 0x7cd   : > { %3252 = vrot.lane.b32.xlu0 %v9788_v40, %s7046_s13 }
 0x7ce   : > { %3244 = vrot.lane.b32.xlu1 %v9789_v36, %s7046_s13 }
 0x7d1   : > { %3248 = vrot.lane.b32.xlu0 %v9790_v47, %s7046_s13 }
 0x7d2   : > { %3417 = vrot.lane.b32.xlu1 %v7759_v49, %s7046_s13 }
 0x7d5   : > { %3242 = vrot.lane.b32.xlu0 %v9791_v39, %s7046_s13 }
 0x7d6   : > { %3415 = vrot.lane.b32.xlu1 %v8028_v42, %s7046_s13 }
 0x7d9   : > { %3659 = vrot.lane.b32.xlu0 %v9792_v0, %s7047_s8  ;;  %v9852_v0 = vld [vmem:[#allocation34_spill] sm:$0xff] }
 0x7da   : > { %3413 = vrot.lane.b32.xlu1 %v7717_v37, %s7046_s13 }
 0x7dd   : > { %3409 = vrot.lane.b32.xlu0 %v7682_v25, %s7046_s13 }
 0x7de   : > { %3657 = vrot.lane.b32.xlu1 %v9848_v1, %s7047_s8  ;;  %v9855_v1 = vld [vmem:[#allocation30_spill] sm:$0xff] }
 0x7e1   : > { %3407 = vrot.lane.b32.xlu0 %v9849_v12, %s7046_s13 }
 0x7e2   : > { %3411 = vrot.lane.b32.xlu1 %v9850_v9, %s7046_s13 }
 0x7e5   : > { %3405 = vrot.lane.b32.xlu0 %v9851_v14, %s7046_s13 }
 0x7e6   : > { %3655 = vrot.lane.b32.xlu1 %v9852_v0, %s7047_s8  ;;  %v9859_v0 = vld [vmem:[#allocation28_spill] sm:$0xff] }
 0x7e9   : > { %3651 = vrot.lane.b32.xlu0 %v9853_v13, %s7047_s8  ;;  %v9860_v13 = vld [vmem:[#allocation39_spill] sm:$0xff] }
 0x7ea   : > { %3653 = vrot.lane.b32.xlu1 %v9854_v51, %s7047_s8  ;;  %v9861_v51 = vld [vmem:[#allocation27_spill] sm:$0xff] }
 0x7ed   : > { %3649 = vrot.lane.b32.xlu0 %v9855_v1, %s7047_s8  ;;  %v9862_v1 = vld [vmem:[#allocation35_spill] sm:$0xff] }
 0x7ee   : > { %3403 = vrot.lane.b32.xlu1 %v9856_v23, %s7046_s13 }
 0x7f1   : > { %3647 = vrot.lane.b32.xlu0 %v9857_v53, %s7047_s8  ;;  %v9864_v53 = vld [vmem:[#allocation33_spill] sm:$0xff] }
 0x7f2   : > { %3844 = vrot.lane.b32.xlu1 %v9858_v2, %s7047_s8  ;;  %v9865_v2 = vld [vmem:[#allocation43_spill] sm:$0xff] }
 0x7f5   : > { %3645 = vrot.lane.b32.xlu0 %v9859_v0, %s7047_s8  ;;  %v3060_v0 = vpop.xlane.xlu0 %3059 }
 0x7f6   : > { %3842 = vrot.lane.b32.xlu1 %v9860_v13, %s7047_s8  ;;  %v3106_v13 = vsub.f32 %v8575_v31, %v3060_v0 }
 0x7f9   : > { %3621 = vrot.lane.b32.xlu0 %v9861_v51, %s7047_s8  ;;  %v9866_v51 = vld [vmem:[#allocation41_spill] sm:$0xff] }
 0x7fa   : > { %3840 = vrot.lane.b32.xlu1 %v9862_v1, %s7047_s8  ;;  %v3122_v1 = vmul.f32 1.442695, %v3106_v13 }
 0x7fc   : > { %6617 = vpow2.f32 %v3122_v1 }
 0x7fd   : > { %3836 = vrot.lane.b32.xlu0 %v9863_v46, %s7047_s8  ;;  %v3063_v46 = vpop.xlane.xlu1 %3062 }
 0x7fe   : > { %3838 = vrot.lane.b32.xlu1 %v9864_v53, %s7047_s8  ;;  %v3107_v53 = vsub.f32 %v8568_v48, %v3063_v46 }
 0x800   : > { %v3124_v56 = vmul.f32 1.442695, %v3107_v53  ;;  %v5955_v53 = vpop.f32.mrf.mxu1 }
 0x801   : > { %3627 = vrot.lane.b32.xlu0 %v7651_v15, %s7047_s8 }
 0x802   : > { %3623 = vrot.lane.b32.xlu1 %v9865_v2, %s7047_s8  ;;  %6619 = vpow2.f32 %v3124_v56 }
 0x806   : > { %3625 = vrot.lane.b32.xlu1 %v7628_v8, %s7047_s8 }
 0x809   : > { %v8767_v14 = vpop.eup %6617 }
 0x80a   : > { %3834 = vrot.lane.b32.xlu1 %v9866_v51, %s7047_s8  ;;  %v3154_v15 = vsel %vm1239_vm1, %v8767_v14, 0.0 }
 0x80f   : > { %v8771_v2 = vpop.eup %6619 }
 0x810   : > { %v3157_v8 = vsel %vm1239_vm1, %v8771_v2, 0.0 }
 0x820   : > { %3155 = vadd.xlane.f32.xlu0 %v3154_v15 }
 0x82e   : > { %3158 = vadd.xlane.f32.xlu1 %v3157_v8 }
 0x832   : > { %v3069_v31 = vpop.xlane.xlu1 %3068 }
 0x833   : > { %v3109_v0 = vsub.f32 %v8628_v52, %v3069_v31  ;;  %v3003_v52 = vpop.f32.mrf.mxu1 }
 0x834   : > { %v3066_v13 = vpop.xlane.xlu0 %3065 }
 0x835   : > { %v3128_v51 = vmul.f32 1.442695, %v3109_v0  ;;  %v3108_v48 = vsub.f32 %v8639_v60, %v3066_v13 }
 0x836   : > { %v3075_v1 = vpop.xlane.xlu1 %3074 }
 0x837   : > { %6621 = vpow2.f32 %v3128_v51  ;;  %v3126_v56 = vmul.f32 1.442695, %v3108_v48  ;;  %v3111_v46 = vsub.f32 %v8652_v4, %v3075_v1  ;;  %v5958_v4 = vpop.f32.mrf.mxu1 }
 0x838   : > { %v3072_v15 = vpop.xlane.xlu0 %3071 }
 0x839   : > { %6623 = vpow2.f32 %v3126_v56  ;;  %v3132_v23 = vmul.f32 1.442695, %v3111_v46  ;;  %v3110_v12 = vsub.f32 %v8667_v21, %v3072_v15 }
 0x83a   : > { %v3081_v25 = vpop.xlane.xlu1 %3080 }
 0x83b   : > { %v3130_v8 = vmul.f32 1.442695, %v3110_v12  ;;  %v3113_v9 = vsub.f32 %v8678_v61, %v3081_v25  ;;  %6625 = vpow2.f32 %v3132_v23  ;;  %v3013_v25 = vpop.f32.mrf.mxu1 }
 0x83c   : > { %v3078_v31 = vpop.xlane.xlu0 %3077 }
 0x83d   : > { %6627 = vpow2.f32 %v3130_v8  ;;  %v3136_v60 = vmul.f32 1.442695, %v3113_v9  ;;  %v3112_v0 = vsub.f32 %v8691_v35, %v3078_v31  ;;  %v5961_v9 = vpop.f32.mrf.mxu1 }
 0x83e   : > { %v3255_v13 = vpop.permute.xlu1 %3254 }
 0x83f   : > { %v3134_v51 = vmul.f32 1.442695, %v3112_v0  ;;  %6629 = vpow2.f32 %v3136_v60  ;;  %v3019_v60 = vadd.f32 %v5958_v4, %v8613_v32  ;;  %v9867_v32 = vld [vmem:[#allocation73_spill] sm:$0xff] }
 0x840   : > { %v3257_v48 = vpop.permute.xlu0 %3256 }
 0x841   : > { %6631 = vpow2.f32 %v3134_v51  ;;  %5965 = vmatprep.subr.mxu0 %v3257_v48  ;;  %v8804_v4 = vadd.f32 %v9867_v32, %v3019_v60 }
 0x842   : > { %v3251_v1 = vpop.permute.xlu1 %3250  ;;  %5966 = vmatpush3.msra.mxu0 %v3257_v48 }
 0x843   : > { %5967 = vmatprep.subr.mxu0 %v3255_v13 }
 0x844   : > { %v8781_v21 = vpop.eup %6621  ;;  %5968 = vmatpush3.msra.mxu0 %v3255_v13  ;;  %v3253_v23 = vpop.permute.xlu0 %3252 }
 0x845   : > { %5969 = vmatprep.subr.mxu0 %v3253_v23  ;;  %v3163_v61 = vsel %vm1239_vm1, %v8781_v21, 0.0  ;;  %v3023_v13 = vpop.f32.mrf.mxu1 }
 0x846   : > { %v8785_v35 = vpop.eup %6623  ;;  %v3247_v12 = vpop.permute.xlu1 %3246  ;;  %3164 = vadd.xlane.f32.xlu0 %v3163_v61  ;;  %5970 = vmatpush3.msra.mxu0 %v3253_v23 }
 0x847   : > { %5971 = vmatprep.subr.mxu0 %v3251_v1  ;;  %v3160_v15 = vsel %vm1239_vm1, %v8785_v35, 0.0 }
 0x848   : > { %5972 = vmatpush3.msra.mxu0 %v3251_v1  ;;  %v3249_v56 = vpop.permute.xlu0 %3248  ;;  %v8787_v46 = vpop.eup %6625  ;;  %v3009_v1 = vadd.f32 %v5955_v53, %v8557_v22 }
 0x849   : > { %5973 = vmatprep.subr.mxu0 %v3249_v56  ;;  %v3169_v23 = vsel %vm1239_vm1, %v8787_v46, 0.0  ;;  %v5964_v53 = vpop.f32.mrf.mxu1 }
 0x84a   : > { %v8791_v8 = vpop.eup %6627  ;;  %v3245_v31 = vpop.permute.xlu1 %3244  ;;  %3161 = vadd.xlane.f32.xlu0 %v3160_v15  ;;  %5974 = vmatpush3.msra.mxu0 %v3249_v56 }
 0x84b   : > { %5975 = vmatprep.subr.mxu0 %v3247_v12  ;;  %v3166_v0 = vsel %vm1239_vm1, %v8791_v8, 0.0 }
 0x84c   : > { %3167 = vadd.xlane.f32.xlu1 %v3166_v0  ;;  %5976 = vmatpush3.msra.mxu0 %v3247_v12  ;;  %v3243_v51 = vpop.permute.xlu0 %3242  ;;  %v8796_v48 = vpop.eup %6629  ;;  %v3029_v12 = vadd.f32 %v5961_v9, %v8622_v55  ;;  %v9868_v0 = vld [vmem:[#allocation74_spill] sm:$0xff]  ;;  %v8820_v9 = vld [vmem:[%s7328_s1 + $0x68] sm:$0xff] }
 0x84d   : > { %5977 = vmatprep.subr.mxu0 %v3245_v31  ;;  %v8812_v49 = vadd.f32 %v9868_v0, %v3009_v1  ;;  %v3175_v60 = vsel %vm1239_vm1, %v8796_v48, 0.0  ;;  %9869 = vst [vmem:[#allocation38_spill] sm:$0xff] %v8820_v9  ;;  %v3039_v1 = vadd.f32 %v5964_v53, %v8646_v7 }
 0x84e   : > { %v8801_v61 = vpop.eup %6631  ;;  %v3418_v56 = vpop.permute.xlu1 %3417  ;;  %3170 = vadd.xlane.f32.xlu0 %v3169_v23  ;;  %5978 = vmatpush3.msra.mxu0 %v3245_v31  ;;  %v3004_v31 = vadd.f32 %v3003_v52, %v8561_v24  ;;  %v8823_v23 = vadd.f32 %v8820_v9, %v3029_v12  ;;  %v3091_v24 = vsel %vm1239_vm1, %v8804_v4, -inf  ;;  %v9870_v52 = vld [vmem:[#allocation62_spill] sm:$0xff] }
 0x84f   : > { %5979 = vmatprep.subr.mxu0 %v3243_v51  ;;  %5993 = vmatprep.subr.mxu1 %v3418_v56  ;;  %v3172_v22 = vsel %vm1239_vm1, %v8801_v61, 0.0  ;;  %v3085_v32 = vsel %vm1239_vm1, %v8812_v49, -inf  ;;  %v8835_v12 = vld [vmem:[%s7328_s1 + $0x78] sm:$0xff] }
 0x850   : > { %5994 = vmatpush3.msra.mxu1 %v3418_v56  ;;  %3173 = vadd.xlane.f32.xlu1 %v3172_v22  ;;  %v8809_v15 = vpop.permute.xlu0 %3659  ;;  %v3014_v56 = vadd.f32 %v3013_v25, %v8617_v54  ;;  %9871 = vst [vmem:[#allocation34_spill] sm:$0xff] %v8835_v12  ;;  %v8838_v7 = vadd.f32 %v8835_v12, %v3039_v1  ;;  %v3097_v53 = vsel %vm1239_vm1, %v8823_v23, -inf }
 0x851   : > { %5980 = vmatpush3.msra.mxu0 %v3243_v51  ;;  %v8829_v51 = vadd.f32 %v9870_v52, %v3004_v31  ;;  %v9872_v31 = vld [vmem:[#allocation65_spill] sm:$0xff]  ;;  %v3024_v54 = vadd.f32 %v3023_v13, %v8633_v16  ;;  %v9873_v52 = vld [vmem:[#allocation75_spill] sm:$0xff]  ;;  %v9874_v13 = vld [vmem:[#allocation76_spill] sm:$0xff] }
 0x852   : > { %6021 = vmatprep.subr.msk.mxu0 %vm916_vm0, %v8809_v15  ;;  %v3416_v55 = vpop.permute.xlu1 %3415  ;;  %3176 = vadd.xlane.f32.xlu0 %v3175_v60  ;;  %v8843_v60 = vadd.f32 %v9872_v31, %v3014_v56  ;;  %v3103_v1 = vsel %vm1239_vm1, %v8838_v7, -inf }
 0x853   : > { %5995 = vmatprep.subr.mxu1 %v3416_v55  ;;  %v3082_v25 = vsel %vm1239_vm1, %v8829_v51, -inf }
 0x854   : > { %5996 = vmatpush3.msra.mxu1 %v3416_v55  ;;  %3092 = vmax.xlane.f32.xlu1 %v3091_v24  ;;  %v3410_v0 = vpop.permute.xlu0 %3409  ;;  %v3033_v55 = vpop.f32.mrf.mxu1  ;;  %v3088_v56 = vsel %vm1239_vm1, %v8843_v60, -inf }
 0x856   : > { %v3414_v22 = vpop.permute.xlu1 %3413  ;;  %3086 = vmax.xlane.f32.xlu0 %v3085_v32  ;;  %v8851_v32 = vadd.f32 %v9873_v52, %v3024_v54 }
 0x857   : > { %5997 = vmatprep.subr.mxu1 %v3414_v22 }
 0x858   : > { %5998 = vmatpush3.msra.mxu1 %v3414_v22  ;;  %3098 = vmax.xlane.f32.xlu1 %v3097_v53  ;;  %v3034_v22 = vadd.f32 %v3033_v55, %v8661_v63  ;;  %v3408_v53 = vpop.permute.xlu0 %3407 }
 0x85a   : > { %v3658_v24 = vpop.permute.xlu1 %3657  ;;  %3083 = vmax.xlane.f32.xlu0 %v3082_v25  ;;  %v8857_v31 = vadd.f32 %v9874_v13, %v3034_v22  ;;  %v3094_v25 = vsel %vm1239_vm1, %v8851_v32, -inf }
 0x85c   : > { %3104 = vmax.xlane.f32.xlu1 %v3103_v1  ;;  %v3406_v63 = vpop.permute.xlu0 %3405  ;;  %v3100_v54 = vsel %vm1239_vm1, %v8857_v31, -inf }
 0x85e   : > { %v3412_v16 = vpop.permute.xlu1 %3411  ;;  %3089 = vmax.xlane.f32.xlu0 %v3088_v56 }
 0x85f   : > { %5999 = vmatprep.subr.mxu1 %v3412_v16 }
 0x860   : > { %6000 = vmatpush3.msra.mxu1 %v3412_v16 }
 0x861   : > { %6001 = vmatprep.subr.mxu1 %v3410_v0 }
 0x862   : > { %v3656_v1 = vpop.permute.xlu1 %3655  ;;  %3095 = vmax.xlane.f32.xlu0 %v3094_v25  ;;  %6002 = vmatpush3.msra.mxu1 %v3410_v0  ;;  %v3652_v0 = vpop.permute.xlu0 %3651 }
 0x863   : > { %6003 = vmatprep.subr.mxu1 %v3408_v53 }
 0x864   : > { %6004 = vmatpush3.msra.mxu1 %v3408_v53 }
 0x865   : > { %6005 = vmatprep.subr.mxu1 %v3406_v63 }
 0x866   : > { %v3654_v55 = vpop.permute.xlu1 %3653  ;;  %3101 = vmax.xlane.f32.xlu0 %v3100_v54  ;;  %6006 = vmatpush3.msra.mxu1 %v3406_v63  ;;  %v3650_v56 = vpop.permute.xlu0 %3649 }
 0x86a   : > { %v3404_v52 = vpop.permute.xlu1 %3403  ;;  %v3648_v53 = vpop.permute.xlu0 %3647 }
 0x86b   : > { %6007 = vmatprep.subr.mxu1 %v3404_v52 }
 0x86c   : > { %6008 = vmatpush3.msra.mxu1 %v3404_v52 }
 0x86d   : > { %3631 = vrot.lane.b32.xlu1 %v7686_v27, %s7047_s8 }
 0x86e   : > { %v8865_v22 = vpop.permute.xlu1 %3844  ;;  %v3646_v16 = vpop.permute.xlu0 %3645 }
 0x86f   : > { %6049 = vmatprep.subr.msk.mxu1 %vm916_vm0, %v8865_v22 }
 0x872   : > { %v8871_v13 = vpop.permute.xlu1 %3842  ;;  %v8873_v25 = vpop.permute.xlu0 %3621 }
 0x876   : > { %v8875_v63 = vpop.permute.xlu1 %3840  ;;  %v8877_v54 = vpop.permute.xlu0 %3836 }
 0x87a   : > { %v8879_v27 = vpop.permute.xlu1 %3838  ;;  %v8881_v52 = vpop.permute.xlu0 %3627 }
 0x87c   : > { %3629 = vrot.lane.b32.xlu0 %v7660_v19, %s7047_s8 }
 0x87e   : > { %v8883_v37 = vpop.permute.xlu1 %3623 }
 0x882   : > { %v8885_v19 = vpop.permute.xlu1 %3625 }
 0x886   : > { %v8887_v42 = vpop.permute.xlu1 %3834 }
 0x8a9   : > { %v3156_v36 = vpop.xlane.xlu0 %3155 }
 0x8aa   : > { %6633 = vrcp.f32 %v3156_v36 }
 0x8b7   : > { %v6634_v39 = vpop.eup %6633  ;;  %v3159_v12 = vpop.xlane.xlu1 %3158 }
 0x8b8   : > { %6635 = vrcp.f32 %v3159_v12  ;;  %v3218_v9 = vmul.f32 %v6634_v39, %v8767_v14 }
 0x8ba   : > { %5981 = vmatprep.mubr.msk.f32.mxu0 %vm1239_vm1, %v3218_v9 }
 0x8c5   : > { %v6636_v47 = vpop.eup %6635 }
 0x8c6   : > { %v3219_v40 = vmul.f32 %v6636_v47, %v8771_v2 }
 0x8c8   : > { %5982 = vmatmul.mubr.msk.f32.vlgmr.msra.gmra.mxu0 %vm1239_vm1, %v3219_v40 }
 0x8c9   : > { %6022 = vmatpush3.xpose.msk.msra.mxu0 %vm916_vm0, %v8809_v15 }
 0x8ca   : > { %6023 = vmatprep.subr.msk.mxu0 %vm916_vm0, %v3658_v24 }
 0x8cd   : > { %6024 = vmatpush3.xpose.msk.msra.mxu0 %vm916_vm0, %v3658_v24 }
 0x8ce   : > { %6025 = vmatprep.subr.msk.mxu0 %vm916_vm0, %v3656_v1 }
 0x8cf   : > { %v3165_v36 = vpop.xlane.xlu0 %3164 }
 0x8d0   : > { %6637 = vrcp.f32 %v3165_v36 }
 0x8d1   : > { %6026 = vmatpush3.xpose.msk.msra.mxu0 %vm916_vm0, %v3656_v1 }
 0x8d2   : > { %6027 = vmatprep.subr.msk.mxu0 %vm916_vm0, %v3654_v55 }
 0x8d3   : > { %v3162_v39 = vpop.xlane.xlu0 %3161 }
 0x8d4   : > { %6639 = vrcp.f32 %v3162_v39 }
 0x8d5   : > { %6028 = vmatpush3.xpose.msk.msra.mxu0 %vm916_vm0, %v3654_v55  ;;  %v3168_v40 = vpop.xlane.xlu1 %3167 }
 0x8d6   : > { %6641 = vrcp.f32 %v3168_v40  ;;  %6029 = vmatprep.subr.msk.mxu0 %vm916_vm0, %v3652_v0 }
 0x8d7   : > { %v3171_v47 = vpop.xlane.xlu0 %3170 }
 0x8d8   : > { %6643 = vrcp.f32 %v3171_v47 }
 0x8d9   : > { %6030 = vmatpush3.xpose.msk.msra.mxu0 %vm916_vm0, %v3652_v0  ;;  %v3174_v14 = vpop.xlane.xlu1 %3173 }
 0x8da   : > { %6645 = vrcp.f32 %v3174_v14  ;;  %6031 = vmatprep.subr.msk.mxu0 %vm916_vm0, %v3650_v56 }
 0x8db   : > { %v3177_v2 = vpop.xlane.xlu0 %3176 }
 0x8dc   : > { %6647 = vrcp.f32 %v3177_v2 }
 0x8dd   : > { %6032 = vmatpush3.xpose.msk.msra.mxu0 %vm916_vm0, %v3650_v56  ;;  %v6638_v9 = vpop.eup %6637  ;;  %v3093_v14 = vpop.xlane.xlu1 %3092 }
 0x8de   : > { %6033 = vmatprep.subr.msk.mxu0 %vm916_vm0, %v3648_v53  ;;  %v3221_v56 = vmul.f32 %v6638_v9, %v8781_v21 }
 0x8df   : > { %v3087_v15 = vpop.xlane.xlu0 %3086 }
 0x8e0   : > { %v3115_v12 = vsub.f32 %v8812_v49, %v3087_v15 }
 0x8e1   : > { %v6640_v24 = vpop.eup %6639  ;;  %6034 = vmatpush3.xpose.msk.msra.mxu0 %vm916_vm0, %v3648_v53 }
 0x8e2   : > { %v3140_v1 = vmul.f32 1.442695, %v3115_v12  ;;  %6035 = vmatprep.subr.msk.mxu0 %vm916_vm0, %v3646_v16  ;;  %v3220_v55 = vmul.f32 %v6640_v24, %v8785_v35 }
 0x8e3   : > { %v6642_v0 = vpop.eup %6641  ;;  %v3084_v36 = vpop.xlane.xlu0 %3083 }
 0x8e4   : > { %6649 = vpow2.f32 %v3140_v1  ;;  %v3114_v39 = vsub.f32 %v8829_v51, %v3084_v36  ;;  %5984 = vmatprep.mubr.msk.f32.mxu0 %vm1239_vm1, %v3220_v55  ;;  %v3222_v40 = vmul.f32 %v6642_v0, %v8791_v8  ;;  %v3117_v1 = vsub.f32 %v8804_v4, %v3093_v14 }
 0x8e5   : > { %v6644_v49 = vpop.eup %6643  ;;  %6036 = vmatpush3.xpose.msk.msra.mxu0 %vm916_vm0, %v3646_v16  ;;  %v3099_v16 = vpop.xlane.xlu1 %3098 }
 0x8e6   : > { %v3138_v53 = vmul.f32 1.442695, %v3114_v39  ;;  %5985 = vmatmul.mubr.msk.f32.gmra.mxu0 %vm1239_vm1, %v3221_v56  ;;  %v3223_v47 = vmul.f32 %v6644_v49, %v8787_v46  ;;  %v3144_v0 = vmul.f32 1.442695, %v3117_v1 }
 0x8e7   : > { %v6646_v35 = vpop.eup %6645  ;;  %5987 = vmatprep.mubr.msk.f32.mxu0 %vm1239_vm1, %v3222_v40  ;;  %v3090_v2 = vpop.xlane.xlu0 %3089 }
 0x8e8   : > { %6651 = vpow2.f32 %v3138_v53  ;;  %v3224_v51 = vmul.f32 %v6646_v35, %v8801_v61 }
 0x8e9   : > { %v6648_v15 = vpop.eup %6647  ;;  %v3105_v12 = vpop.xlane.xlu1 %3104 }
 0x8ea   : > { %5988 = vmatmul.mubr.msk.f32.gmra.mxu0 %vm1239_vm1, %v3223_v47  ;;  %v3225_v21 = vmul.f32 %v6648_v15, %v8796_v48 }
 0x8eb   : > { %5990 = vmatprep.mubr.msk.f32.mxu0 %vm1239_vm1, %v3224_v51  ;;  %v3096_v8 = vpop.xlane.xlu0 %3095 }
 0x8ec   : > { %v3118_v36 = vsub.f32 %v8851_v32, %v3096_v8 }
 0x8ee   : > { %5991 = vmatmul.mubr.msk.f32.gmra.mxu0 %vm1239_vm1, %v3225_v21  ;;  %v3146_v40 = vmul.f32 1.442695, %v3118_v36 }
 0x8ef   : > { %6037 = vmatprep.mubr.msk.f32.mxu0 %vm916_vm0, %v8873_v25  ;;  %v3102_v46 = vpop.xlane.xlu0 %3101 }
 0x8f0   : > { %v3120_v56 = vsub.f32 %v8857_v31, %v3102_v46 }
 0x8f1   : > { %v8925_v9 = vpop.eup %6649 }
 0x8f2   : > { %6038 = vmatmul.mubr.msk.f32.vlgmr.msra.gmra.mxu0 %vm916_vm0, %v8883_v37  ;;  %v3181_v61 = vsel %vm1239_vm1, %v8925_v9, 0.0  ;;  %v3632_v37 = vpop.permute.xlu1 %3631 }
 0x8f3   : > { %6040 = vmatprep.mubr.msk.f32.mxu0 %vm916_vm0, %v8885_v19  ;;  %3182 = vadd.xlane.f32.xlu0 %v3181_v61  ;;  %v3630_v24 = vpop.permute.xlu0 %3629  ;;  %v3116_v19 = vsub.f32 %v8843_v60, %v3090_v2 }
 0x8f5   : > { %v8933_v48 = vpop.eup %6651  ;;  %v3142_v55 = vmul.f32 1.442695, %v3116_v19 }
 0x8f6   : > { %6041 = vmatmul.mubr.msk.f32.gmra.mxu0 %vm916_vm0, %v8881_v52  ;;  %v3178_v25 = vsel %vm1239_vm1, %v8933_v48, 0.0  ;;  %v3119_v52 = vsub.f32 %v8823_v23, %v3099_v16 }
 0x8f7   : > { %6043 = vmatprep.mubr.msk.f32.mxu0 %vm916_vm0, %v3630_v24  ;;  %3179 = vadd.xlane.f32.xlu1 %v3178_v25  ;;  %6653 = vpow2.f32 %v3142_v55 }
 0x8f8   : > { %v3148_v39 = vmul.f32 1.442695, %v3119_v52  ;;  %6655 = vpow2.f32 %v3144_v0  ;;  %v9057_v52 = vld [vmem:[#allocation9 + $0xd8] sm:$0xff]  ;;  %v9059_v0 = vld [vmem:[#allocation9 + $0xd0] sm:$0xff] }
 0x8fa   : > { %6044 = vmatmul.mubr.msk.f32.gmra.mxu0 %vm916_vm0, %v3632_v37  ;;  %6657 = vpow2.f32 %v3148_v39 }
 0x8fb   : > { %6659 = vpow2.f32 %v3146_v40 }
 0x904   : > { %v8951_v4 = vpop.eup %6653 }
 0x905   : > { %v8953_v23 = vpop.eup %6655  ;;  %v3184_v32 = vsel %vm1239_vm1, %v8951_v4, 0.0 }
 0x907   : > { %v8957_v49 = vpop.eup %6657 }
 0x908   : > { %3633 = vrot.lane.b32.xlu1 %v7695_v30, %s7047_s8  ;;  %v3121_v30 = vsub.f32 %v8838_v7, %v3105_v12  ;;  %v8959_v31 = vpop.eup %6659  ;;  %v3187_v7 = vsel %vm1239_vm1, %v8953_v23, 0.0  ;;  %v3193_v53 = vsel %vm1239_vm1, %v8957_v49, 0.0  ;;  %v9050_v12 = vld [vmem:[#allocation9 + $0xc0] sm:$0xff] }
 0x909   : > { %3832 = vrot.lane.b32.xlu0 %v7581_v58, %s7047_s8  ;;  %v3150_v58 = vmul.f32 1.442695, %v3120_v56  ;;  %v3190_v35 = vsel %vm1239_vm1, %v8959_v31, 0.0 }
 0x90a   : > { %v3152_v60 = vmul.f32 1.442695, %v3121_v30 }
 0x90b   : > { %6661 = vpow2.f32 %v3150_v58 }
 0x90c   : > { %6663 = vpow2.f32 %v3152_v60 }
 0x918   : > { %v8965_v47 = vpop.eup %6661 }
 0x919   : > { %v3196_v14 = vsel %vm1239_vm1, %v8965_v47, 0.0  ;;  %v8971_v2 = vpop.eup %6663 }
 0x91a   : > { %v3199_v51 = vsel %vm1239_vm1, %v8971_v2, 0.0 }
 0x928   : > { %3185 = vadd.xlane.f32.xlu0 %v3184_v32 }
 0x92c   : > { %3188 = vadd.xlane.f32.xlu1 %v3187_v7  ;;  %3194 = vadd.xlane.f32.xlu0 %v3193_v53  ;;  %v9072_v7 = vld [vmem:[#allocation9 + $0xe0] sm:$0xff] }
 0x930   : > { %3191 = vadd.xlane.f32.xlu1 %v3190_v35  ;;  %3197 = vadd.xlane.f32.xlu0 %v3196_v14 }
 0x934   : > { %3200 = vadd.xlane.f32.xlu1 %v3199_v51 }
 0x945   : > { %3830 = vrot.lane.b32.xlu1 %v7598_v62, %s7047_s8 }
 0x946   : > { %3635 = vrot.lane.b32.xlu0 %v7721_v38, %s7047_s8 }
 0x949   : > { %3808 = vrot.lane.b32.xlu1 %v7624_v6, %s7047_s8 }
 0x94a   : > { %3806 = vrot.lane.b32.xlu0 %v7422_v10, %s7047_s8 }
 0x94d   : > { %3812 = vrot.lane.b32.xlu1 %v7655_v17, %s7047_s8 }
 0x94e   : > { %3810 = vrot.lane.b32.xlu0 %v7632_v11, %s7047_s8 }
 0x951   : > { %3816 = vrot.lane.b32.xlu1 %v7690_v28, %s7047_s8 }
 0x952   : > { %3814 = vrot.lane.b32.xlu0 %v7664_v20, %s7047_s8 }
 0x955   : > { %3820 = vrot.lane.b32.xlu1 %v7725_v41, %s7047_s8 }
 0x956   : > { %3818 = vrot.lane.b32.xlu0 %v9831_v5, %s7047_s8 }
 0x97c   : > { %v3183_v62 = vpop.xlane.xlu0 %3182 }
 0x97d   : > { %6665 = vrcp.f32 %v3183_v62 }
 0x980   : > { %v3180_v10 = vpop.xlane.xlu1 %3179 }
 0x981   : > { %6667 = vrcp.f32 %v3180_v10 }
 0x984   : > { %v3634_v6 = vpop.permute.xlu1 %3633 }
 0x985   : > { %6046 = vmatprep.mubr.msk.f32.mxu0 %vm916_vm0, %v3634_v6 }
 0x988   : > { %v8996_v11 = vpop.f32.mrf.mxu0 }
 0x98a   : > { %v8998_v17 = vpop.f32.mrf.mxu0  ;;  %v6666_v28 = vpop.eup %6665 }
 0x98b   : > { %v6374_v20 = vpack.i.bf16 %v8996_v11, %v8998_v17  ;;  %v3227_v5 = vmul.f32 %v6666_v28, %v8925_v9  ;;  %v4749_v11 = vld [vmem:[#allocation8 + $0x58] sm:$0xff]  ;;  %v4748_v17 = vld [vmem:[#allocation8 + $0x50] sm:$0xff] }
 0x98e   : > { %v6668_v38 = vpop.eup %6667 }
 0x98f   : > { %v3226_v41 = vmul.f32 %v6668_v38, %v8933_v48 }
 0x991   : > { %6009 = vmatprep.mubr.msk.f32.mxu1 %vm1239_vm1, %v3226_v41 }
 0x992   : > { %6010 = vmatmul.mubr.msk.f32.vlgmr.msra.gmra.mxu1 %vm1239_vm1, %v3227_v5 }
 0x993   : > { %6050 = vmatpush3.xpose.msk.msra.mxu1 %vm916_vm0, %v8865_v22 }
 0x994   : > { %6051 = vmatprep.subr.msk.mxu1 %vm916_vm0, %v8871_v13 }
 0x997   : > { %6052 = vmatpush3.xpose.msk.msra.mxu1 %vm916_vm0, %v8871_v13  ;;  %v3833_v13 = vpop.permute.xlu0 %3832 }
 0x998   : > { %6053 = vmatprep.subr.msk.mxu1 %vm916_vm0, %v8875_v63 }
 0x99b   : > { %6054 = vmatpush3.xpose.msk.msra.mxu1 %vm916_vm0, %v8875_v63 }
 0x99c   : > { %6055 = vmatprep.subr.msk.mxu1 %vm916_vm0, %v8879_v27 }
 0x99f   : > { %6056 = vmatpush3.xpose.msk.msra.mxu1 %vm916_vm0, %v8879_v27 }
 0x9a0   : > { %6057 = vmatprep.subr.msk.mxu1 %vm916_vm0, %v8877_v54 }
 0x9a3   : > { %6058 = vmatpush3.xpose.msk.msra.mxu1 %vm916_vm0, %v8877_v54 }
 0x9a4   : > { %6059 = vmatprep.subr.msk.mxu1 %vm916_vm0, %v8887_v42 }
 0x9a6   : > { %v9026_v22 = vpop.f32.mrf.mxu0 }
 0x9a7   : > { %6060 = vmatpush3.xpose.msk.msra.mxu1 %vm916_vm0, %v8887_v42  ;;  %v9046_v42 = vld [vmem:[#allocation9 + $0xc8] sm:$0xff] }
 0x9a8   : > { %v9030_v63 = vpop.f32.mrf.mxu0  ;;  %6061 = vmatprep.subr.msk.mxu1 %vm916_vm0, %v3833_v13 }
 0x9a9   : > { %v6389_v27 = vpack.i.bf16 %v9026_v22, %v9030_v63  ;;  %v9899_v22 = vld [vmem:[#allocation83_spill] sm:$0xff] }
 0x9aa   : > { %v9035_v15 = vpop.f32.mrf.mxu0 }
 0x9ab   : > { %6062 = vmatpush3.xpose.msk.msra.mxu1 %vm916_vm0, %v3833_v13 }
 0x9ac   : > { %v9038_v54 = vpop.f32.mrf.mxu0 }
 0x9ad   : > { %v6404_v21 = vpack.i.bf16 %v9035_v15, %v9038_v54  ;;  %v9901_v15 = vld [vmem:[#allocation84_spill] sm:$0xff]  ;;  %v9902_v54 = vld [vmem:[#allocation85_spill] sm:$0xff] }
 0x9ae   : > { %v9042_v8 = vpop.f32.mrf.mxu0 }
 0x9b0   : > { %v9044_v16 = vpop.f32.mrf.mxu0 }
 0x9b1   : > { %v6419_v46 = vpack.i.bf16 %v9042_v8, %v9044_v16  ;;  %v3186_v9 = vpop.xlane.xlu0 %3185  ;;  %v9904_v8 = vld [vmem:[#allocation86_spill] sm:$0xff]  ;;  %v9905_v16 = vld [vmem:[#allocation87_spill] sm:$0xff] }
 0x9b2   : > { %v6039_v61 = vpop.f32.mrf.mxu0  ;;  %6669 = vrcp.f32 %v3186_v9 }
 0x9b3   : > { %v3765_v48 = vadd.f32 %v6039_v61, %v9046_v42 }
 0x9b4   : > { %v3759_v24 = vpop.f32.mrf.mxu0 }
 0x9b5   : > { %v9054_v25 = vadd.f32 %v8565_v43, %v3765_v48  ;;  %v3760_v37 = vadd.f32 %v3759_v24, %v9050_v12  ;;  %v3189_v19 = vpop.xlane.xlu1 %3188  ;;  %v3195_v1 = vpop.xlane.xlu0 %3194  ;;  %v9066_v43 = vld [vmem:[#allocation9 + $0xe8] sm:$0xff] }
 0x9b6   : > { %v6042_v55 = vpop.f32.mrf.mxu0  ;;  %6671 = vrcp.f32 %v3189_v19 }
 0x9b7   : > { %v9062_v36 = vadd.f32 %v8572_v45, %v3760_v37  ;;  %v4002_v39 = vsel %vm1239_vm1, %v9054_v25, -inf  ;;  %v3775_v40 = vadd.f32 %v6042_v55, %v9057_v52  ;;  %6673 = vrcp.f32 %v3195_v1 }
 0x9b8   : > { %v3769_v56 = vpop.f32.mrf.mxu0  ;;  %4003 = vmax.xlane.f32.xlu1 %v4002_v39 }
 0x9b9   : > { %v3770_v30 = vadd.f32 %v3769_v56, %v9059_v0  ;;  %v3192_v58 = vpop.xlane.xlu1 %3191  ;;  %v3999_v60 = vsel %vm1239_vm1, %v9062_v36, -inf  ;;  %v3198_v32 = vpop.xlane.xlu0 %3197  ;;  %v9079_v51 = vadd.f32 %v8625_v18, %v3775_v40 }
 0x9ba   : > { %6675 = vrcp.f32 %v3192_v58  ;;  %4000 = vmax.xlane.f32.xlu0 %v3999_v60  ;;  %v6045_v45 = vpop.f32.mrf.mxu0 }
 0x9bb   : > { %v9075_v53 = vadd.f32 %v8636_v34, %v3770_v30  ;;  %v3785_v35 = vadd.f32 %v6045_v45, %v9066_v43  ;;  %6677 = vrcp.f32 %v3198_v32  ;;  %v4008_v13 = vsel %vm1239_vm1, %v9079_v51, -inf  ;;  %v9125_v45 = vld [vmem:[#allocation9 + $0xf8] sm:$0xff] }
 0x9bc   : > { %v3779_v14 = vpop.f32.mrf.mxu0 }
 0x9bd   : > { %v9082_v62 = vadd.f32 %v8649_v44, %v3785_v35  ;;  %v3780_v10 = vadd.f32 %v3779_v14, %v9072_v7  ;;  %v3201_v6 = vpop.xlane.xlu1 %3200  ;;  %v4005_v28 = vsel %vm1239_vm1, %v9075_v53, -inf  ;;  %v3636_v38 = vpop.permute.xlu0 %3635  ;;  %v9127_v14 = vld [vmem:[#allocation9 + $0xf0] sm:$0xff] }
 0x9be   : > { %6679 = vrcp.f32 %v3201_v6  ;;  %4006 = vmax.xlane.f32.xlu0 %v4005_v28  ;;  %6047 = vmatmul.mubr.msk.f32.gmra.mxu0 %vm916_vm0, %v3636_v38 }
 0x9bf   : > { %v6670_v34 = vpop.eup %6669  ;;  %v4014_v41 = vsel %vm1239_vm1, %v9082_v62, -inf  ;;  %v9092_v44 = vadd.f32 %v8664_v33, %v3780_v10 }
 0x9c0   : > { %4015 = vmax.xlane.f32.xlu1 %v4014_v41  ;;  %v3228_v18 = vmul.f32 %v6670_v34, %v8951_v4 }
 0x9c1   : > { %v3831_v5 = vpop.permute.xlu1 %3830  ;;  %v4011_v4 = vsel %vm1239_vm1, %v9092_v44, -inf  ;;  %v3807_v19 = vpop.permute.xlu0 %3806 }
 0x9c2   : > { %4009 = vmax.xlane.f32.xlu0 %v4008_v13  ;;  %6012 = vmatprep.mubr.msk.f32.mxu1 %vm1239_vm1, %v3228_v18 }
 0x9c3   : > { %v6672_v9 = vpop.eup %6671  ;;  %6063 = vmatprep.subr.msk.mxu1 %vm916_vm0, %v3831_v5 }
 0x9c4   : > { %6064 = vmatpush3.xpose.msk.msra.mxu1 %vm916_vm0, %v3831_v5  ;;  %v3229_v61 = vmul.f32 %v6672_v9, %v8953_v23  ;;  %v6674_v48 = vpop.eup %6673 }
 0x9c5   : > { %v3231_v1 = vmul.f32 %v6674_v48, %v8957_v49  ;;  %v3809_v23 = vpop.permute.xlu1 %3808  ;;  %v3811_v40 = vpop.permute.xlu0 %3810 }
 0x9c6   : > { %4012 = vmax.xlane.f32.xlu0 %v4011_v4  ;;  %6013 = vmatmul.mubr.msk.f32.gmra.mxu1 %vm1239_vm1, %v3229_v61 }
 0x9c7   : > { %v6676_v33 = vpop.eup %6675 }
 0x9c8   : > { %v6678_v24 = vpop.eup %6677  ;;  %v3230_v37 = vmul.f32 %v6676_v33, %v8959_v31 }
 0x9c9   : > { %v3232_v55 = vmul.f32 %v6678_v24, %v8965_v47  ;;  %v3813_v31 = vpop.permute.xlu1 %3812  ;;  %v3815_v49 = vpop.permute.xlu0 %3814 }
 0x9ca   : > { %6015 = vmatprep.mubr.msk.f32.mxu1 %vm1239_vm1, %v3230_v37  ;;  %v9875_v37 = vld [vmem:[#allocation46_spill] sm:$0xff] }
 0x9cb   : > { %v6680_v39 = vpop.eup %6679  ;;  %6016 = vmatmul.mubr.msk.f32.gmra.mxu1 %vm1239_vm1, %v3231_v1  ;;  %v9876_v1 = vld [vmem:[#allocation53_spill] sm:$0xff] }
 0x9cc   : > { %6018 = vmatprep.mubr.msk.f32.mxu1 %vm1239_vm1, %v3232_v55  ;;  %v3233_v56 = vmul.f32 %v6680_v39, %v8971_v2 }
 0x9cd   : > { %v3817_v47 = vpop.permute.xlu1 %3816  ;;  %v3819_v30 = vpop.permute.xlu0 %3818 }
 0x9cf   : > { %6019 = vmatmul.mubr.msk.f32.gmra.mxu1 %vm1239_vm1, %v3233_v56 }
 0x9d0   : > { %6065 = vmatprep.mubr.msk.f32.mxu1 %vm916_vm0, %v3807_v19 }
 0x9d1   : > { %v3821_v2 = vpop.permute.xlu1 %3820 }
 0x9d3   : > { %6066 = vmatmul.mubr.msk.f32.vlgmr.msra.gmra.mxu1 %vm916_vm0, %v3809_v23 }
 0x9d4   : > { %6068 = vmatprep.mubr.msk.f32.mxu1 %vm916_vm0, %v3811_v40 }
 0x9d7   : > { %6069 = vmatmul.mubr.msk.f32.gmra.mxu1 %vm916_vm0, %v3813_v31 }
 0x9d8   : > { %6071 = vmatprep.mubr.msk.f32.mxu1 %vm916_vm0, %v3815_v49 }
 0x9db   : > { %6072 = vmatmul.mubr.msk.f32.gmra.mxu1 %vm916_vm0, %v3817_v47 }
 0x9dc   : > { %6074 = vmatprep.mubr.msk.f32.mxu1 %vm916_vm0, %v3819_v30 }
 0x9df   : > { %6075 = vmatmul.mubr.msk.f32.gmra.mxu1 %vm916_vm0, %v3821_v2 }
 0xa41   : > { %v4004_v55 = vpop.xlane.xlu1 %4003 }
 0xa43   : > { %v4001_v24 = vpop.xlane.xlu0 %4000 }
 0xa47   : > { %v4007_v19 = vpop.xlane.xlu0 %4006 }
 0xa49   : > { %v4016_v56 = vpop.xlane.xlu1 %4015 }
 0xa4a   : > { %v4052_v49 = vsub.f32 %v9082_v62, %v4016_v56 }
 0xa4b   : > { %v4010_v39 = vpop.xlane.xlu0 %4009 }
 0xa4f   : > { %v4013_v31 = vpop.xlane.xlu0 %4012 }
 0xa50   : > { %v4051_v2 = vsub.f32 %v9092_v44, %v4013_v31 }
 0xa52   : > { %v9119_v58 = vpop.f32.mrf.mxu1 }
 0xa54   : > { %v9121_v60 = vpop.f32.mrf.mxu1 }
 0xa55   : > { %v6434_v32 = vpack.i.bf16 %v9119_v58, %v9121_v60 }
 0xa7e   : > { %v6048_v35 = vpop.f32.mrf.mxu0 }
 0xa7f   : > { %v3795_v10 = vadd.f32 %v6048_v35, %v9125_v45 }
 0xa80   : > { %v3789_v6 = vpop.f32.mrf.mxu0 }
 0xa81   : > { %v9131_v28 = vadd.f32 %v8675_v29, %v3795_v10  ;;  %v3790_v38 = vadd.f32 %v3789_v6, %v9127_v14 }
 0xa83   : > { %v9135_v34 = vadd.f32 %v8688_v59, %v3790_v38  ;;  %v4020_v41 = vsel %vm1239_vm1, %v9131_v28, -inf }
 0xa84   : > { %4021 = vmax.xlane.f32.xlu1 %v4020_v41 }
 0xa85   : > { %v4017_v18 = vsel %vm1239_vm1, %v9135_v34, -inf }
 0xa86   : > { %v9141_v5 = vpop.f32.mrf.mxu1  ;;  %4018 = vmax.xlane.f32.xlu0 %v4017_v18 }
 0xa88   : > { %v9143_v13 = vpop.f32.mrf.mxu1 }
 0xa89   : > { %v6444_v29 = vpack.i.bf16 %v9141_v5, %v9143_v13 }
 0xa8b   : > { %v9147_v9 = vpop.f32.mrf.mxu1 }
 0xa8d   : > { %v9149_v61 = vpop.f32.mrf.mxu1 }
 0xa8e   : > { %v6459_v59 = vpack.i.bf16 %v9147_v9, %v9149_v61 }
 0xa8f   : > { %v9153_v4 = vpop.f32.mrf.mxu1 }
 0xa91   : > { %v9155_v48 = vpop.f32.mrf.mxu1 }
 0xa92   : > { %v6479_v33 = vpack.i.bf16 %v9153_v4, %v9155_v48 }
 0xa95   : > { %4195 = vrot.lane.b32.xlu1 %v9784_v26, %s7047_s8  ;;  %v4048_v26 = vsub.f32 %v9054_v25, %v4004_v55  ;;  %v4073_v25 = vmul.f32 1.442695, %v4052_v49 }
 0xa97   : > { %v4065_v23 = vmul.f32 1.442695, %v4048_v26 }
 0xa99   : > { %4191 = vrot.lane.b32.xlu1 %v9785_v57, %s7047_s8  ;;  %v4047_v57 = vsub.f32 %v9062_v36, %v4001_v24  ;;  %6681 = vpow2.f32 %v4065_v23  ;;  %v4071_v36 = vmul.f32 1.442695, %v4051_v2 }
 0xa9b   : > { %v4063_v40 = vmul.f32 1.442695, %v4047_v57 }
 0xa9c   : > { %4197 = vrot.lane.b32.xlu0 %v9786_v50, %s7047_s8  ;;  %v4050_v50 = vsub.f32 %v9079_v51, %v4010_v39 }
 0xa9d   : > { %4187 = vrot.lane.b32.xlu1 %v9787_v3, %s7047_s8  ;;  %v4049_v3 = vsub.f32 %v9075_v53, %v4007_v19  ;;  %6683 = vpow2.f32 %v4063_v40  ;;  %v6067_v19 = vpop.f32.mrf.mxu1 }
 0xa9e   : > { %v4069_v47 = vmul.f32 1.442695, %v4050_v50 }
 0xa9f   : > { %v4067_v30 = vmul.f32 1.442695, %v4049_v3  ;;  %v3944_v55 = vpop.f32.mrf.mxu1 }
 0xaa0   : > { %4193 = vrot.lane.b32.xlu0 %v9875_v37, %s7047_s8  ;;  %6685 = vpow2.f32 %v4069_v47 }
 0xaa1   : > { %6687 = vpow2.f32 %v4067_v30  ;;  %v6070_v56 = vpop.f32.mrf.mxu1  ;;  %v3950_v30 = vadd.f32 %v6067_v19, %v9046_v42 }
 0xaa2   : > { %6689 = vpow2.f32 %v4073_v25  ;;  %v3945_v25 = vadd.f32 %v3944_v55, %v9050_v12 }
 0xaa3   : > { %6691 = vpow2.f32 %v4071_v36  ;;  %v3954_v31 = vpop.f32.mrf.mxu1 }
 0xaa4   : > { %4189 = vrot.lane.b32.xlu0 %v9876_v1, %s7047_s8  ;;  %v3955_v19 = vadd.f32 %v3954_v31, %v9059_v0 }
 0xaa6   : > { %v9177_v51 = vpop.eup %6681 }
 0xaa7   : > { %v4098_v53 = vsel %vm1239_vm1, %v9177_v51, 0.0 }
 0xaaa   : > { %v9179_v35 = vpop.eup %6683 }
 0xaab   : > { %v4095_v62 = vsel %vm1239_vm1, %v9179_v35, 0.0 }
 0xaad   : > { %v9183_v10 = vpop.eup %6685 }
 0xaae   : > { %v9187_v44 = vpop.eup %6687  ;;  %v4104_v6 = vsel %vm1239_vm1, %v9183_v10, 0.0 }
 0xaaf   : > { %v9191_v38 = vpop.eup %6689  ;;  %v4101_v41 = vsel %vm1239_vm1, %v9187_v44, 0.0 }
 0xab0   : > { %v9195_v18 = vpop.eup %6691  ;;  %v4110_v24 = vsel %vm1239_vm1, %v9191_v38, 0.0 }
 0xab1   : > { %v4107_v37 = vsel %vm1239_vm1, %v9195_v18, 0.0 }
 0xac1   : > { %4099 = vadd.xlane.f32.xlu1 %v4098_v53 }
 0xac3   : > { %4096 = vadd.xlane.f32.xlu0 %v4095_v62  ;;  %v6761_v62 = vld [vmem:[%s7328_s1 + $0x48] sm:$0xff] }
 0xac5   : > { %4105 = vadd.xlane.f32.xlu1 %v4104_v6  ;;  %v9208_v6 = vadd.f32 %v6761_v62, %v3950_v30  ;;  %v9878_v30 = vld [vmem:[#allocation34_spill] sm:$0xff] }
 0xac7   : > { %4102 = vadd.xlane.f32.xlu0 %v4101_v41  ;;  %v3960_v41 = vadd.f32 %v6070_v56, %v9057_v52 }
 0xac9   : > { %4111 = vadd.xlane.f32.xlu1 %v4110_v24 }
 0xacb   : > { %4108 = vadd.xlane.f32.xlu0 %v4107_v37  ;;  %v6762_v37 = vld [vmem:[%s7328_s1 + $0x40] sm:$0xff] }
 0xacc   : > { %v9216_v12 = vadd.f32 %v6762_v37, %v3945_v25  ;;  %v9880_v37 = vld [vmem:[#allocation66_spill] sm:$0xff] }
 0xace   : > { %v4023_v56 = vsel %vm1239_vm1, %v9216_v12, -inf }
 0xb0d   : > { %v4022_v1 = vpop.xlane.xlu1 %4021 }
 0xb0e   : > { %v4054_v26 = vsub.f32 %v9131_v28, %v4022_v1  ;;  %v6073_v28 = vpop.f32.mrf.mxu1 }
 0xb0f   : > { %v4019_v39 = vpop.xlane.xlu0 %4018  ;;  %v3970_v52 = vadd.f32 %v6073_v28, %v9066_v43 }
 0xb10   : > { %v4077_v57 = vmul.f32 1.442695, %v4054_v26  ;;  %v4053_v23 = vsub.f32 %v9135_v34, %v4019_v39  ;;  %v3964_v53 = vpop.f32.mrf.mxu1  ;;  %v6763_v26 = vld [vmem:[%s7328_s1 + $0x58] sm:$0xff] }
 0xb11   : > { %v4196_v50 = vpop.permute.xlu1 %4195  ;;  %v9222_v39 = vadd.f32 %v6763_v26, %v3960_v41  ;;  %v3965_v0 = vadd.f32 %v3964_v53, %v9072_v7  ;;  %v9883_v26 = vld [vmem:[#allocation58_spill] sm:$0xff] }
 0xb12   : > { %6693 = vpow2.f32 %v4077_v57  ;;  %v4075_v40 = vmul.f32 1.442695, %v4053_v23  ;;  %v6076_v55 = vpop.f32.mrf.mxu1  ;;  %v4026_v57 = vsel %vm1239_vm1, %v9208_v6, -inf  ;;  %v6764_v23 = vld [vmem:[%s7328_s1 + $0x50] sm:$0xff] }
 0xb13   : > { %v4198_v3 = vpop.permute.xlu0 %4197  ;;  %v3980_v43 = vadd.f32 %v6076_v55, %v9125_v45  ;;  %v6766_v45 = vld [vmem:[%s7328_s1 + $0x70] sm:$0xff] }
 0xb14   : > { %6695 = vpow2.f32 %v4075_v40  ;;  %6077 = vmatprep.subr.mxu0 %v4198_v3  ;;  %v3974_v40 = vpop.f32.mrf.mxu1 }
 0xb15   : > { %6078 = vmatpush3.msra.mxu0 %v4198_v3  ;;  %v4192_v49 = vpop.permute.xlu1 %4191  ;;  %v9877_v3 = vld [vmem:[#allocation38_spill] sm:$0xff]  ;;  %v3975_v7 = vadd.f32 %v3974_v40, %v9127_v14 }
 0xb16   : > { %6079 = vmatprep.subr.mxu0 %v4196_v50  ;;  %v9234_v31 = vadd.f32 %v9877_v3, %v3970_v52  ;;  %v9884_v52 = vld [vmem:[#allocation54_spill] sm:$0xff] }
 0xb17   : > { %6080 = vmatpush3.msra.mxu0 %v4196_v50  ;;  %v4194_v47 = vpop.permute.xlu0 %4193  ;;  %v9228_v50 = vadd.f32 %v6764_v23, %v3955_v19  ;;  %v9251_v53 = vadd.f32 %v6766_v45, %v3975_v7  ;;  %v9881_v19 = vld [vmem:[#allocation56_spill] sm:$0xff]  ;;  %v9886_v23 = vld [vmem:[#allocation51_spill] sm:$0xff] }
 0xb18   : > { %6081 = vmatprep.subr.mxu0 %v4194_v47  ;;  %v4038_v25 = vsel %vm1239_vm1, %v9234_v31, -inf }
 0xb19   : > { %6082 = vmatpush3.msra.mxu0 %v4194_v47  ;;  %v4188_v2 = vpop.permute.xlu1 %4187  ;;  %v6765_v47 = vld [vmem:[%s7328_s1 + $0x60] sm:$0xff]  ;;  %v4041_v41 = vsel %vm1239_vm1, %v9251_v53, -inf  ;;  %s4939_s1 = sshll.u32 %s9491_s4, 4  ;;  %s9515_s1 = int_to_ptr.vmem [resolvable:$true] %s4939_s1 }
 0xb1a   : > { %6083 = vmatprep.subr.mxu0 %v4192_v49  ;;  %v9240_v28 = vadd.f32 %v6765_v47, %v3965_v0  ;;  %p6908_p5 = scmp.lt.s32.totalorder %s9515_s1, %s6906_s7 }
 0xb1b   : > { %6084 = vmatpush3.msra.mxu0 %v4192_v49  ;;  %v4190_v34 = vpop.permute.xlu0 %4189  ;;  %v4032_v49 = vsel %vm1239_vm1, %v9222_v39, -inf }
 0xb1c   : > { %6085 = vmatprep.subr.mxu0 %v4190_v34  ;;  %v4035_v62 = vsel %vm1239_vm1, %v9240_v28, -inf }
 0xb1d   : > { %6086 = vmatpush3.msra.mxu0 %v4190_v34  ;;  %v4029_v34 = vsel %vm1239_vm1, %v9228_v50, -inf }
 0xb1e   : > { %6087 = vmatprep.subr.mxu0 %v4188_v2 }
 0xb1f   : > { %v9205_v36 = vpop.eup %6693  ;;  %6088 = vmatpush3.msra.mxu0 %v4188_v2  ;;  %v9246_v2 = vadd.f32 %v9878_v30, %v3980_v43 }
 0xb20   : > { %v4116_v42 = vsel %vm1239_vm1, %v9205_v36, 0.0 }
 0xb21   : > { %v9213_v24 = vpop.eup %6695  ;;  %4117 = vadd.xlane.f32.xlu1 %v4116_v42  ;;  %v4044_v14 = vsel %vm1239_vm1, %v9246_v2, -inf  ;;  %v9879_v42 = vld [vmem:[#allocation57_spill] sm:$0xff] }
 0xb22   : > { %v4113_v1 = vsel %vm1239_vm1, %v9213_v24, 0.0 }
 0xb23   : > { %4114 = vadd.xlane.f32.xlu0 %v4113_v1  ;;  %v9882_v1 = vld [vmem:[#allocation52_spill] sm:$0xff] }
 0xb25   : > { %4027 = vmax.xlane.f32.xlu1 %v4026_v57  ;;  %v9885_v57 = vld [vmem:[#allocation48_spill] sm:$0xff] }
 0xb27   : > { %4024 = vmax.xlane.f32.xlu0 %v4023_v56 }
 0xb29   : > { %4033 = vmax.xlane.f32.xlu1 %v4032_v49 }
 0xb2b   : > { %4030 = vmax.xlane.f32.xlu0 %v4029_v34 }
 0xb2d   : > { %4039 = vmax.xlane.f32.xlu1 %v4038_v25 }
 0xb2f   : > { %4036 = vmax.xlane.f32.xlu0 %v4035_v62 }
 0xb31   : > { %4045 = vmax.xlane.f32.xlu1 %v4044_v14 }
 0xb33   : > { %4042 = vmax.xlane.f32.xlu0 %v4041_v41 }
 0xb42   : > { %4183 = vrot.lane.b32.xlu1 %v9879_v42, %s7047_s8 }
 0xb46   : > { %4356 = vrot.lane.b32.xlu1 %v9880_v37, %s7047_s8 }
 0xb49   : > { %4185 = vrot.lane.b32.xlu0 %v9881_v19, %s7047_s8 }
 0xb4a   : > { %4354 = vrot.lane.b32.xlu1 %v9882_v1, %s7047_s8  ;;  %v4100_v40 = vpop.xlane.xlu1 %4099 }
 0xb4c   : > { %v4097_v55 = vpop.xlane.xlu0 %4096 }
 0xb4d   : > { %6697 = vrcp.f32 %v4097_v55  ;;  %4358 = vrot.lane.b32.xlu0 %v9883_v26, %s7047_s8 }
 0xb4e   : > { %4352 = vrot.lane.b32.xlu1 %v9884_v52, %s7047_s8  ;;  %v4106_v3 = vpop.xlane.xlu1 %4105  ;;  %6699 = vrcp.f32 %v4100_v40 }
 0xb50   : > { %v4103_v43 = vpop.xlane.xlu0 %4102 }
 0xb51   : > { %4350 = vrot.lane.b32.xlu0 %v9885_v57, %s7047_s8 }
 0xb52   : > { %4348 = vrot.lane.b32.xlu1 %v9886_v23, %s7047_s8  ;;  %v4112_v49 = vpop.xlane.xlu1 %4111 }
 0xb54   : > { %v4109_v47 = vpop.xlane.xlu0 %4108 }
 0xb5a   : > { %v6698_v0 = vpop.eup %6697 }
 0xb5b   : > { %v4159_v56 = vmul.f32 %v6698_v0, %v9179_v35 }
 0xb5d   : > { %6093 = vmatprep.mubr.msk.f32.mxu0 %vm1239_vm1, %v4159_v56 }
 0xbaa   : > { %v4118_v7 = vpop.xlane.xlu1 %4117 }
 0xbac   : > { %v4115_v34 = vpop.xlane.xlu0 %4114 }
 0xbae   : > { %v4028_v30 = vpop.xlane.xlu1 %4027 }
 0xbaf   : > { %v4056_v25 = vsub.f32 %v9208_v6, %v4028_v30 }
 0xbb0   : > { %v4025_v45 = vpop.xlane.xlu0 %4024 }
 0xbb1   : > { %v4081_v62 = vmul.f32 1.442695, %v4056_v25  ;;  %v4055_v14 = vsub.f32 %v9216_v12, %v4025_v45 }
 0xbb2   : > { %v4034_v41 = vpop.xlane.xlu1 %4033 }
 0xbb3   : > { %6701 = vpow2.f32 %v4081_v62  ;;  %v4079_v35 = vmul.f32 1.442695, %v4055_v14  ;;  %v4058_v42 = vsub.f32 %v9222_v39, %v4034_v41 }
 0xbb4   : > { %6703 = vrcp.f32 %v4103_v43  ;;  %v4031_v37 = vpop.xlane.xlu0 %4030 }
 0xbb5   : > { %6705 = vpow2.f32 %v4079_v35  ;;  %v4085_v19 = vmul.f32 1.442695, %v4058_v42  ;;  %v4057_v1 = vsub.f32 %v9228_v50, %v4031_v37 }
 0xbb6   : > { %6707 = vrcp.f32 %v4106_v3  ;;  %v4040_v55 = vpop.xlane.xlu1 %4039  ;;  %v6700_v3 = vpop.eup %6699 }
 0xbb7   : > { %6709 = vpow2.f32 %v4085_v19  ;;  %v4083_v6 = vmul.f32 1.442695, %v4057_v1  ;;  %v4060_v26 = vsub.f32 %v9234_v31, %v4040_v55 }
 0xbb8   : > { %6711 = vrcp.f32 %v4109_v47  ;;  %v4037_v12 = vpop.xlane.xlu0 %4036 }
 0xbb9   : > { %6713 = vpow2.f32 %v4083_v6  ;;  %v4089_v52 = vmul.f32 1.442695, %v4060_v26  ;;  %v4059_v57 = vsub.f32 %v9240_v28, %v4037_v12 }
 0xbba   : > { %6715 = vrcp.f32 %v4112_v49  ;;  %v4046_v39 = vpop.xlane.xlu1 %4045 }
 0xbbb   : > { %6717 = vpow2.f32 %v4089_v52  ;;  %v4087_v23 = vmul.f32 1.442695, %v4059_v57  ;;  %v4062_v0 = vsub.f32 %v9246_v2, %v4046_v39 }
 0xbbc   : > { %6719 = vrcp.f32 %v4115_v34  ;;  %v4043_v50 = vpop.xlane.xlu0 %4042 }
 0xbbd   : > { %6721 = vpow2.f32 %v4087_v23  ;;  %v4093_v56 = vmul.f32 1.442695, %v4062_v0  ;;  %v4061_v40 = vsub.f32 %v9251_v53, %v4043_v50 }
 0xbbe   : > { %6723 = vrcp.f32 %v4118_v7  ;;  %v4184_v31 = vpop.permute.xlu1 %4183  ;;  %v4160_v7 = vmul.f32 %v6700_v3, %v9177_v51  ;;  %v9888_v3 = vld [vmem:[#allocation45_spill] sm:$0xff] }
 0xbbf   : > { %6725 = vpow2.f32 %v4093_v56  ;;  %v4091_v43 = vmul.f32 1.442695, %v4061_v40 }
 0xbc0   : > { %v9285_v47 = vpop.eup %6701  ;;  %v4186_v28 = vpop.permute.xlu0 %4185 }
 0xbc1   : > { %v6704_v49 = vpop.eup %6703  ;;  %6727 = vpow2.f32 %v4091_v43  ;;  %6089 = vmatprep.subr.mxu0 %v4186_v28  ;;  %v4122_v2 = vsel %vm1239_vm1, %v9285_v47, 0.0  ;;  %v9889_v43 = vld [vmem:[#allocation49_spill] sm:$0xff] }
 0xbc2   : > { %v9289_v34 = vpop.eup %6705  ;;  %v4357_v30 = vpop.permute.xlu1 %4356  ;;  %4123 = vadd.xlane.f32.xlu0 %v4122_v2  ;;  %6090 = vmatpush3.msra.mxu0 %v4186_v28  ;;  %v4161_v14 = vmul.f32 %v6704_v49, %v9187_v44  ;;  %v9890_v28 = vld [vmem:[#allocation77_spill] sm:$0xff]  ;;  %v9892_v49 = vld [vmem:[#allocation78_spill] sm:$0xff]  ;;  %v9893_v2 = vld [vmem:[#allocation79_spill] sm:$0xff] }
 0xbc3   : > { %v6708_v53 = vpop.eup %6707  ;;  %6091 = vmatprep.subr.mxu0 %v4184_v31  ;;  %v4119_v25 = vsel %vm1239_vm1, %v9289_v34, 0.0 }
 0xbc4   : > { %v9294_v45 = vpop.eup %6709  ;;  %4120 = vadd.xlane.f32.xlu1 %v4119_v25  ;;  %6092 = vmatpush3.msra.mxu0 %v4184_v31  ;;  %v4359_v62 = vpop.permute.xlu0 %4358  ;;  %v4162_v44 = vmul.f32 %v6708_v53, %v9183_v10  ;;  %v4753_v53 = vld [vmem:[#allocation8 + $0x78] sm:$0xff]  ;;  %v4751_v25 = vld [vmem:[#allocation8 + $0x68] sm:$0xff] }
 0xbc5   : > { %v6712_v41 = vpop.eup %6711  ;;  %6094 = vmatmul.mubr.msk.f32.vlgmr.msra.gmra.mxu0 %vm1239_vm1, %v4160_v7  ;;  %6105 = vmatprep.subr.mxu1 %v4359_v62  ;;  %v4128_v35 = vsel %vm1239_vm1, %v9294_v45, 0.0  ;;  %v4752_v7 = vld [vmem:[#allocation8 + $0x70] sm:$0xff] }
 0xbc6   : > { %v9300_v42 = vpop.eup %6713  ;;  %v4355_v51 = vpop.permute.xlu1 %4354  ;;  %4129 = vadd.xlane.f32.xlu0 %v4128_v35  ;;  %6096 = vmatprep.mubr.msk.f32.mxu0 %vm1239_vm1, %v4161_v14  ;;  %v4163_v26 = vmul.f32 %v6712_v41, %v9195_v18  ;;  %v4746_v14 = vld [vmem:[#allocation8 + $0x40] sm:$0xff]  ;;  %v4745_v41 = vld [vmem:[#allocation8 + $0x38] sm:$0xff]  ;;  %v4744_v35 = vld [vmem:[#allocation8 + $0x30] sm:$0xff] }
 0xbc7   : > { %v6716_v37 = vpop.eup %6715  ;;  %6106 = vmatpush3.msra.mxu1 %v4359_v62  ;;  %v4125_v19 = vsel %vm1239_vm1, %v9300_v42, 0.0  ;;  %6133 = vmatprep.subr.mxu0 %v4753_v53  ;;  %v4750_v62 = vld [vmem:[#allocation8 + $0x60] sm:$0xff] }
 0xbc8   : > { %v9306_v1 = vpop.eup %6717  ;;  %6107 = vmatprep.subr.mxu1 %v4357_v30  ;;  %4126 = vadd.xlane.f32.xlu1 %v4125_v19  ;;  %v4164_v39 = vmul.f32 %v6716_v37, %v9191_v38  ;;  %v4351_v0 = vpop.permute.xlu0 %4350  ;;  %v4742_v37 = vld [vmem:[#allocation8 + $0x20] sm:$0xff]  ;;  %v4741_v19 = vld [vmem:[#allocation8 + $0x18] sm:$0xff] }
 0xbc9   : > { %v6720_v55 = vpop.eup %6719  ;;  %6108 = vmatpush3.msra.mxu1 %v4357_v30  ;;  %6097 = vmatmul.mubr.msk.f32.gmra.mxu0 %vm1239_vm1, %v4162_v44  ;;  %v4134_v6 = vsel %vm1239_vm1, %v9306_v1, 0.0  ;;  %v9894_v30 = vpack.i.bf16 %v9892_v49, %v9893_v2  ;;  %v4740_v44 = vld [vmem:[#allocation8 + $0x10] sm:$0xff] }
 0xbca   : > { %v9312_v12 = vpop.eup %6721  ;;  %6109 = vmatprep.subr.mxu1 %v4355_v51  ;;  %v4353_v52 = vpop.permute.xlu1 %4352  ;;  %4135 = vadd.xlane.f32.xlu0 %v4134_v6  ;;  %v4165_v50 = vmul.f32 %v6720_v55, %v9213_v24  ;;  %v9887_v24 = vld [vmem:[#allocation47_spill] sm:$0xff] }
 0xbcb   : > { %v6724_v57 = vpop.eup %6723  ;;  %6099 = vmatprep.mubr.msk.f32.mxu0 %vm1239_vm1, %v4163_v26  ;;  %6110 = vmatpush3.msra.mxu1 %v4355_v51  ;;  %v4131_v10 = vsel %vm1239_vm1, %v9312_v12, 0.0  ;;  %v4743_v51 = vld [vmem:[#allocation8 + $0x28] sm:$0xff] }
 0xbcc   : > { %v9318_v23 = vpop.eup %6725  ;;  %6111 = vmatprep.subr.mxu1 %v4353_v52  ;;  %4132 = vadd.xlane.f32.xlu1 %v4131_v10  ;;  %v4166_v31 = vmul.f32 %v6724_v57, %v9205_v36  ;;  %v9891_v36 = vpack.i.bf16 %v9889_v43, %v9890_v28 }
 0xbcd   : > { %6112 = vmatpush3.msra.mxu1 %v4353_v52  ;;  %6100 = vmatmul.mubr.msk.f32.gmra.mxu0 %vm1239_vm1, %v4164_v39  ;;  %v4140_v18 = vsel %vm1239_vm1, %v9318_v23, 0.0 }
 0xbce   : > { %v9324_v56 = vpop.eup %6727  ;;  %6113 = vmatprep.subr.mxu1 %v4351_v0  ;;  %v4349_v40 = vpop.permute.xlu1 %4348  ;;  %4141 = vadd.xlane.f32.xlu0 %v4140_v18 }
 0xbcf   : > { %6102 = vmatprep.mubr.msk.f32.mxu0 %vm1239_vm1, %v4165_v50  ;;  %6114 = vmatpush3.msra.mxu1 %v4351_v0  ;;  %v4137_v38 = vsel %vm1239_vm1, %v9324_v56, 0.0 }
 0xbd0   : > { %6115 = vmatprep.subr.mxu1 %v4349_v40  ;;  %4138 = vadd.xlane.f32.xlu1 %v4137_v38 }
 0xbd1   : > { %6116 = vmatpush3.msra.mxu1 %v4349_v40  ;;  %6103 = vmatmul.mubr.msk.f32.gmra.mxu0 %vm1239_vm1, %v4166_v31 }
 0xbd2   : > { %6134 = vmatpush3.msra.mxu0 %v4753_v53 }
 0xbd3   : > { %6135 = vmatprep.subr.mxu0 %v4752_v7 }
 0xbd4   : > { %6136 = vmatpush3.msra.mxu0 %v4752_v7 }
 0xbd5   : > { %6137 = vmatprep.subr.mxu0 %v4751_v25 }
 0xbd6   : > { %6138 = vmatpush3.msra.mxu0 %v4751_v25  ;;  %v4738_v25 = vld [vmem:[#allocation8] sm:$0xff] }
 0xbd7   : > { %6139 = vmatprep.subr.mxu0 %v4750_v62 }
 0xbd8   : > { %6140 = vmatpush3.msra.mxu0 %v4750_v62 }
 0xbd9   : > { %6141 = vmatprep.subr.mxu0 %v4749_v11 }
 0xbda   : > { %6142 = vmatpush3.msra.mxu0 %v4749_v11 }
 0xbdb   : > { %6143 = vmatprep.subr.mxu0 %v4748_v17 }
 0xbdc   : > { %6144 = vmatpush3.msra.mxu0 %v4748_v17 }
 0xbe1   : > { %4344 = vrot.lane.b32.xlu1 %v9887_v24, %s7047_s8 }
 0xbe4   : > { %4346 = vrot.lane.b32.xlu0 %v9888_v3, %s7047_s8 }
 0xbe5   : > { %6375 = vrot.lane.b32.xlu1 %v6374_v20, %s7046_s13  ;;  %v4747_v20 = vld [vmem:[#allocation8 + $0x48] sm:$0xff] }
 0xbe6   : > { %6145 = vmatprep.subr.mxu0 %v4747_v20 }
 0xbe7   : > { %6146 = vmatpush3.msra.mxu0 %v4747_v20 }
 0xbe8   : > { %6370 = vrot.lane.b32.xlu0 %v9891_v36, %s7047_s8  ;;  %6147 = vmatprep.subr.mxu0 %v4746_v14 }
 0xbe9   : > { %6385 = vrot.lane.b32.xlu1 %v9894_v30, %s7047_s8  ;;  %6148 = vmatpush3.msra.mxu0 %v4746_v14 }
 0xbea   : > { %6149 = vmatprep.subr.mxu0 %v4745_v41 }
 0xbeb   : > { %6150 = vmatpush3.msra.mxu0 %v4745_v41  ;;  %v9895_v41 = vld [vmem:[#allocation80_spill] sm:$0xff] }
 0xbec   : > { %6151 = vmatprep.subr.mxu0 %v4744_v35 }
 0xbed   : > { %6152 = vmatpush3.msra.mxu0 %v4744_v35  ;;  %v9896_v35 = vld [vmem:[#allocation81_spill] sm:$0xff] }
 0xbee   : > { %6153 = vmatprep.subr.mxu0 %v4743_v51 }
 0xbef   : > { %6154 = vmatpush3.msra.mxu0 %v4743_v51  ;;  %v9897_v51 = vpack.i.bf16 %v9895_v41, %v9896_v35 }
 0xbf0   : > { %6155 = vmatprep.subr.mxu0 %v4742_v37 }
 0xbf1   : > { %6156 = vmatpush3.msra.mxu0 %v4742_v37 }
 0xbf2   : > { %6157 = vmatprep.subr.mxu0 %v4741_v19 }
 0xbf3   : > { %6158 = vmatpush3.msra.mxu0 %v4741_v19 }
 0xbf4   : > { %6159 = vmatprep.subr.mxu0 %v4740_v44 }
 0xbf5   : > { %6160 = vmatpush3.msra.mxu0 %v4740_v44  ;;  %v9898_v44 = vld [vmem:[#allocation82_spill] sm:$0xff] }
 0xbf6   : > { %v9900_v63 = vpack.i.bf16 %v9898_v44, %v9899_v22 }
 0xc4b   : > { %v4124_v55 = vpop.xlane.xlu0 %4123 }
 0xc4c   : > { %6729 = vrcp.f32 %v4124_v55 }
 0xc4d   : > { %v4121_v6 = vpop.xlane.xlu1 %4120 }
 0xc4e   : > { %6731 = vrcp.f32 %v4121_v6 }
 0xc4f   : > { %v4130_v26 = vpop.xlane.xlu0 %4129 }
 0xc50   : > { %6733 = vrcp.f32 %v4130_v26 }
 0xc51   : > { %v4127_v52 = vpop.xlane.xlu1 %4126 }
 0xc52   : > { %6735 = vrcp.f32 %v4127_v52  ;;  %v9907_v52 = vld [vmem:[#allocation59_spill] sm:$0xff] }
 0xc53   : > { %v4136_v57 = vpop.xlane.xlu0 %4135 }
 0xc54   : > { %6737 = vrcp.f32 %v4136_v57 }
 0xc55   : > { %v4133_v10 = vpop.xlane.xlu1 %4132 }
 0xc56   : > { %6739 = vrcp.f32 %v4133_v10 }
 0xc57   : > { %v4142_v39 = vpop.xlane.xlu0 %4141 }
 0xc58   : > { %6741 = vrcp.f32 %v4142_v39 }
 0xc59   : > { %v4139_v0 = vpop.xlane.xlu1 %4138  ;;  %v6730_v18 = vpop.eup %6729 }
 0xc5a   : > { %6743 = vrcp.f32 %v4139_v0  ;;  %v4168_v3 = vmul.f32 %v6730_v18, %v9285_v47 }
 0xc5b   : > { %v6732_v50 = vpop.eup %6731  ;;  %v4347_v40 = vpop.permute.xlu0 %4346 }
 0xc5c   : > { %6117 = vmatprep.subr.mxu1 %v4347_v40  ;;  %v4167_v38 = vmul.f32 %v6732_v50, %v9289_v34 }
 0xc5d   : > { %v4345_v31 = vpop.permute.xlu1 %4344  ;;  %6118 = vmatpush3.msra.mxu1 %v4347_v40  ;;  %v6734_v24 = vpop.eup %6733 }
 0xc5e   : > { %6119 = vmatprep.subr.mxu1 %v4345_v31  ;;  %6121 = vmatprep.mubr.msk.f32.mxu1 %vm1239_vm1, %v4167_v38  ;;  %v4170_v49 = vmul.f32 %v6734_v24, %v9294_v45  ;;  %v4739_v45 = vld [vmem:[#allocation8 + $0x8] sm:$0xff] }
 0xc5f   : > { %v6736_v43 = vpop.eup %6735  ;;  %6120 = vmatpush3.msra.mxu1 %v4345_v31  ;;  %6161 = vmatprep.subr.mxu0 %v4739_v45  ;;  %v6371_v55 = vpop.permute.xlu0 %6370 }
 0xc60   : > { %6122 = vmatmul.mubr.msk.f32.vlgmr.msra.gmra.mxu1 %vm1239_vm1, %v4168_v3  ;;  %v4169_v28 = vmul.f32 %v6736_v43, %v9300_v42  ;;  %6162 = vmatpush3.msra.mxu0 %v4739_v45  ;;  %v6373_v26 = vunpack.i.h.bf16 %v6371_v55  ;;  %v6372_v58 = vunpack.i.l.bf16 %v6371_v55 }
 0xc61   : > { %v6738_v36 = vpop.eup %6737  ;;  %6163 = vmatprep.subr.mxu0 %v4738_v25  ;;  %v6376_v6 = vpop.permute.xlu1 %6375 }
 0xc62   : > { %6124 = vmatprep.mubr.msk.f32.mxu1 %vm1239_vm1, %v4169_v28  ;;  %v4172_v30 = vmul.f32 %v6738_v36, %v9306_v1  ;;  %6164 = vmatpush3.msra.mxu0 %v4738_v25  ;;  %v6378_v60 = vunpack.i.h.bf16 %v6376_v6  ;;  %v4690_v5 = vsel %vm916_vm0, %v9907_v52, %v6373_v26  ;;  %v9909_v36 = vld [vmem:[#allocation63_spill] sm:$0xff] }
 0xc63   : > { %v6740_v34 = vpop.eup %6739 }
 0xc64   : > { %6125 = vmatmul.mubr.msk.f32.gmra.mxu1 %vm1239_vm1, %v4170_v49  ;;  %v4171_v2 = vmul.f32 %v6740_v34, %v9312_v12  ;;  %v4706_v9 = vsel %vm1239_vm1, %v4690_v5, %v6378_v60  ;;  %v9910_v34 = vld [vmem:[#allocation61_spill] sm:$0xff] }
 0xc65   : > { %v6742_v47 = vpop.eup %6741  ;;  %v6386_v13 = vpop.permute.xlu1 %6385 }
 0xc66   : > { %6127 = vmatprep.mubr.msk.f32.mxu1 %vm1239_vm1, %v4171_v2  ;;  %v4174_v7 = vmul.f32 %v6742_v47, %v9318_v23  ;;  %v6388_v61 = vunpack.i.h.bf16 %v6386_v13 }
 0xc67   : > { %v6744_v53 = vpop.eup %6743 }
 0xc68   : > { %6128 = vmatmul.mubr.msk.f32.gmra.mxu1 %vm1239_vm1, %v4172_v30  ;;  %v4173_v42 = vmul.f32 %v6744_v53, %v9324_v56  ;;  %v4692_v2 = vsel %vm916_vm0, %v9910_v34, %v6388_v61  ;;  %v9916_v61 = vld [vmem:[#allocation89_spill] sm:$0xff] }
 0xc6a   : > { %6130 = vmatprep.mubr.msk.f32.mxu1 %vm1239_vm1, %v4173_v42 }
 0xc6c   : > { %6131 = vmatmul.mubr.msk.f32.gmra.mxu1 %vm1239_vm1, %v4174_v7 }
 0xc85   : > { %v6095_v12 = vpop.f32.mrf.mxu0 }
 0xc87   : > { %v4297_v62 = vpop.f32.mrf.mxu0 }
 0xc88   : > { %v6379_v1 = vpack.i.bf16 %v6095_v12, %v4297_v62 }
 0xc89   : > { %v6098_v11 = vpop.f32.mrf.mxu0 }
 0xc8a   : > { %6380 = vrot.lane.b32.xlu0 %v6379_v1, %s7045_s23 }
 0xc8b   : > { %v4307_v17 = vpop.f32.mrf.mxu0 }
 0xc8c   : > { %v6394_v56 = vpack.i.bf16 %v6098_v11, %v4307_v17  ;;  %v9911_v11 = vld [vmem:[#allocation44_spill] sm:$0xff] }
 0xc8d   : > { %v6101_v20 = vpop.f32.mrf.mxu0 }
 0xc8e   : > { %6390 = vrot.lane.b32.xlu0 %v6389_v27, %s7046_s13  ;;  %6395 = vrot.lane.b32.xlu1 %v6394_v56, %s7045_s23  ;;  %v9912_v56 = vld [vmem:[#allocation64_spill] sm:$0xff] }
 0xc8f   : > { %v4317_v23 = vpop.f32.mrf.mxu0 }
 0xc90   : > { %v6409_v37 = vpack.i.bf16 %v6101_v20, %v4317_v23 }
 0xc91   : > { %v6104_v14 = vpop.f32.mrf.mxu0 }
 0xc92   : > { %6400 = vrot.lane.b32.xlu0 %v9897_v51, %s7047_s8  ;;  %6405 = vrot.lane.b32.xlu1 %v6404_v21, %s7046_s13  ;;  %v9903_v21 = vpack.i.bf16 %v9901_v15, %v9902_v54 }
 0xc93   : > { %v4327_v19 = vpop.f32.mrf.mxu0 }
 0xc94   : > { %v6424_v27 = vpack.i.bf16 %v6104_v14, %v4327_v19 }
 0xc96   : > { %6415 = vrot.lane.b32.xlu1 %v9900_v63, %s7047_s8  ;;  %6410 = vrot.lane.b32.xlu0 %v6409_v37, %s7045_s23 }
 0xc9a   : > { %6420 = vrot.lane.b32.xlu0 %v6419_v46, %s7046_s13  ;;  %6425 = vrot.lane.b32.xlu1 %v6424_v27, %s7045_s23  ;;  %v9906_v46 = vpack.i.bf16 %v9904_v8, %v9905_v16 }
 0xc9e   : > { %6430 = vrot.lane.b32.xlu0 %v9903_v21, %s7047_s8  ;;  %6435 = vrot.lane.b32.xlu1 %v6434_v32, %s7046_s13  ;;  %v6377_v32 = vunpack.i.l.bf16 %v6376_v6  ;;  %v9914_v6 = vld [vmem:[#allocation50_spill] sm:$0xff] }
 0xca2   : > { %6445 = vrot.lane.b32.xlu0 %v6444_v29, %s7046_s13  ;;  %6440 = vrot.lane.b32.xlu1 %v9906_v46, %s7047_s8  ;;  %v9908_v29 = vld [vmem:[#allocation60_spill] sm:$0xff]  ;;  %v9913_v46 = vld [vmem:[#allocation42_spill] sm:$0xff] }
 0xca3   : > { %v4689_v57 = vsel %vm916_vm0, %v9908_v29, %v6372_v58 }
 0xca4   : > { %v4705_v18 = vsel %vm1239_vm1, %v4689_v57, %v6377_v32 }
 0xca6   : > { %6460 = vrot.lane.b32.xlu1 %v6459_v59, %s7046_s13  ;;  %v6387_v59 = vunpack.i.l.bf16 %v6386_v13 }
 0xca8   : > { %v4691_v49 = vsel %vm916_vm0, %v9909_v36, %v6387_v59 }
 0xcfc   : > { %v6381_v10 = vpop.permute.xlu0 %6380 }
 0xcfd   : > { %v6383_v39 = vunpack.i.h.bf16 %v6381_v10  ;;  %v6382_v0 = vunpack.i.l.bf16 %v6381_v10 }
 0xcff   : > { %v4722_v50 = vsel %vm4721_vm2, %v4705_v18, %v6382_v0  ;;  %v4723_v40 = vsel %vm4721_vm2, %v4706_v9, %v6383_v39  ;;  %v9915_v9 = vld [vmem:[#allocation88_spill] sm:$0xff] }
 0xd00   : > { %v6396_v38 = vpop.permute.xlu1 %6395  ;;  %v6391_v31 = vpop.permute.xlu0 %6390  ;;  %6165 = vmatprep.mubr.f32.mxu0 %v4722_v50  ;;  %v9917_v59 = vpack.i.bf16 %v9915_v9, %v9916_v61 }
 0xd01   : > { %v6398_v24 = vunpack.i.h.bf16 %v6396_v38  ;;  %v6397_v3 = vunpack.i.l.bf16 %v6396_v38  ;;  %v6393_v43 = vunpack.i.h.bf16 %v6391_v31  ;;  %v6392_v28 = vunpack.i.l.bf16 %v6391_v31  ;;  %6166 = vmatmul.mubr.f32.vlgmr.msra.gmra.mxu0 %v4723_v40  ;;  %v9918_v38 = vld [vmem:[#allocation90_spill] sm:$0xff]  ;;  %v9919_v31 = vld [vmem:[#allocation91_spill] sm:$0xff] }
 0xd03   : > { %v4707_v47 = vsel %vm1239_vm1, %v4691_v49, %v6392_v28  ;;  %v4708_v30 = vsel %vm1239_vm1, %v4692_v2, %v6393_v43 }
 0xd04   : > { %v6406_v53 = vpop.permute.xlu1 %6405  ;;  %v6401_v42 = vpop.permute.xlu0 %6400  ;;  %v4724_v7 = vsel %vm4721_vm2, %v4707_v47, %v6397_v3  ;;  %v4725_v45 = vsel %vm4721_vm2, %v4708_v30, %v6398_v24  ;;  %v9920_v24 = vpack.i.bf16 %v9918_v38, %v9919_v31  ;;  %v9927_v31 = vld [vmem:[#allocation72_spill] sm:$0xff] }
 0xd05   : > { %v6403_v25 = vunpack.i.h.bf16 %v6401_v42  ;;  %v6402_v12 = vunpack.i.l.bf16 %v6401_v42  ;;  %6168 = vmatprep.mubr.f32.mxu0 %v4724_v7  ;;  %v6408_v62 = vunpack.i.h.bf16 %v6406_v53  ;;  %v6407_v1 = vunpack.i.l.bf16 %v6406_v53 }
 0xd06   : > { %6169 = vmatmul.mubr.f32.gmra.mxu0 %v4725_v45  ;;  %v9921_v45 = vld [vmem:[#allocation36_spill] sm:$0xff] }
 0xd07   : > { %v4693_v17 = vsel %vm916_vm0, %v9911_v11, %v6402_v12  ;;  %v4694_v20 = vsel %vm916_vm0, %v9912_v56, %v6403_v25  ;;  %v9922_v12 = vld [vmem:[#allocation55_spill] sm:$0xff] }
 0xd08   : > { %v6416_v23 = vpop.permute.xlu1 %6415  ;;  %v6411_v14 = vpop.permute.xlu0 %6410  ;;  %v4709_v19 = vsel %vm1239_vm1, %v4693_v17, %v6407_v1  ;;  %v4710_v44 = vsel %vm1239_vm1, %v4694_v20, %v6408_v62 }
 0xd09   : > { %v6413_v41 = vunpack.i.h.bf16 %v6411_v14  ;;  %v6412_v35 = vunpack.i.l.bf16 %v6411_v14  ;;  %v6418_v51 = vunpack.i.h.bf16 %v6416_v23  ;;  %v6417_v37 = vunpack.i.l.bf16 %v6416_v23 }
 0xd0b   : > { %v4726_v22 = vsel %vm4721_vm2, %v4709_v19, %v6412_v35  ;;  %v4727_v63 = vsel %vm4721_vm2, %v4710_v44, %v6413_v41  ;;  %v4695_v55 = vsel %vm916_vm0, %v9913_v46, %v6417_v37  ;;  %v4696_v26 = vsel %vm916_vm0, %v9914_v6, %v6418_v51  ;;  %v9923_v41 = vld [vmem:[#allocation68_spill] sm:$0xff]  ;;  %v9924_v51 = vld [vmem:[#allocation67_spill] sm:$0xff]  ;;  %v9925_v46 = vld [vmem:[#allocation70_spill] sm:$0xff] }
 0xd0c   : > { %v6426_v27 = vpop.permute.xlu1 %6425  ;;  %v6421_v15 = vpop.permute.xlu0 %6420  ;;  %6171 = vmatprep.mubr.f32.mxu0 %v4726_v22  ;;  %v9926_v6 = vld [vmem:[#allocation69_spill] sm:$0xff] }
 0xd0d   : > { %v6428_v54 = vunpack.i.h.bf16 %v6426_v27  ;;  %v6427_v21 = vunpack.i.l.bf16 %v6426_v27  ;;  %v6423_v8 = vunpack.i.h.bf16 %v6421_v15  ;;  %v6422_v16 = vunpack.i.l.bf16 %v6421_v15  ;;  %6172 = vmatmul.mubr.f32.gmra.mxu0 %v4727_v63 }
 0xd0f   : > { %v4711_v58 = vsel %vm1239_vm1, %v4695_v55, %v6422_v16  ;;  %v4712_v60 = vsel %vm1239_vm1, %v4696_v26, %v6423_v8 }
 0xd10   : > { %v4728_v32 = vsel %vm4721_vm2, %v4711_v58, %v6427_v21  ;;  %v4729_v52 = vsel %vm4721_vm2, %v4712_v60, %v6428_v54  ;;  %v6436_v28 = vpop.permute.xlu1 %6435  ;;  %v6431_v36 = vpop.permute.xlu0 %6430 }
 0xd11   : > { %6174 = vmatprep.mubr.f32.mxu0 %v4728_v32  ;;  %v6433_v34 = vunpack.i.h.bf16 %v6431_v36  ;;  %v6432_v2 = vunpack.i.l.bf16 %v6431_v36  ;;  %v6438_v30 = vunpack.i.h.bf16 %v6436_v28  ;;  %v6437_v53 = vunpack.i.l.bf16 %v6436_v28 }
 0xd12   : > { %6175 = vmatmul.mubr.f32.gmra.mxu0 %v4729_v52 }
 0xd13   : > { %v4697_v25 = vsel %vm916_vm0, %v9921_v45, %v6432_v2  ;;  %v4698_v62 = vsel %vm916_vm0, %v9922_v12, %v6433_v34  ;;  %v5295_v2 = vld [vmem:[%s9929_s2] ss:$0 sm:$0xff]  ;;  %s6907_s2 = scalar_lea.vmem %s6906_s7, 4096 }
 0xd14   : > { %v6441_v49 = vpop.permute.xlu1 %6440  ;;  %v6446_v47 = vpop.permute.xlu0 %6445  ;;  %v4713_v56 = vsel %vm1239_vm1, %v4697_v25, %v6437_v53  ;;  %v4714_v20 = vsel %vm1239_vm1, %v4698_v62, %v6438_v30 }
 0xd15   : > { %v6443_v42 = vunpack.i.h.bf16 %v6441_v49  ;;  %v6442_v7 = vunpack.i.l.bf16 %v6441_v49  ;;  %v6448_v11 = vunpack.i.h.bf16 %v6446_v47  ;;  %v6447_v17 = vunpack.i.l.bf16 %v6446_v47 }
 0xd17   : > { %v4699_v35 = vsel %vm916_vm0, %v9923_v41, %v6442_v7  ;;  %v4700_v37 = vsel %vm916_vm0, %v9924_v51, %v6443_v42 }
 0xd18   : > { %v6461_v4 = vpop.permute.xlu1 %6460  ;;  %v4715_v54 = vsel %vm1239_vm1, %v4699_v35, %v6447_v17  ;;  %v4716_v21 = vsel %vm1239_vm1, %v4700_v37, %v6448_v11 }
 0xd19   : > { %v6463_v58 = vunpack.i.h.bf16 %v6461_v4  ;;  %v6462_v60 = vunpack.i.l.bf16 %v6461_v4 }
 0xd20   : > { %v6123_v5 = vpop.f32.mrf.mxu1 }
 0xd22   : > { %v4458_v13 = vpop.f32.mrf.mxu1 }
 0xd23   : > { %v6449_v29 = vpack.i.bf16 %v6123_v5, %v4458_v13 }
 0xd24   : > { %v6126_v57 = vpop.f32.mrf.mxu1 }
 0xd25   : > { %6450 = vrot.lane.b32.xlu0 %v6449_v29, %s7045_s23 }
 0xd26   : > { %v4468_v10 = vpop.f32.mrf.mxu1 }
 0xd27   : > { %v6464_v39 = vpack.i.bf16 %v6126_v57, %v4468_v10 }
 0xd28   : > { %v6129_v0 = vpop.f32.mrf.mxu1 }
 0xd29   : > { %6455 = vrot.lane.b32.xlu0 %v9917_v59, %s7047_s8  ;;  %6465 = vrot.lane.b32.xlu1 %v6464_v39, %s7045_s23 }
 0xd2a   : > { %v4478_v18 = vpop.f32.mrf.mxu1 }
 0xd2b   : > { %v6474_v50 = vpack.i.bf16 %v6129_v0, %v4478_v18 }
 0xd2c   : > { %v6132_v40 = vpop.f32.mrf.mxu1 }
 0xd2d   : > { %6470 = vrot.lane.b32.xlu1 %v9920_v24, %s7047_s8  ;;  %6475 = vrot.lane.b32.xlu0 %v6474_v50, %s7045_s23  ;;  %s6901_s8 = scalar_lea.vmem %s9515_s1, 2048 }
 0xd2e   : > { %v4488_v3 = vpop.f32.mrf.mxu1  ;;  %p6902_p4 = scmp.ne.s32.totalorder %s9515_s1, %s6901_s8  ;;  %p6909_p3 = scmp.lt.s32.totalorder %s6907_s2, %s6901_s8 }
 0xd2f   : > { %v6484_v43 = vpack.i.bf16 %v6132_v40, %v4488_v3  ;;  %v9928_v3 = vld [vmem:[#allocation71_spill] sm:$0xff] }
 0xd30   : > { %p6903_p9 = pnand %p6902_p4, %p9934_p12  ;;  %p6910_p8 = por %p6909_p3, %p6908_p5 }
 0xd31   : > { %6480 = vrot.lane.b32.xlu0 %v6479_v33, %s7046_s13  ;;  %6485 = vrot.lane.b32.xlu1 %v6484_v43, %s7045_s23  ;;  %s9513_s23 = scalar_lea.hbm %s9933_s16, %s5308_s9  ;;  %s9521_s13 = scalar_lea.sflag [#allocation5], %s343_s30 }
 0xd32   : > { %p6904_p6 = pneg %p6903_p9 }
 0xd34   : > { %p6911_p13 = pnand %p6910_p8, %p6904_p6 }
 0xd97   : > { %v6451_v48 = vpop.permute.xlu0 %6450 }
 0xd98   : > { %v6453_v33 = vunpack.i.h.bf16 %v6451_v48  ;;  %v6452_v1 = vunpack.i.l.bf16 %v6451_v48 }
 0xd9a   : > { %v4730_v23 = vsel %vm4721_vm2, %v4713_v56, %v6452_v1  ;;  %v4731_v14 = vsel %vm4721_vm2, %v4714_v20, %v6453_v33 }
 0xd9b   : > { %v6466_v19 = vpop.permute.xlu1 %6465  ;;  %v6456_v44 = vpop.permute.xlu0 %6455  ;;  %6177 = vmatprep.mubr.f32.mxu0 %v4730_v23 }
 0xd9c   : > { %v6468_v22 = vunpack.i.h.bf16 %v6466_v19  ;;  %v6467_v63 = vunpack.i.l.bf16 %v6466_v19  ;;  %v6458_v27 = vunpack.i.h.bf16 %v6456_v44  ;;  %v6457_v15 = vunpack.i.l.bf16 %v6456_v44  ;;  %6178 = vmatmul.mubr.f32.gmra.mxu0 %v4731_v14 }
 0xd9e   : > { %v4732_v8 = vsel %vm4721_vm2, %v4715_v54, %v6467_v63  ;;  %v4733_v16 = vsel %vm4721_vm2, %v4716_v21, %v6468_v22  ;;  %v4701_v55 = vsel %vm916_vm0, %v9925_v46, %v6457_v15  ;;  %v4702_v26 = vsel %vm916_vm0, %v9926_v6, %v6458_v27 }
 0xd9f   : > { %v6471_v32 = vpop.permute.xlu1 %6470  ;;  %v6476_v52 = vpop.permute.xlu0 %6475  ;;  %6180 = vmatprep.mubr.f32.mxu0 %v4732_v8  ;;  %v4717_v10 = vsel %vm1239_vm1, %v4701_v55, %v6462_v60  ;;  %v4718_v39 = vsel %vm1239_vm1, %v4702_v26, %v6463_v58 }
 0xda0   : > { %v6478_v5 = vunpack.i.h.bf16 %v6476_v52  ;;  %v6477_v13 = vunpack.i.l.bf16 %v6476_v52  ;;  %6181 = vmatmul.mubr.f32.gmra.mxu0 %v4733_v16  ;;  %v6473_v29 = vunpack.i.h.bf16 %v6471_v32  ;;  %v6472_v57 = vunpack.i.l.bf16 %v6471_v32 }
 0xda2   : > { %v4734_v0 = vsel %vm4721_vm2, %v4717_v10, %v6477_v13  ;;  %v4735_v9 = vsel %vm4721_vm2, %v4718_v39, %v6478_v5  ;;  %v4703_v24 = vsel %vm916_vm0, %v9927_v31, %v6472_v57  ;;  %v4704_v43 = vsel %vm916_vm0, %v9928_v3, %v6473_v29 }
 0xda3   : > { %v6486_v61 = vpop.permute.xlu1 %6485  ;;  %v6481_v59 = vpop.permute.xlu0 %6480  ;;  %6183 = vmatprep.mubr.f32.mxu0 %v4734_v0 }
 0xda4   : > { %v6488_v18 = vunpack.i.h.bf16 %v6486_v61  ;;  %v6487_v50 = vunpack.i.l.bf16 %v6486_v61  ;;  %v6483_v40 = vunpack.i.h.bf16 %v6481_v59  ;;  %v6482_v38 = vunpack.i.l.bf16 %v6481_v59  ;;  %6184 = vmatmul.mubr.f32.gmra.mxu0 %v4735_v9 }
 0xda6   : > { %v4719_v28 = vsel %vm1239_vm1, %v4703_v24, %v6482_v38  ;;  %v4720_v36 = vsel %vm1239_vm1, %v4704_v43, %v6483_v40 }
 0xda7   : > { %v4736_v49 = vsel %vm4721_vm2, %v4719_v28, %v6487_v50  ;;  %v4737_v34 = vsel %vm4721_vm2, %v4720_v36, %v6488_v18 }
 0xda8   : > { %6186 = vmatprep.mubr.f32.mxu0 %v4736_v49 }
 0xda9   : > { %6187 = vmatmul.mubr.f32.gmra.mxu0 %v4737_v34 }
 0xdc1   : > { %v6167_v47 = vpop.f32.mrf.mxu0 }
 0xdc2   : > { %v4833_v30 = vadd.f32 %v6167_v47, %v5295_v2 }
 0xdc3   : > { %v4827_v53 = vpop.f32.mrf.mxu0 }
 0xdc4   : > { %4907 = vst [vmem:[%s9491_s4 + $0x8] sm:$0xff] %v4833_v30  ;;  %v4828_v42 = vadd.f32 %v5295_v2, %v4827_v53 }
 0xdc6   : > { %4906 = vst [vmem:[%s9491_s4] sm:$0xff] %v4828_v42  ;;  %v6170_v7 = vpop.f32.mrf.mxu0 }
 0xdc7   : > { %v4843_v45 = vadd.f32 %v6170_v7, %v5295_v2 }
 0xdc8   : > { %v4837_v25 = vpop.f32.mrf.mxu0 }
 0xdc9   : > { %4909 = vst [vmem:[%s9491_s4 + $0x18] sm:$0xff] %v4843_v45  ;;  %v4838_v12 = vadd.f32 %v5295_v2, %v4837_v25 }
 0xdcb   : > { %4908 = vst [vmem:[%s9491_s4 + $0x10] sm:$0xff] %v4838_v12 }
 0xdcd   : > { %v6173_v62 = vpop.f32.mrf.mxu0 }
 0xdce   : > { %v4853_v4 = vadd.f32 %v6173_v62, %v5295_v2 }
 0xdcf   : > { %v4847_v48 = vpop.f32.mrf.mxu0 }
 0xdd0   : > { %4911 = vst [vmem:[%s9491_s4 + $0x28] sm:$0xff] %v4853_v4  ;;  %v4848_v33 = vadd.f32 %v5295_v2, %v4847_v48 }
 0xdd2   : > { %4910 = vst [vmem:[%s9491_s4 + $0x20] sm:$0xff] %v4848_v33  ;;  %v6176_v1 = vpop.f32.mrf.mxu0 }
 0xdd3   : > { %v4863_v11 = vadd.f32 %v6176_v1, %v5295_v2 }
 0xdd4   : > { %v4857_v17 = vpop.f32.mrf.mxu0 }
 0xdd5   : > { %4913 = vst [vmem:[%s9491_s4 + $0x38] sm:$0xff] %v4863_v11  ;;  %v4858_v56 = vadd.f32 %v5295_v2, %v4857_v17 }
 0xdd7   : > { %4912 = vst [vmem:[%s9491_s4 + $0x30] sm:$0xff] %v4858_v56 }
 0xe5c   : > { %v6179_v20 = vpop.f32.mrf.mxu0 }
 0xe5d   : > { %v4873_v23 = vadd.f32 %v6179_v20, %v5295_v2 }
 0xe5e   : > { %v4867_v14 = vpop.f32.mrf.mxu0 }
 0xe5f   : > { %4915 = vst [vmem:[%s9491_s4 + $0x48] sm:$0xff] %v4873_v23  ;;  %v4868_v41 = vadd.f32 %v5295_v2, %v4867_v14 }
 0xe60   : > { %v6182_v35 = vpop.f32.mrf.mxu0 }
 0xe61   : > { %4914 = vst [vmem:[%s9491_s4 + $0x40] sm:$0xff] %v4868_v41  ;;  %v4883_v51 = vadd.f32 %v6182_v35, %v5295_v2 }
 0xe62   : > { %v4877_v37 = vpop.f32.mrf.mxu0 }
 0xe63   : > { %4917 = vst [vmem:[%s9491_s4 + $0x58] sm:$0xff] %v4883_v51  ;;  %v4878_v19 = vadd.f32 %v5295_v2, %v4877_v37 }
 0xe64   : > { %v6185_v44 = vpop.f32.mrf.mxu0 }
 0xe65   : > { %4916 = vst [vmem:[%s9491_s4 + $0x50] sm:$0xff] %v4878_v19  ;;  %v4893_v22 = vadd.f32 %v6185_v44, %v5295_v2 }
 0xe66   : > { %v4887_v63 = vpop.f32.mrf.mxu0 }
 0xe67   : > { %4919 = vst [vmem:[%s9491_s4 + $0x68] sm:$0xff] %v4893_v22  ;;  %v4888_v27 = vadd.f32 %v5295_v2, %v4887_v63 }
 0xe69   : > { %4918 = vst [vmem:[%s9491_s4 + $0x60] sm:$0xff] %v4888_v27  ;;  %v6188_v15 = vpop.f32.mrf.mxu0 }
 0xe6a   : > { %v4903_v54 = vadd.f32 %v6188_v15, %v5295_v2 }
 0xe6b   : > { %v4897_v21 = vpop.f32.mrf.mxu0 }
 0xe6c   : > { %4921 = vst [vmem:[%s9491_s4 + $0x78] sm:$0xff] %v4903_v54  ;;  %v4898_v8 = vadd.f32 %v5295_v2, %v4897_v21 }
 0xe6e   : > { %4920 = vst [vmem:[%s9491_s4 + $0x70] sm:$0xff] %v4898_v8 }
 0xe6f   : > { %6914 = shalt.err (!%p6911_p13)
}
 0xe70   : > { %s6915_s30 = scalar_lea.hbm %s9513_s23, 2048  ;;  %s6919_s19 = scalar_lea.hbm %s9933_s16, 8192 }
 0xe71   : > { %p6916_p0 = scmp.ne.s32.totalorder %s9513_s23, %s6915_s30  ;;  %p6920_p11 = scmp.lt.s32.totalorder %s9513_s23, %s9933_s16 }
 0xe72   : > { %p6921_p2 = scmp.lt.s32.totalorder %s6919_s19, %s6915_s30 }
 0xe73   : > { %p6917_p10 = pnand %p6916_p0, %p9934_p12 }
 0xe74   : > { %p6922_p1 = por %p6921_p2, %p6920_p11 }
 0xe75   : > { %p6918_p7 = pneg %p6917_p10 }
 0xe77   : > { %p6923_p4 = pnand %p6922_p1, %p6918_p7 }
 0xe79   : > { %6926 = shalt.err (!%p6923_p4)
}
 0xe7a   : > { %s7049_s9 = smov 128   ;;  %s7050_s12 = smov 8  }
 0xe7b   : > { %6237 = dma.vmem_to_hbm [thread:$0]  (%p9934_p12), %s9515_s1, 2048, %s9513_s23, %s9521_s13, %s7049_s9, %s7049_s9, %s7050_s12  }
 0xe7c PF: > { %s9935_s22 = sld [smem:[#allocation18_spill]]  ;;  %p6267_p9 = scmp.ge.s32.totalorder %s7033_s11, 2 }
 0xe7d   : > { %s9936_s8 = sld [smem:[#allocation24_spill]] }
 0xe82   : > { %s4954_s27 = sand.u32 1, %s9935_s22  }
 0xe83   : > { %p9937_p6 = scmp.ne.s32.totalorder %s9936_s8, 0  ;;  %s4955_s7 = scalar_lea.sflag [#allocation5], %s4954_s27 }
 0xe85   : > { %p6257_p5 = pnand %p6267_p9, %p9937_p6 }
 0xe87   : > { %p6258_p3 = pneg %p6257_p5 }
 0xe89   : > { %6988 = dma.done.wait (%p6258_p3), %s4955_s7, 2048  }
 0xe8a   : > { %6990 = vsyncadd (%p6258_p3), %s4955_s7, 4294965248  ;;  %s25_s11 = sadd.s32 1, %s7033_s11   ;;  %s9938_s30 = sld [smem:[#allocation21_spill]] }
 0xe8b   : > { %p22_p8 = scmp.ge.s32.totalorder %s25_s11, 6   ;;  %s9939_s9 = sld [smem:[#allocation25_spill]] }
 0xe8c   : > { %s9940_s24 = smov %s6997_s25  ;;  %s9941_s25 = smov %s7001_s26 }
 0xe8d   : > { %s9942_s26 = smov %s7281_s20  ;;  %s9943_s27 = smov %s7009_s28 }
 0xe8e   : > { %s9944_s28 = smov %s7013_s29  ;;  %s9945_s29 = smov %s7229_s18 }
 0xe8f   : > { %s9946_s8 = smov %s7029_s10  ;;  %s9947_s10 = smov %s9953_s21 }
 0xe90   :  { %24 = sbr.rel (!%p22_p8) target bundleno = 16 (0x10), region = 119 }
 0xe95   :  { %4960 = vsyncpa [#allocation4], 1 }
 0xe96   :  { %4962 = vsyncpa [#allocation4 + $0x1], 1 }
 0xe97   :  { %4963 = vsyncpa [#allocation7], 1 }
 0xe98   :  { %4964 = vsyncpa [#allocation10], 1 }
 0xe99   :  { %4965 = vsyncpa [#allocation5], 1 }
 0xe9a   :  { %4967 = vsyncpa [#allocation5 + $0x1], 1 }

</bundles_post_ra>
